<compile_context>
chip_gen: v7x
topology: tpu7x:2x2x1
jax: 0.10.0
libtpu: 0.0.40
codegen_flags: <defaults>
</compile_context>

<pallas_src>
import math

import jax
import jax.numpy as jnp
from jax.experimental import pallas as pl
from jax.experimental.pallas import tpu as pltpu


def make_attention_block_kernel(num_head: int, head_dim: int, c: int, tq: int, tkv: int):
    nh, d, C = num_head, head_dim, c

    def kernel(xq_ref, xkv_ref, wq_ref, wk_ref, wv_ref, wc_ref, bias_ref,
               o_ref, q_scr, m_scr, l_scr, acc_scr):
        ki = pl.program_id(2)

        # ---- init (first kv tile of this (batch, q-tile)): Q projection + softmax state
        @pl.when(ki == 0)
        def _init():
            xq = xq_ref[0].astype(jnp.bfloat16)                                  # (C, tq)
            # scale already folded into wq
            q = jnp.dot(wq_ref[...], xq, preferred_element_type=jnp.float32)     # (C, tq)
            # one transpose per (batch, q-tile) so the QK^T einsum is in standard
            # (h, m, k) x (h, k, n) form (no per-kv-step relayouts anywhere).
            q_scr[...] = jnp.transpose(q.reshape(nh, d, tq), (0, 2, 1)).astype(jnp.bfloat16)
            m_scr[...] = jnp.full((nh, tq), -jnp.inf, dtype=jnp.float32)
            l_scr[...] = jnp.zeros((nh, tq), dtype=jnp.float32)
            acc_scr[...] = jnp.zeros((nh, d, tq), dtype=jnp.float32)

        # ---- K/V projection for this kv tile (channels-major: head split is free)
        xkv = xkv_ref[0].astype(jnp.bfloat16)                                    # (C, tkv)
        k = jnp.dot(wk_ref[...], xkv, preferred_element_type=jnp.float32)        # (C, tkv)
        v = jnp.dot(wv_ref[...], xkv, preferred_element_type=jnp.float32)        # (C, tkv)
        k = k.reshape(nh, d, tkv).astype(jnp.bfloat16)      # free sublane-dim split
        v = v.reshape(nh, d, tkv).astype(jnp.bfloat16)

        q = q_scr[...]                                                           # (nh, tq, d)

        # ---- batched (all heads at once) attention with online softmax, f32 stats
        s = jnp.einsum('hqd,hdk->hqk', q, k,
                       preferred_element_type=jnp.float32)                       # (nh, tq, tkv)
        m_prev = m_scr[...]                                                      # (nh, tq)
        m_new = jnp.maximum(m_prev, jnp.max(s, axis=-1))
        alpha = jnp.exp(m_prev - m_new)                                          # (nh, tq)
        p = jnp.exp(s - m_new[:, :, None])                                       # (nh, tq, tkv)
        l_scr[...] = alpha * l_scr[...] + jnp.sum(p, axis=-1)
        pv = jnp.einsum('hdk,hqk->hdq', v, p.astype(jnp.bfloat16),
                        preferred_element_type=jnp.float32)                      # (nh, d, tq)
        acc_scr[...] = alpha[:, None, :] * acc_scr[...] + pv
        m_scr[...] = m_new

        # ---- finalize (last kv tile): normalize, output projection, bias, residual
        @pl.when(ki == pl.num_programs(2) - 1)
        def _finalize():
            inv_l = 1.0 / l_scr[...]                      # exact divide, once per q tile
            res = (acc_scr[...] * inv_l[:, None, :]).reshape(C, tq)              # (C, tq)
            out = jnp.dot(wc_ref[...], res.astype(jnp.bfloat16),
                          preferred_element_type=jnp.float32) + bias_ref[...]
            o_ref[0] = (out + xq_ref[0]).astype(o_ref.dtype)

    return kernel


def _pick_tile(hw: int, target: int) -> int:
    """Largest multiple of 128 that divides hw and is <= target, else the full extent."""
    if hw <= target:
        return hw
    t = (target // 128) * 128
    while t >= 128:
        if hw % t == 0:
            return t
        t -= 128
    return hw


def attention_block_pallas(x, w_qkv, w_conv, b_conv, num_head, tq=None, tkv=None):
    """x: (B, C, H, W) float32 (NCHW, like the PyTorch module)."""
    B, C, H, W = x.shape
    HW = H * W
    assert C % num_head == 0 and C // num_head > 0
    d = C // num_head
    scale = 1.0 / math.sqrt(d)

    # Defaults sized for v7x VMEM; on v5e/v6e larger tiles (and a larger vmem limit) amortize
    # per-step overhead better.
    if tq is None:
        tq = _pick_tile(HW, 256)
    if tkv is None:
        tkv = _pick_tile(HW, 512)
    assert HW % tq == 0 and HW % tkv == 0, "tiles must divide H*W"
    assert tq == HW or tq % 128 == 0, "q tile must be lane-aligned (multiple of 128) or full"
    assert tkv == HW or tkv % 128 == 0, "kv tile must be lane-aligned (multiple of 128) or full"
    n_q, n_kv = HW // tq, HW // tkv

    # Channels-major layout: free reshape only, no HBM transpose.
    x_cm = x.reshape(B, C, HW)                                                   # (B, C, HW)

    # Split the 1x1-conv QKV weight into per-head-contiguous Q/K/V slabs (rows ordered
    # h-major, dim-within-head minor), fold the softmax scale into Wq, cast to bf16 for MXU.
    w = w_qkv.reshape(num_head, 3, d, C)                 # row index = h*3d + chunk*d + dd
    wq = (w[:, 0].reshape(C, C) * scale).astype(jnp.bfloat16)                    # (C, C)
    wk = w[:, 1].reshape(C, C).astype(jnp.bfloat16)                              # (C, C)
    wv = w[:, 2].reshape(C, C).astype(jnp.bfloat16)                              # (C, C)
    wc = w_conv.reshape(C, C).astype(jnp.bfloat16)                               # (C, C)
    bias = b_conv.reshape(C, 1).astype(jnp.float32)                              # (C, 1)

    kernel = make_attention_block_kernel(num_head, d, C, tq, tkv)

    out_cm = pl.pallas_call(
        kernel,
        out_shape=jax.ShapeDtypeStruct((B, C, HW), x.dtype),
        grid_spec=pltpu.PrefetchScalarGridSpec(
            num_scalar_prefetch=0,
            grid=(B, n_q, n_kv),
            in_specs=[
                pl.BlockSpec((1, C, tq), lambda b, qi, ki: (b, 0, qi)),   # x: Q path + residual
                pl.BlockSpec((1, C, tkv), lambda b, qi, ki: (b, 0, ki)),  # x: KV tile stream
                pl.BlockSpec((C, C), lambda b, qi, ki: (0, 0)),           # Wq (scaled)
                pl.BlockSpec((C, C), lambda b, qi, ki: (0, 0)),           # Wk
                pl.BlockSpec((C, C), lambda b, qi, ki: (0, 0)),           # Wv
                pl.BlockSpec((C, C), lambda b, qi, ki: (0, 0)),           # W_out (conv)
                pl.BlockSpec((C, 1), lambda b, qi, ki: (0, 0)),           # conv bias
            ],
            out_specs=pl.BlockSpec((1, C, tq), lambda b, qi, ki: (b, 0, qi)),
            scratch_shapes=[
                pltpu.VMEM((num_head, tq, d), jnp.bfloat16),   # Q (resident per q tile)
                pltpu.VMEM((num_head, tq), jnp.float32),       # running max m (lane-dense)
                pltpu.VMEM((num_head, tq), jnp.float32),       # running sum l (lane-dense)
                pltpu.VMEM((num_head, d, tq), jnp.float32),    # un-normalized acc (lane=tq)
            ],
        ),
        compiler_params=pltpu.CompilerParams(
            dimension_semantics=("parallel", "parallel", "arbitrary"),
            vmem_limit_bytes=48 * 1024 * 1024,
        ),
    )(x_cm, x_cm, wq, wk, wv, wc, bias)

    return out_cm.reshape(B, C, H, W)                     # free reshape back to NCHW


def attention_block_ref(x, w_qkv, w_conv, b_conv, num_head):
    """Pure-JAX f32 reference mirroring the PyTorch forward exactly."""
    B, C, H, W = x.shape
    d = C // num_head
    x_ = jnp.einsum('oc,bchw->bohw', w_qkv.reshape(3 * C, C), x)
    x_ = x_.reshape(B, num_head, 3 * d, H, W)
    q, k, v = x_[:, :, :d], x_[:, :, d:2 * d], x_[:, :, 2 * d:]
    q = q.reshape(B * num_head, d, H * W)
    k = k.reshape(B * num_head, d, H * W)
    v = v.reshape(B * num_head, d, H * W)
    scale = 1.0 / math.sqrt(d)
    qT = jnp.transpose(q, (0, 2, 1)) * scale
    vT = jnp.transpose(v, (0, 2, 1))
    attn = jax.nn.softmax(jnp.matmul(qT, k), axis=-1)
    result = jnp.transpose(jnp.matmul(attn, vT), (0, 2, 1)).reshape(B, C, H, W)
    out = jnp.einsum('oc,bchw->bohw', w_conv.reshape(C, C), result) \
        + b_conv.reshape(1, C, 1, 1)
    return out + x


if __name__ == "__main__":
    B, C, H, W = 2, 32, 16, 16
    num_head = 4

    key = jax.random.PRNGKey(0)
    kx, kq, kc, kb = jax.random.split(key, 4)

    x = jax.random.normal(kx, (B, C, H, W), dtype=jnp.float32)
    # Shapes per nn.Conv2d with kernel_size=1.
    w_qkv = jax.random.normal(kq, (3 * C, C, 1, 1), dtype=jnp.float32) * (1.0 / math.sqrt(C))
    w_conv = jax.random.normal(kc, (C, C, 1, 1), dtype=jnp.float32) * (1.0 / math.sqrt(C))
    b_conv = jax.random.normal(kb, (C,), dtype=jnp.float32) * 0.1

    # HW = 256 with tq = tkv = 128 -> grid (B, 2, 2): exercises both q-tiling and the
    # online-softmax accumulation across kv tiles, with lane-aligned tiles.
    out = attention_block_pallas(x, w_qkv, w_conv, b_conv, num_head, tq=128, tkv=128)
    out = jax.block_until_ready(out)

    ref = attention_block_ref(x, w_qkv, w_conv, b_conv, num_head)
    assert out.shape == (B, C, H, W)
    # bf16 MXU inputs (f32 accumulation / softmax, exact normalization) vs f32 reference.
    max_err = jnp.max(jnp.abs(out - ref))
    assert jnp.allclose(out, ref, atol=5e-2, rtol=5e-2), f"max abs err {max_err}"

    print("KERNEL_OK")
</pallas_src>

<mosaic_0001>
module attributes {stable_mosaic.version = 11 : i64} {
  func.func @kernel(%arg0: i32, %arg1: i32, %arg2: i32, %arg3: memref<1x32x128xf32, #tpu.memory_space<vmem>>, %arg4: memref<1x32x128xf32, #tpu.memory_space<vmem>>, %arg5: memref<32x32xbf16, #tpu.memory_space<vmem>>, %arg6: memref<32x32xbf16, #tpu.memory_space<vmem>>, %arg7: memref<32x32xbf16, #tpu.memory_space<vmem>>, %arg8: memref<32x32xbf16, #tpu.memory_space<vmem>>, %arg9: memref<32x1xf32, #tpu.memory_space<vmem>>, %arg10: memref<1x32x128xf32, #tpu.memory_space<vmem>>, %arg11: memref<4x128x8xbf16, #tpu.memory_space<vmem>>, %arg12: memref<4x128xf32, #tpu.memory_space<vmem>>, %arg13: memref<4x128xf32, #tpu.memory_space<vmem>>, %arg14: memref<4x8x128xf32, #tpu.memory_space<vmem>>) attributes {dimension_semantics = [#tpu.dimension_semantics<parallel>, #tpu.dimension_semantics<parallel>, #tpu.dimension_semantics<arbitrary>], iteration_bounds = array<i64: 2, 2, 2>, scalar_prefetch = 0 : i64, scratch_operands = 4 : i64, tpu.core_type = #tpu.core_type<tc>, window_params = [{transform_indices = @transform_0, window_bounds = array<i64: 1, 32, 128>}, {transform_indices = @transform_1, window_bounds = array<i64: 1, 32, 128>}, {pipeline_mode = #tpu.pipeline_mode<synchronous>, transform_indices = @transform_2, window_bounds = array<i64: 32, 32>}, {pipeline_mode = #tpu.pipeline_mode<synchronous>, transform_indices = @transform_3, window_bounds = array<i64: 32, 32>}, {pipeline_mode = #tpu.pipeline_mode<synchronous>, transform_indices = @transform_4, window_bounds = array<i64: 32, 32>}, {pipeline_mode = #tpu.pipeline_mode<synchronous>, transform_indices = @transform_5, window_bounds = array<i64: 32, 32>}, {pipeline_mode = #tpu.pipeline_mode<synchronous>, transform_indices = @transform_6, window_bounds = array<i64: 32, 1>}, {transform_indices = @transform_7, window_bounds = array<i64: 1, 32, 128>}]} {
    %c0_i32 = arith.constant 0 : i32
    %0 = arith.cmpi eq, %arg2, %c0_i32 : i32
    %1 = arith.extui %0 : i1 to i32
    %c0_i32_0 = arith.constant 0 : i32
    %2 = arith.cmpi ne, %1, %c0_i32_0 : i32
    scf.if %2 {
      %c0_30 = arith.constant 0 : index
      %c0_31 = arith.constant 0 : index
      %c0_32 = arith.constant 0 : index
      %42 = vector.load %arg3[%c0_30, %c0_31, %c0_32] : memref<1x32x128xf32, #tpu.memory_space<vmem>>, vector<1x32x128xf32>
      %43 = vector.shape_cast %42 : vector<1x32x128xf32> to vector<32x128xf32>
      %44 = arith.truncf %43 : vector<32x128xf32> to vector<32x128xbf16>
      %c0_33 = arith.constant 0 : index
      %c0_34 = arith.constant 0 : index
      %45 = vector.load %arg5[%c0_33, %c0_34] : memref<32x32xbf16, #tpu.memory_space<vmem>>, vector<32x32xbf16>
      %cst_35 = arith.constant dense<0.000000e+00> : vector<32x128xf32>
      %46 = tpu.matmul %45, %44, %cst_35 {dimension_numbers = #tpu.dot_dimension_numbers<[1], [0], [0], [1], [0, 0, 1, 1], [], []>} : vector<32x32xbf16>, vector<32x128xbf16>, vector<32x128xf32> -> vector<32x128xf32>
      %47 = vector.shape_cast %46 : vector<32x128xf32> to vector<4x8x128xf32>
      %48 = tpu.transpose %47, [0, 2, 1] : vector<4x8x128xf32> -> vector<4x128x8xf32>
      %49 = arith.truncf %48 : vector<4x128x8xf32> to vector<4x128x8xbf16>
      %c0_36 = arith.constant 0 : index
      %c0_37 = arith.constant 0 : index
      %c0_38 = arith.constant 0 : index
      %50 = vector.load %arg11[%c0_36, %c0_37, %c0_38] : memref<4x128x8xbf16, #tpu.memory_space<vmem>>, vector<4x128x8xbf16>
      tpu.vector_store %arg11[%c0_36, %c0_37, %c0_38], %49 {strides = array<i32>} : memref<4x128x8xbf16, #tpu.memory_space<vmem>>, vector<4x128x8xbf16>,
      %cst_39 = arith.constant 0xFF800000 : f32
      %51 = vector.broadcast %cst_39 : f32 to vector<4x128xf32>
      %c0_40 = arith.constant 0 : index
      %c0_41 = arith.constant 0 : index
      %52 = vector.load %arg12[%c0_40, %c0_41] : memref<4x128xf32, #tpu.memory_space<vmem>>, vector<4x128xf32>
      tpu.vector_store %arg12[%c0_40, %c0_41], %51 {strides = array<i32>} : memref<4x128xf32, #tpu.memory_space<vmem>>, vector<4x128xf32>,
      %cst_42 = arith.constant 0.000000e+00 : f32
      %53 = vector.broadcast %cst_42 : f32 to vector<4x128xf32>
      %c0_43 = arith.constant 0 : index
      %c0_44 = arith.constant 0 : index
      %54 = vector.load %arg13[%c0_43, %c0_44] : memref<4x128xf32, #tpu.memory_space<vmem>>, vector<4x128xf32>
      tpu.vector_store %arg13[%c0_43, %c0_44], %53 {strides = array<i32>} : memref<4x128xf32, #tpu.memory_space<vmem>>, vector<4x128xf32>,
      %cst_45 = arith.constant 0.000000e+00 : f32
      %55 = vector.broadcast %cst_45 : f32 to vector<4x8x128xf32>
      %c0_46 = arith.constant 0 : index
      %c0_47 = arith.constant 0 : index
      %c0_48 = arith.constant 0 : index
      %56 = vector.load %arg14[%c0_46, %c0_47, %c0_48] : memref<4x8x128xf32, #tpu.memory_space<vmem>>, vector<4x8x128xf32>
      tpu.vector_store %arg14[%c0_46, %c0_47, %c0_48], %55 {strides = array<i32>} : memref<4x8x128xf32, #tpu.memory_space<vmem>>, vector<4x8x128xf32>,
    } else {
    }
    %c0 = arith.constant 0 : index
    %c0_1 = arith.constant 0 : index
    %c0_2 = arith.constant 0 : index
    %3 = vector.load %arg4[%c0, %c0_1, %c0_2] : memref<1x32x128xf32, #tpu.memory_space<vmem>>, vector<1x32x128xf32>
    %4 = vector.shape_cast %3 : vector<1x32x128xf32> to vector<32x128xf32>
    %5 = arith.truncf %4 : vector<32x128xf32> to vector<32x128xbf16>
    %c0_3 = arith.constant 0 : index
    %c0_4 = arith.constant 0 : index
    %6 = vector.load %arg6[%c0_3, %c0_4] : memref<32x32xbf16, #tpu.memory_space<vmem>>, vector<32x32xbf16>
    %cst = arith.constant dense<0.000000e+00> : vector<32x128xf32>
    %7 = tpu.matmul %6, %5, %cst {dimension_numbers = #tpu.dot_dimension_numbers<[1], [0], [0], [1], [0, 0, 1, 1], [], []>} : vector<32x32xbf16>, vector<32x128xbf16>, vector<32x128xf32> -> vector<32x128xf32>
    %c0_5 = arith.constant 0 : index
    %c0_6 = arith.constant 0 : index
    %8 = vector.load %arg7[%c0_5, %c0_6] : memref<32x32xbf16, #tpu.memory_space<vmem>>, vector<32x32xbf16>
    %cst_7 = arith.constant dense<0.000000e+00> : vector<32x128xf32>
    %9 = tpu.matmul %8, %5, %cst_7 {dimension_numbers = #tpu.dot_dimension_numbers<[1], [0], [0], [1], [0, 0, 1, 1], [], []>} : vector<32x32xbf16>, vector<32x128xbf16>, vector<32x128xf32> -> vector<32x128xf32>
    %10 = vector.shape_cast %7 : vector<32x128xf32> to vector<4x8x128xf32>
    %11 = arith.truncf %10 : vector<4x8x128xf32> to vector<4x8x128xbf16>
    %12 = vector.shape_cast %9 : vector<32x128xf32> to vector<4x8x128xf32>
    %13 = arith.truncf %12 : vector<4x8x128xf32> to vector<4x8x128xbf16>
    %c0_8 = arith.constant 0 : index
    %c0_9 = arith.constant 0 : index
    %c0_10 = arith.constant 0 : index
    %14 = vector.load %arg11[%c0_8, %c0_9, %c0_10] : memref<4x128x8xbf16, #tpu.memory_space<vmem>>, vector<4x128x8xbf16>
    "tpu.trace_start"() <{level = 10 : i32, message = "hqd,hdk->hqk"}> : () -> ()
    %cst_11 = arith.constant dense<0.000000e+00> : vector<4x128x128xf32>
    %15 = tpu.matmul %14, %11, %cst_11 {dimension_numbers = #tpu.dot_dimension_numbers<[2], [1], [1], [2], [0, 0, 0, 1, 1, 2], [0], [0]>} : vector<4x128x8xbf16>, vector<4x8x128xbf16>, vector<4x128x128xf32> -> vector<4x128x128xf32>
    "tpu.trace_stop"() : () -> ()
    %c0_12 = arith.constant 0 : index
    %c0_13 = arith.constant 0 : index
    %16 = vector.load %arg12[%c0_12, %c0_13] : memref<4x128xf32, #tpu.memory_space<vmem>>, vector<4x128xf32>
    %cst_14 = arith.constant dense<0xFF800000> : vector<4x128xf32>
    %17 = vector.multi_reduction <maximumf>, %15, %cst_14 [2] : vector<4x128x128xf32> to vector<4x128xf32>
    %18 = arith.maximumf %16, %17 : vector<4x128xf32>
    %19 = arith.subf %16, %18 : vector<4x128xf32>
    %20 = math.exp %19 : vector<4x128xf32>
    %21 = vector.shape_cast %18 : vector<4x128xf32> to vector<4x128x1xf32>
    %22 = vector.broadcast %21 : vector<4x128x1xf32> to vector<4x128x128xf32>
    %23 = arith.subf %15, %22 : vector<4x128x128xf32>
    %24 = math.exp %23 : vector<4x128x128xf32>
    %c0_15 = arith.constant 0 : index
    %c0_16 = arith.constant 0 : index
    %25 = vector.load %arg13[%c0_15, %c0_16] : memref<4x128xf32, #tpu.memory_space<vmem>>, vector<4x128xf32>
    %26 = arith.mulf %20, %25 : vector<4x128xf32>
    %cst_17 = arith.constant dense<0.000000e+00> : vector<4x128xf32>
    %27 = vector.multi_reduction <add>, %24, %cst_17 [2] : vector<4x128x128xf32> to vector<4x128xf32>
    %28 = arith.addf %26, %27 : vector<4x128xf32>
    %c0_18 = arith.constant 0 : index
    %c0_19 = arith.constant 0 : index
    %29 = vector.load %arg13[%c0_18, %c0_19] : memref<4x128xf32, #tpu.memory_space<vmem>>, vector<4x128xf32>
    tpu.vector_store %arg13[%c0_18, %c0_19], %28 {strides = array<i32>} : memref<4x128xf32, #tpu.memory_space<vmem>>, vector<4x128xf32>,
    %30 = arith.truncf %24 : vector<4x128x128xf32> to vector<4x128x128xbf16>
    "tpu.trace_start"() <{level = 10 : i32, message = "hdk,hqk->hdq"}> : () -> ()
    %cst_20 = arith.constant dense<0.000000e+00> : vector<4x8x128xf32>
    %31 = tpu.matmul %13, %30, %cst_20 {dimension_numbers = #tpu.dot_dimension_numbers<[2], [2], [1], [1], [0, 0, 0, 1, 1, 1], [0], [0]>} : vector<4x8x128xbf16>, vector<4x128x128xbf16>, vector<4x8x128xf32> -> vector<4x8x128xf32>
    "tpu.trace_stop"() : () -> ()
    %32 = vector.shape_cast %20 : vector<4x128xf32> to vector<4x1x128xf32>
    %c0_21 = arith.constant 0 : index
    %c0_22 = arith.constant 0 : index
    %c0_23 = arith.constant 0 : index
    %33 = vector.load %arg14[%c0_21, %c0_22, %c0_23] : memref<4x8x128xf32, #tpu.memory_space<vmem>>, vector<4x8x128xf32>
    %34 = vector.broadcast %32 : vector<4x1x128xf32> to vector<4x8x128xf32>
    %35 = arith.mulf %34, %33 : vector<4x8x128xf32>
    %36 = arith.addf %35, %31 : vector<4x8x128xf32>
    %c0_24 = arith.constant 0 : index
    %c0_25 = arith.constant 0 : index
    %c0_26 = arith.constant 0 : index
    %37 = vector.load %arg14[%c0_24, %c0_25, %c0_26] : memref<4x8x128xf32, #tpu.memory_space<vmem>>, vector<4x8x128xf32>
    tpu.vector_store %arg14[%c0_24, %c0_25, %c0_26], %36 {strides = array<i32>} : memref<4x8x128xf32, #tpu.memory_space<vmem>>, vector<4x8x128xf32>,
    %c0_27 = arith.constant 0 : index
    %c0_28 = arith.constant 0 : index
    %38 = vector.load %arg12[%c0_27, %c0_28] : memref<4x128xf32, #tpu.memory_space<vmem>>, vector<4x128xf32>
    tpu.vector_store %arg12[%c0_27, %c0_28], %18 {strides = array<i32>} : memref<4x128xf32, #tpu.memory_space<vmem>>, vector<4x128xf32>,
    %c1_i32 = arith.constant 1 : i32
    %39 = arith.cmpi eq, %arg2, %c1_i32 : i32
    %40 = arith.extui %39 : i1 to i32
    %c0_i32_29 = arith.constant 0 : i32
    %41 = arith.cmpi ne, %40, %c0_i32_29 : i32
    scf.if %41 {
      %c0_30 = arith.constant 0 : index
      %c0_31 = arith.constant 0 : index
      %42 = vector.load %arg13[%c0_30, %c0_31] : memref<4x128xf32, #tpu.memory_space<vmem>>, vector<4x128xf32>
      %cst_32 = arith.constant 1.000000e+00 : f32
      %43 = vector.broadcast %cst_32 : f32 to vector<4x128xf32>
      %44 = arith.divf %43, %42 : vector<4x128xf32>
      %c0_33 = arith.constant 0 : index
      %c0_34 = arith.constant 0 : index
      %c0_35 = arith.constant 0 : index
      %45 = vector.load %arg14[%c0_33, %c0_34, %c0_35] : memref<4x8x128xf32, #tpu.memory_space<vmem>>, vector<4x8x128xf32>
      %46 = vector.shape_cast %44 : vector<4x128xf32> to vector<4x1x128xf32>
      %47 = vector.broadcast %46 : vector<4x1x128xf32> to vector<4x8x128xf32>
      %48 = arith.mulf %45, %47 : vector<4x8x128xf32>
      %49 = vector.shape_cast %48 : vector<4x8x128xf32> to vector<32x128xf32>
      %c0_36 = arith.constant 0 : index
      %c0_37 = arith.constant 0 : index
      %50 = vector.load %arg8[%c0_36, %c0_37] : memref<32x32xbf16, #tpu.memory_space<vmem>>, vector<32x32xbf16>
      %51 = arith.truncf %49 : vector<32x128xf32> to vector<32x128xbf16>
      %cst_38 = arith.constant dense<0.000000e+00> : vector<32x128xf32>
      %52 = tpu.matmul %50, %51, %cst_38 {dimension_numbers = #tpu.dot_dimension_numbers<[1], [0], [0], [1], [0, 0, 1, 1], [], []>} : vector<32x32xbf16>, vector<32x128xbf16>, vector<32x128xf32> -> vector<32x128xf32>
      %c0_39 = arith.constant 0 : index
      %c0_40 = arith.constant 0 : index
      %53 = vector.load %arg9[%c0_39, %c0_40] : memref<32x1xf32, #tpu.memory_space<vmem>>, vector<32x1xf32>
      %54 = vector.broadcast %53 : vector<32x1xf32> to vector<32x128xf32>
      %55 = arith.addf %52, %54 : vector<32x128xf32>
      %c0_41 = arith.constant 0 : index
      %c0_42 = arith.constant 0 : index
      %c0_43 = arith.constant 0 : index
      %56 = vector.load %arg3[%c0_41, %c0_42, %c0_43] : memref<1x32x128xf32, #tpu.memory_space<vmem>>, vector<1x32x128xf32>
      %57 = vector.shape_cast %56 : vector<1x32x128xf32> to vector<32x128xf32>
      %58 = arith.addf %55, %57 : vector<32x128xf32>
      %c0_44 = arith.constant 0 : index
      %c0_45 = arith.constant 0 : index
      %c0_46 = arith.constant 0 : index
      %59 = vector.load %arg10[%c0_44, %c0_45, %c0_46] : memref<1x32x128xf32, #tpu.memory_space<vmem>>, vector<1x32x128xf32>
      %60 = vector.shape_cast %59 : vector<1x32x128xf32> to vector<32x128xf32>
      %61 = vector.shape_cast %58 : vector<32x128xf32> to vector<1x32x128xf32>
      tpu.vector_store %arg10[%c0_44, %c0_45, %c0_46], %61 {strides = array<i32>} : memref<1x32x128xf32, #tpu.memory_space<vmem>>, vector<1x32x128xf32>,
    } else {
    }
    return
  }
  func.func @transform_0(%arg0: i32, %arg1: i32, %arg2: i32) -> (i32, i32, i32) {
    %c0_i32 = arith.constant 0 : i32
    %c0_i32_0 = arith.constant 0 : i32
    return %arg0, %c0_i32, %arg1 : i32, i32, i32
  }
  func.func @transform_1(%arg0: i32, %arg1: i32, %arg2: i32) -> (i32, i32, i32) {
    %c0_i32 = arith.constant 0 : i32
    %c0_i32_0 = arith.constant 0 : i32
    return %arg0, %c0_i32, %arg2 : i32, i32, i32
  }
  func.func @transform_2(%arg0: i32, %arg1: i32, %arg2: i32) -> (i32, i32) {
    %c0_i32 = arith.constant 0 : i32
    %c0_i32_0 = arith.constant 0 : i32
    %c0_i32_1 = arith.constant 0 : i32
    return %c0_i32, %c0_i32_0 : i32, i32
  }
  func.func @transform_3(%arg0: i32, %arg1: i32, %arg2: i32) -> (i32, i32) {
    %c0_i32 = arith.constant 0 : i32
    %c0_i32_0 = arith.constant 0 : i32
    %c0_i32_1 = arith.constant 0 : i32
    return %c0_i32, %c0_i32_0 : i32, i32
  }
  func.func @transform_4(%arg0: i32, %arg1: i32, %arg2: i32) -> (i32, i32) {
    %c0_i32 = arith.constant 0 : i32
    %c0_i32_0 = arith.constant 0 : i32
    %c0_i32_1 = arith.constant 0 : i32
    return %c0_i32, %c0_i32_0 : i32, i32
  }
  func.func @transform_5(%arg0: i32, %arg1: i32, %arg2: i32) -> (i32, i32) {
    %c0_i32 = arith.constant 0 : i32
    %c0_i32_0 = arith.constant 0 : i32
    %c0_i32_1 = arith.constant 0 : i32
    return %c0_i32, %c0_i32_0 : i32, i32
  }
  func.func @transform_6(%arg0: i32, %arg1: i32, %arg2: i32) -> (i32, i32) {
    %c0_i32 = arith.constant 0 : i32
    %c0_i32_0 = arith.constant 0 : i32
    %c0_i32_1 = arith.constant 0 : i32
    return %c0_i32, %c0_i32_0 : i32, i32
  }
  func.func @transform_7(%arg0: i32, %arg1: i32, %arg2: i32) -> (i32, i32, i32) {
    %c0_i32 = arith.constant 0 : i32
    %c0_i32_0 = arith.constant 0 : i32
    return %arg0, %c0_i32, %arg1 : i32, i32, i32
  }
}

</mosaic_0001>

<bundles_post_ra>
// kernel: tpu_custom_call.1
= control target key start
LH: loop header
LB: loop body
LE: loop exit
PB: predicated region body
PF: predicated region fallthrough
CT: control target
= control target key end

     0   :  { %s6020_s0 = inlined_call_operand.hbm [shape: f32[2,32,256], index: 0, kind: input, shape index: {}]   ;;  %s6021_s1 = inlined_call_operand.hbm [shape: f32[2,32,256], index: 1, kind: input, shape index: {}]   ;;  %s6022_s2 = inlined_call_operand.vmem [shape: bf16[32,32], index: 2, kind: input, shape index: {}]   ;;  %s6023_s3 = inlined_call_operand.vmem [shape: bf16[32,32], index: 3, kind: input, shape index: {}]   ;;  %s6024_s4 = inlined_call_operand.vmem [shape: bf16[32,32], index: 4, kind: input, shape index: {}]   ;;  %s6025_s5 = inlined_call_operand.hbm [shape: bf16[32,32], index: 5, kind: input, shape index: {}]   ;;  %s6026_s6 = inlined_call_operand.vmem [shape: f32[32,1], index: 6, kind: input, shape index: {}]   ;;  %s6027_s7 = inlined_call_operand.hbm [shape: f32[2,32,256], index: 7, kind: output, shape index: {}]  }
   0x1   :  { %6126 = sst [smem:[#allocation102_spill]] %s6020_s0 }
   0x2   :  { %6127 = sst [smem:[#allocation103_spill]] %s6022_s2 }
   0x3   :  { %6128 = sst [smem:[#allocation104_spill]] %s6023_s3 }
   0x4   :  { %6129 = sst [smem:[#allocation105_spill]] %s6024_s4 }
   0x5   :  { %6130 = sst [smem:[#allocation106_spill]] %s6025_s5 }
   0x6   :  { %6131 = sst [smem:[#allocation107_spill]] %s6026_s6 }
   0x7   :  { %6132 = sst [smem:[#allocation108_spill]] %s6027_s7 }
   0x8   :  { %12 = vsyncpa [#allocation7], 0 }
   0x9   :  { %14 = vsyncpa [#allocation7 + $0x1], 0 }
   0xa   :  { %15 = vsyncpa [#allocation10], 0 }
   0xb   :  { %17 = vsyncpa [#allocation10 + $0x1], 0 }
   0xc   :  { %18 = vsyncpa [#allocation8], 0 }
   0xd   :  { %20 = vsyncpa [#allocation8 + $0x1], 0  ;;  %s4528_s24 = smov 0   ;;  %s4530_s25 = smov 0  }
   0xe   :  { %s4532_s26 = smov 0   ;;  %s4534_s27 = smov 0  }
   0xf   :  { %s4536_s28 = smov 0   ;;  %s4538_s29 = smov 0  }
  0x10   :  { %s4540_s30 = smov 0   ;;  %s4542_s8 = smov 0  }
  0x11   :  { %s4544_s9 = smov 0   ;;  %s4546_s10 = smov 0  }
  0x12   :  { %s4548_s11 = smov 0   ;;  %s4550_s12 = smov 0  }
  0x13   :  { %s4552_s13 = smov 0  }
  0x14 LB: > { %6133 = sst [smem:[#allocation17_spill]] %s4424_s25  ;;  %s4592_s14 = sadd.s32 4294967295, %s4468_s13   ;;  %s4468_s13 = sphi %s4552_s13, %s26_s13   ;;  %s4464_s12 = sphi %s4550_s12, %s6368_s12   ;;  %s4460_s11 = sphi %s4548_s11, %s6367_s11   ;;  %s4456_s10 = sphi %s4546_s10, %s6366_s10   ;;  %s4452_s9 = sphi %s4544_s9, %s6365_s9   ;;  %s4448_s8 = sphi %s4542_s8, %s6364_s8   ;;  %s4444_s30 = sphi %s4540_s30, %s6363_s30   ;;  %s4440_s29 = sphi %s4538_s29, %s6362_s29   ;;  %s4436_s28 = sphi %s4536_s28, %s6361_s28   ;;  %s4432_s27 = sphi %s4534_s27, %s6360_s27   ;;  %s4428_s26 = sphi %s4532_s26, %s6359_s26   ;;  %s4424_s25 = sphi %s4530_s25, %s6358_s25   ;;  %s4420_s24 = sphi %s4528_s24, %s6355_s24  }
  0x15   : > { %6134 = sst [smem:[#allocation18_spill]] %s4432_s27  ;;  %s3434_s15 = sadd.s32 4294967294, %s4468_s13  }
  0x16   : > { %6135 = sst [smem:[#allocation19_spill]] %s4444_s30  ;;  %p6033_p0 = scmp.eq.s32.totalorder %s4468_s13, 0 }
  0x17   : > { %6136 = sst [smem:[#allocation20_spill]] %s4448_s8  ;;  %p67_p1 = scmp.ne.s32.totalorder %s4436_s28, %s4432_s27 }
  0x18   : > { %6137 = sst [smem:[#allocation21_spill]] %s4452_s9  ;;  %p6031_p2 = scmp.eq.s32.totalorder %s4592_s14, 0 }
  0x19   : > { %6138 = sst [smem:[#allocation22_spill]] %s4592_s14  ;;  %p89_p3 = scmp.ne.s32.totalorder %s4428_s26, %s4424_s25 }
  0x1a   : > { %p95_p4 = scmp.ne.s32.totalorder %s4424_s25, %s4420_s24  ;;  %p4605_p6 = por %p6031_p2, %p67_p1 }
  0x1b   : > { %p4611_p7 = por %p89_p3, %p6033_p0  ;;  %p232_p9 = scmp.eq.s32.totalorder %s3434_s15, 7 }
  0x1c   : > { %s6139_s16 = scalar_select %p4605_p6, 1, 0 }
  0x1d   : > { %p4617_p8 = por %p95_p4, %p6031_p2  ;;  %p3435_p10 = scmp.ge.s32.totalorder %s4468_s13, 1 }
  0x1e   : > { %6140 = sst [smem:[#allocation23_spill]] %s6139_s16  ;;  %p239_p11 = scmp.lt.s32.totalorder %s4468_s13, 9 }
  0x1f   : > { %s6142_s18 = scalar_select %p4617_p8, 1, 0 }
  0x20   : > { %p4623_p12 = por %p232_p9, %p67_p1  ;;  %p4627_p13 = pnand %p3435_p10, %p239_p11 }
  0x21   : > { %6143 = sst [smem:[#allocation24_spill]] %s6142_s18  ;;  %s4470_s21 = smov [#allocation11]  }
  0x22   : > { %s6144_s19 = scalar_select %p4623_p12, 1, 0 }
  0x23   : > { %s6146_s20 = scalar_select %p4627_p13, 1, 0 }
  0x24   : > { %6145 = sst [smem:[#allocation25_spill]] %s6144_s19  ;;  %s260_s22 = sshll.u32 %s4470_s21, 4  ;;  %s261_s22 = int_to_ptr.vmem [resolvable:$true] %s260_s22 }
  0x25   : > { %p3790_p3 = pneg %p4627_p13  ;;  %p6032_p1 = scmp.lt.s32.totalorder %s4468_s13, 8 }
  0x26   : > { %s6149_s5 = sld [smem:[#allocation106_spill]] }
  0x27   : > { %p4635_p4 = pnand %p3790_p3, %p6031_p2  ;;  %p4644_p9 = pnand %p6032_p1, %p4611_p7 }
  0x29   : > { %s6148_s24 = scalar_select %p4644_p9, 1, 0 }
  0x2a   : > { %p4236_p11 = pneg %p4635_p4 }
  0x2c   : > { %s4234_s21 = scalar_lea.hbm %s6149_s5, 256 }
  0x2d   : > { %p4235_p10 = scmp.ne.s32.totalorder %s6149_s5, %s4234_s21  ;;  %p4241_p5 = scmp.lt.u32.totalorder %s4234_s21, %s6149_s5 }
  0x2f   : > { %p4237_p3 = pnand %p4236_p11, %p4235_p10 }
  0x31   : > { %p4238_p2 = pneg %p4237_p3 }
  0x33   : > { %p4243_p7 = pnand %p4241_p5, %p4238_p2 }
  0x35   : > { %4246 = shalt.err (!%p4243_p7)
}
  0x36   : > { %s4247_s17 = scalar_lea.vmem %s261_s22, 256  ;;  %p4255_p8 = scmp.lt.s32.totalorder %s261_s22, %s261_s22 }
  0x37   : > { %p4248_p1 = scmp.ne.s32.totalorder %s261_s22, %s4247_s17  ;;  %p4256_p6 = scmp.lt.s32.totalorder %s4247_s17, %s4247_s17 }
  0x39   : > { %p4250_p0 = pnand %p4248_p1, %p4236_p11  ;;  %p4257_p13 = por %p4256_p6, %p4255_p8 }
  0x3b   : > { %p4251_p12 = pneg %p4250_p0 }
  0x3d   : > { %p4258_p9 = pnand %p4257_p13, %p4251_p12 }
  0x3f   : > { %4261 = shalt.err (!%p4258_p9)
}
  0x40   : > { %s4471_s7 = smov 64   ;;  %s4472_s27 = smov 4  }
  0x41   : > { %3793 = dma.hbm_to_vmem [thread:$0]  (!%p4635_p4), %s6149_s5, 256, %s261_s22, [#allocation10], %s4471_s7, %s4471_s7, %s4472_s27  }
  0x42   : > { %s38_s19 = sadd.s32 1, %s4456_s10  ;;  %s41_s15 = sadd.s32 1, %s4460_s11 }
  0x43   : > { %p39_p0 = scmp.ge.s32.totalorder %s38_s19, 2  ;;  %s45_s21 = sadd.s32 1, %s4464_s12 }
  0x44   : > { %s54_s17 = sadd.s32 1, %s4440_s29  ;;  %p61_p2 = scmp.ne.s32.totalorder %s4440_s29, %s4436_s28 }
  0x45   : > { %s6370_s19 = smov (%p39_p0, %s38_s19), 0  ;;  %s6372_s15 = smov (!%p39_p0, %s41_s15), %s4460_s11 }
  0x46   : > { %6150 = sst [smem:[#allocation26_spill]] %s6370_s19  ;;  %s78_s23 = ssub.s32 %s4456_s10, %s6370_s19 }
  0x47   : > { %p43_p5 = scmp.ge.s32.totalorder %s6372_s15, 2  ;;  %s82_s8 = sadd.s32 1, %s4428_s26 }
  0x48   : > { %p6151_p6 = scmp.eq.s32.totalorder %s4468_s13, 0  ;;  %p6153_p12 = scmp.eq.s32.totalorder %s4592_s14, 7 }
  0x49   : > { %s6374_s15 = smov (%p43_p5, %s6372_s15), 0  ;;  %s6376_s21 = smov (!%p43_p5, %s45_s21), %s4464_s12 }
  0x4a   : > { %p4678_p8 = por %p6151_p6, %p61_p2  ;;  %p4684_p13 = por %p6153_p12, %p61_p2 }
  0x4b   : > { %6156 = sst [smem:[#allocation28_spill]] %s6374_s15  ;;  %s50_s27 = ssub.s32 %s4460_s11, %s6374_s15 }
  0x4c   : > { %s6154_s7 = scalar_select %p4684_p13, 1, 0 }
  0x4d   : > { %s277_s9 = sand.u32 1, %s4440_s29   ;;  %p47_p4 = scmp.ge.s32.totalorder %s6376_s21, 2 }
  0x4e   : > { %6155 = sst [smem:[#allocation27_spill]] %s6154_s7  ;;  %s3438_s5 = sshll.u32 %s277_s9, 5 }
  0x4f   : > { %s6053_s19 = sshll.u32 %s4464_s12, 3  ;;  %s6378_s21 = smov (%p47_p4, %s6376_s21), 0 }
  0x50   : > { %s286_s6 = sadd.s32 %s4460_s11, %s6053_s19  ;;  %s49_s4 = ssub.s32 %s4464_s12, %s6378_s21 }
  0x51   : > { %s3440_s7 = sshll.u32 %s286_s6, 7  ;;  %s51_s3 = sor.u32 %s50_s27, %s49_s4 }
  0x52   : > { %s79_s2 = sor.u32 %s78_s23, %s49_s4  ;;  %p52_p1 = scmp.eq.s32.totalorder %s51_s3, 0 }
  0x53   : > { %p80_p9 = scmp.eq.s32.totalorder %s79_s2, 0  ;;  %s6157_s0 = sld [smem:[#allocation102_spill]] }
  0x54   : > { %s281_s25 = scalar_lea.vmem [#allocation6], %s3438_s5  ;;  %p6158_p10 = scmp.lt.s32.totalorder %s4468_s13, 8 }
  0x55   : > { %s289_s14 = sshll.u32 %s281_s25, 4  ;;  %s4723_s3 = scalar_lea.sflag [#allocation7], %s277_s9  ;;  %s4713_s14 = int_to_ptr.vmem [resolvable:$true] %s289_s14 }
  0x56   : > { %s4708_s16 = scalar_select %p52_p1, %s4440_s29, %s54_s17  }
  0x57   : > { %s4711_s19 = scalar_select %p80_p9, %s4428_s26, %s82_s8  }
  0x58   : > { %p4719_p11 = pnand %p6158_p10, %p4678_p8 }
  0x59   : > { %s4705_s18 = scalar_lea.hbm %s6157_s0, %s3440_s7  ;;  %s4267_s25 = scalar_lea.hbm %s6157_s0, 2048 }
  0x5a   : > { %s4262_s4 = scalar_lea.hbm %s4705_s18, 512  ;;  %p4264_p7 = pneg %p4719_p11 }
  0x5b   : > { %p4263_p3 = scmp.ne.s32.totalorder %s4705_s18, %s4262_s4  ;;  %p4268_p5 = scmp.lt.u32.totalorder %s4705_s18, %s6157_s0 }
  0x5c   : > { %p4269_p6 = scmp.lt.u32.totalorder %s4267_s25, %s4262_s4  ;;  %p4271_p12 = scmp.lt.u32.totalorder %s4262_s4, %s4705_s18 }
  0x5d   : > { %p4265_p0 = pnand %p4264_p7, %p4263_p3 }
  0x5e   : > { %p4270_p8 = por %p4269_p6, %p4268_p5 }
  0x5f   : > { %p4266_p2 = pneg %p4265_p0 }
  0x60   : > { %p4272_p4 = por %p4271_p12, %p4270_p8 }
  0x62   : > { %p4273_p1 = pnand %p4272_p4, %p4266_p2 }
  0x64   : > { %4276 = shalt.err (!%p4273_p1)
}
  0x65   : > { %s4277_s17 = scalar_lea.vmem %s4713_s14, 512  ;;  %s4473_s23 = smov [#allocation6]  }
  0x66   : > { %p4278_p9 = scmp.ne.s32.totalorder %s4713_s14, %s4277_s17  ;;  %s4282_s8 = sshll.u32 %s4473_s23, 4  ;;  %s4283_s8 = int_to_ptr.vmem [resolvable:$false] %s4282_s8 }
  0x67   : > { %s4284_s22 = scalar_lea.vmem %s4283_s8, 1024  ;;  %p4285_p0 = scmp.lt.s32.totalorder %s4713_s14, %s4283_s8 }
  0x68   : > { %p4280_p10 = pnand %p4278_p9, %p4264_p7  ;;  %p4286_p5 = scmp.lt.s32.totalorder %s4284_s22, %s4277_s17 }
  0x6a   : > { %p4281_p3 = pneg %p4280_p10  ;;  %p4287_p6 = por %p4286_p5, %p4285_p0 }
  0x6c   : > { %p4288_p8 = pnand %p4287_p6, %p4281_p3 }
  0x6e   : > { %4291 = shalt.err (!%p4288_p8)
}
  0x6f   : > { %s4474_s7 = smov 256   ;;  %s4475_s27 = smov 128  }
  0x70   : > { %s4476_s9 = smov 8   ;;  %s6160_s4 = sshll.u32 %s4464_s12, 3 }
  0x71   : > { %3797 = dma.hbm_to_vmem [thread:$0]  (!%p4719_p11), %s4705_s18, 512, %s4713_s14, %s4723_s3, %s4474_s7, %s4475_s27, %s4476_s9  }
  0x72   : > { %s308_s5 = sadd.s32 %s4456_s10, %s6160_s4  ;;  %s299_s6 = sand.u32 1, %s4468_s13  }
  0x73   : > { %s3443_s25 = sshll.u32 %s308_s5, 7  ;;  %s301_s30 = sand.u32 1, %s4428_s26  }
  0x74   : > { %s3441_s15 = sshll.u32 %s301_s30, 5  ;;  %s4762_s8 = scalar_lea.hbm %s6021_s1, %s3443_s25 }
  0x75   : > { %s303_s2 = scalar_lea.vmem [#allocation9], %s3441_s15  ;;  %s4766_s14 = scalar_lea.sflag [#allocation10], %s299_s6 }
  0x76   : > { %s311_s22 = sshll.u32 %s303_s2, 4  ;;  %s4292_s18 = scalar_lea.hbm %s4762_s8, 512  ;;  %s4764_s22 = int_to_ptr.vmem [resolvable:$true] %s311_s22 }
  0x77   : > { %p4293_p11 = scmp.ne.s32.totalorder %s4762_s8, %s4292_s18  ;;  %p6161_p7 = scmp.ne.s32.totalorder %s6148_s24, 0 }
  0x78   : > { %s4297_s5 = scalar_lea.hbm %s6021_s1, 2048  ;;  %p4298_p1 = scmp.lt.u32.totalorder %s4762_s8, %s6021_s1 }
  0x79   : > { %p4294_p2 = pneg %p6161_p7  ;;  %p4299_p9 = scmp.lt.u32.totalorder %s4297_s5, %s4292_s18 }
  0x7a   : > { %p4301_p3 = scmp.lt.u32.totalorder %s4292_s18, %s4762_s8 }
  0x7b   : > { %p4295_p12 = pnand %p4294_p2, %p4293_p11  ;;  %p4300_p10 = por %p4299_p9, %p4298_p1 }
  0x7d   : > { %p4296_p4 = pneg %p4295_p12  ;;  %p4302_p0 = por %p4301_p3, %p4300_p10 }
  0x7f   : > { %p4303_p5 = pnand %p4302_p0, %p4296_p4 }
  0x81   : > { %4306 = shalt.err (!%p4303_p5)
}
  0x82   : > { %s4307_s6 = scalar_lea.vmem %s4764_s22, 512  ;;  %s4477_s15 = smov [#allocation9]  }
  0x83   : > { %p4308_p6 = scmp.ne.s32.totalorder %s4764_s22, %s4307_s6  ;;  %s4312_s17 = sshll.u32 %s4477_s15, 4  ;;  %s4313_s17 = int_to_ptr.vmem [resolvable:$false] %s4312_s17 }
  0x84   : > { %s4314_s23 = scalar_lea.vmem %s4313_s17, 1024  ;;  %p4315_p12 = scmp.lt.s32.totalorder %s4764_s22, %s4313_s17 }
  0x85   : > { %p4310_p8 = pnand %p4308_p6, %p4294_p2  ;;  %p4316_p1 = scmp.lt.s32.totalorder %s4314_s23, %s4307_s6 }
  0x87   : > { %p4311_p11 = pneg %p4310_p8  ;;  %p4317_p9 = por %p4316_p1, %p4315_p12 }
  0x89   : > { %p4318_p10 = pnand %p4317_p9, %p4311_p11 }
  0x8b   : > { %4321 = shalt.err (!%p4318_p10)
}
  0x8c   : > { %3800 = dma.hbm_to_vmem [thread:$0]  (!%p6161_p7), %s4762_s8, 512, %s4764_s22, %s4766_s14, %s4474_s7, %s4475_s27, %s4476_s9  }
  0x8d   : > { %p6162_p2 = scmp.ne.s32.totalorder %s6146_s20, 0 }
  0x8f   : > { %323 = sbr.rel (%p6162_p2) target bundleno = 2133 (0x855), region = 48 }
  0x96   : > { %s6163_s2 = sld [smem:[#allocation23_spill]]  ;;  %s4800_s18 = sand.u32 1, %s4436_s28  }
  0x97   : > { %s3445_s3 = sshll.u32 %s4800_s18, 5  ;;  %s326_s4 = scalar_lea.sflag [#allocation7], %s4800_s18 }
  0x98   : > { %s4804_s5 = scalar_lea.vmem [#allocation6], %s3445_s3 }
  0x9c   : > { %p6164_p4 = scmp.ne.s32.totalorder %s6163_s2, 0 }
  0x9e   : > { %4403 = dma.done.wait (%p6164_p4), %s326_s4, 512  }
  0x9f   : > { %4405 = vsyncadd (%p6164_p4), %s326_s4, 4294966784  ;;  %s6165_s24 = sld [smem:[#allocation22_spill]]  ;;  %s6166_s7 = sld [smem:[#allocation17_spill]] }
  0xa0   : > { %s6167_s27 = sld [smem:[#allocation24_spill]] }
  0xa5   : > { %s334_s20 = sand.u32 1, %s6165_s24   ;;  %s336_s9 = sand.u32 1, %s6166_s7  }
  0xa6   : > { %s3446_s8 = sshll.u32 %s336_s9, 5  ;;  %s335_s22 = scalar_lea.sflag [#allocation10], %s334_s20 }
  0xa7   : > { %s4812_s14 = scalar_lea.vmem [#allocation9], %s3446_s8  ;;  %p6168_p7 = scmp.ne.s32.totalorder %s6167_s27, 0 }
  0xa9   : > { %4407 = dma.done.wait (%p6168_p7), %s335_s22, 512  }
  0xaa   : > { %4409 = vsyncadd (%p6168_p7), %s335_s22, 4294966784  ;;  %p6169_p3 = scmp.eq.s32.totalorder %s6165_s24, 0 }
  0xac   : > { %4411 = dma.done.wait (%p6169_p3), [#allocation10], 256   ;;  %p6170_p0 = pmov %p6169_p3 }
  0xad   : > { %s4822_s25 = scalar_lea.vmem [#allocation12], %s3445_s3  ;;  %s6171_s30 = sld [smem:[#allocation19_spill]] }
  0xae   : > { %4413 = vsyncadd (%p6170_p0), [#allocation10], 4294967040 }
  0xb3   : > { %p3449_p5 = scmp.ne.s32.totalorder %s6171_s30, 0 }
  0xb4   : > { %v383_v0 = vld [vmem:[%s4804_s5] sm:$0xff] (!%p3449_p5)  ;;  %v384_v1 = vld [vmem:[%s4804_s5 + $0x8] sm:$0xff] (!%p3449_p5)  ;;  %v385_v2 = vld [vmem:[%s4804_s5 + $0x10] sm:$0xff] (!%p3449_p5)  ;;  %vm403_vm0 = vcmask (!%p3449_p5), 261120   ;;  %s6172_s17 = sld [smem:[#allocation103_spill]] (!%p3449_p5)  ;;  %v4478_v15 = vmov (!%p3449_p5), -inf  }
  0xb5   : > { %382 = sbr.rel (%p3449_p5) target bundleno = 666 (0x29a), region = 64  ;;  %v387_v3 = vpack.c.bf16 (!%p3449_p5), %v384_v1, %v383_v0  ;;  %v386_v4 = vld [vmem:[%s4804_s5 + $0x18] sm:$0xff] (!%p3449_p5)  ;;  %652 = vst [vmem:[#allocation3] sm:$0xf] (!%p3449_p5), %v4478_v15  ;;  %v4479_v16 = vmov (!%p3449_p5), 0.0   ;;  %vm619_vm1 = vcmask (!%p3449_p5), 64512  }
  0xb6   : > { %v388_v5 = vpack.c.bf16 (!%p3449_p5), %v386_v4, %v385_v2  ;;  %653 = vst [vmem:[#allocation4] sm:$0xf] (!%p3449_p5), %v4479_v16  ;;  %654 = vst [vmem:[#allocation5] sm:$0xff] (!%p3449_p5), %v4479_v16 }
  0xb7   : > { %3592 = vmatprep.subr.bf16.mxu0 (!%p3449_p5), %v387_v3  ;;  %655 = vst [vmem:[#allocation5 + $0x8] sm:$0xff] (!%p3449_p5), %v4479_v16  ;;  %656 = vst [vmem:[#allocation5 + $0x10] sm:$0xff] (!%p3449_p5), %v4479_v16 }
  0xb8   : > { %3593 = vmatpush3.bf16.msra.mxu0 (!%p3449_p5), %v387_v3  ;;  %657 = vst [vmem:[#allocation5 + $0x18] sm:$0xff] (!%p3449_p5), %v4479_v16 }
  0xb9   : > { %3594 = vmatprep.subr.bf16.mxu0 (!%p3449_p5), %v388_v5 }
  0xba   : > { %v4092_v6 = vld [vmem:[%s6172_s17] sm:$0xff] (!%p3449_p5)   ;;  %v4093_v7 = vld [vmem:[%s6172_s17 + $0x8] sm:$0xff] (!%p3449_p5)  }
  0xbb   : > { %3596 = vmatprep.mubr.msk.bf16.mxu0 (!%p3449_p5), %vm403_vm0, %v4092_v6 }
  0xbc   : > { %3595 = vmatpush3.bf16.msra.mxu0 %v388_v5 }
  0xbf   : > { %3597 = vmatmul.mubr.msk.bf16.vlgmr.msra.gmra.mrb[0].mxu0 %vm403_vm0, %v4093_v7 }
 0x192   : > { %v3598_v8 = vpop.f32.mrb[0].mxu0 }
 0x193   : > { %v444_v9 = vpop.f32.mrb[1].mxu0 }
 0x194   : > { %v3599_v10 = vpop.f32.mrb[2].mxu0 }
 0x195   : > { %v4010_v11 = vpack.i.bf16 %v3599_v10, %v3598_v8  ;;  %v447_v12 = vpop.f32.mrb[3].mxu0 }
 0x196   : > { %v3928_v13 = vpack.i.bf16 %v447_v12, %v444_v9 }
 0x198   : > { %3929 = vxpose.xlu0.b32.start.end [1/1] (short) %v3928_v13, 128 }
 0x1d5   : > { %4011 = vxpose.xlu0.b32.start.end [1/1] (short) %v4010_v11, 128 }
 0x218   : > { %v3930_v14 = vpop.trf.xlu0 }
 0x219   : > { %v3934_v17 = vunpack.i.h.bf16 %v3930_v14  ;;  %v3931_v18 = vunpack.i.l.bf16 %v3930_v14 }
 0x21c   : > { %v3935_v19 = vpop.trf.xlu0 }
 0x21d   : > { %v3939_v20 = vunpack.i.h.bf16 %v3935_v19  ;;  %v3936_v21 = vunpack.i.l.bf16 %v3935_v19 }
 0x21f   : > { %v587_v22 = vpack.c.bf16 %v3936_v21, %v3931_v18  ;;  %v595_v23 = vpack.c.bf16 %v3939_v20, %v3934_v17 }
 0x220   : > { %v3940_v24 = vpop.trf.xlu0 }
 0x221   : > { %620 = vst.msk [vmem:[#allocation2] sm:$0xff] %vm619_vm1, %v587_v22  ;;  %628 = vst.msk [vmem:[#allocation2 + $0x40] sm:$0xff] %vm619_vm1, %v595_v23  ;;  %v3944_v25 = vunpack.i.h.bf16 %v3940_v24  ;;  %v3941_v26 = vunpack.i.l.bf16 %v3940_v24 }
 0x224   : > { %v3945_v27 = vpop.trf.xlu0 }
 0x225   : > { %v3949_v28 = vunpack.i.h.bf16 %v3945_v27  ;;  %v3946_v29 = vunpack.i.l.bf16 %v3945_v27 }
 0x227   : > { %v588_v30 = vpack.c.bf16 %v3946_v29, %v3941_v26  ;;  %v596_v31 = vpack.c.bf16 %v3949_v28, %v3944_v25 }
 0x228   : > { %v3950_v32 = vpop.trf.xlu0 }
 0x229   : > { %621 = vst.msk [vmem:[#allocation2 + $0x8] sm:$0xff] %vm619_vm1, %v588_v30  ;;  %629 = vst.msk [vmem:[#allocation2 + $0x48] sm:$0xff] %vm619_vm1, %v596_v31  ;;  %v3954_v33 = vunpack.i.h.bf16 %v3950_v32  ;;  %v3951_v34 = vunpack.i.l.bf16 %v3950_v32 }
 0x22c   : > { %v3955_v35 = vpop.trf.xlu0 }
 0x22d   : > { %v3959_v36 = vunpack.i.h.bf16 %v3955_v35  ;;  %v3956_v37 = vunpack.i.l.bf16 %v3955_v35 }
 0x22f   : > { %v589_v38 = vpack.c.bf16 %v3956_v37, %v3951_v34  ;;  %v597_v39 = vpack.c.bf16 %v3959_v36, %v3954_v33 }
 0x230   : > { %v3960_v40 = vpop.trf.xlu0 }
 0x231   : > { %622 = vst.msk [vmem:[#allocation2 + $0x10] sm:$0xff] %vm619_vm1, %v589_v38  ;;  %630 = vst.msk [vmem:[#allocation2 + $0x50] sm:$0xff] %vm619_vm1, %v597_v39  ;;  %v3964_v41 = vunpack.i.h.bf16 %v3960_v40  ;;  %v3961_v42 = vunpack.i.l.bf16 %v3960_v40 }
 0x234   : > { %v3965_v43 = vpop.trf.xlu0 }
 0x235   : > { %v3969_v44 = vunpack.i.h.bf16 %v3965_v43  ;;  %v3966_v45 = vunpack.i.l.bf16 %v3965_v43 }
 0x237   : > { %v590_v46 = vpack.c.bf16 %v3966_v45, %v3961_v42  ;;  %v598_v47 = vpack.c.bf16 %v3969_v44, %v3964_v41 }
 0x238   : > { %v3970_v48 = vpop.trf.xlu0 }
 0x239   : > { %623 = vst.msk [vmem:[#allocation2 + $0x18] sm:$0xff] %vm619_vm1, %v590_v46  ;;  %631 = vst.msk [vmem:[#allocation2 + $0x58] sm:$0xff] %vm619_vm1, %v598_v47  ;;  %v3974_v49 = vunpack.i.h.bf16 %v3970_v48  ;;  %v3971_v50 = vunpack.i.l.bf16 %v3970_v48 }
 0x23c   : > { %v3975_v51 = vpop.trf.xlu0 }
 0x23d   : > { %v3979_v52 = vunpack.i.h.bf16 %v3975_v51  ;;  %v3976_v53 = vunpack.i.l.bf16 %v3975_v51 }
 0x23f   : > { %v591_v54 = vpack.c.bf16 %v3976_v53, %v3971_v50  ;;  %v599_v55 = vpack.c.bf16 %v3979_v52, %v3974_v49 }
 0x240   : > { %v3980_v56 = vpop.trf.xlu0 }
 0x241   : > { %624 = vst.msk [vmem:[#allocation2 + $0x20] sm:$0xff] %vm619_vm1, %v591_v54  ;;  %632 = vst.msk [vmem:[#allocation2 + $0x60] sm:$0xff] %vm619_vm1, %v599_v55  ;;  %v3984_v57 = vunpack.i.h.bf16 %v3980_v56  ;;  %v3981_v58 = vunpack.i.l.bf16 %v3980_v56 }
 0x244   : > { %v3985_v59 = vpop.trf.xlu0 }
 0x245   : > { %v3989_v60 = vunpack.i.h.bf16 %v3985_v59  ;;  %v3986_v61 = vunpack.i.l.bf16 %v3985_v59 }
 0x247   : > { %v592_v62 = vpack.c.bf16 %v3986_v61, %v3981_v58  ;;  %v600_v63 = vpack.c.bf16 %v3989_v60, %v3984_v57 }
 0x248   : > { %v3990_v0 = vpop.trf.xlu0 }
 0x249   : > { %625 = vst.msk [vmem:[#allocation2 + $0x28] sm:$0xff] %vm619_vm1, %v592_v62  ;;  %633 = vst.msk [vmem:[#allocation2 + $0x68] sm:$0xff] %vm619_vm1, %v600_v63  ;;  %v3994_v1 = vunpack.i.h.bf16 %v3990_v0  ;;  %v3991_v2 = vunpack.i.l.bf16 %v3990_v0 }
 0x24c   : > { %v3995_v3 = vpop.trf.xlu0 }
 0x24d   : > { %v3999_v4 = vunpack.i.h.bf16 %v3995_v3  ;;  %v3996_v5 = vunpack.i.l.bf16 %v3995_v3 }
 0x24f   : > { %v593_v6 = vpack.c.bf16 %v3996_v5, %v3991_v2  ;;  %v601_v7 = vpack.c.bf16 %v3999_v4, %v3994_v1 }
 0x250   : > { %v4000_v8 = vpop.trf.xlu0 }
 0x251   : > { %626 = vst.msk [vmem:[#allocation2 + $0x30] sm:$0xff] %vm619_vm1, %v593_v6  ;;  %634 = vst.msk [vmem:[#allocation2 + $0x70] sm:$0xff] %vm619_vm1, %v601_v7  ;;  %v4004_v9 = vunpack.i.h.bf16 %v4000_v8  ;;  %v4001_v10 = vunpack.i.l.bf16 %v4000_v8 }
 0x254   : > { %v4005_v11 = vpop.trf.xlu0 }
 0x255   : > { %v4009_v12 = vunpack.i.h.bf16 %v4005_v11  ;;  %v4006_v13 = vunpack.i.l.bf16 %v4005_v11 }
 0x257   : > { %v594_v14 = vpack.c.bf16 %v4006_v13, %v4001_v10  ;;  %v602_v15 = vpack.c.bf16 %v4009_v12, %v4004_v9 }
 0x258   : > { %v4012_v16 = vpop.trf.xlu0 }
 0x259   : > { %627 = vst.msk [vmem:[#allocation2 + $0x38] sm:$0xff] %vm619_vm1, %v594_v14  ;;  %635 = vst.msk [vmem:[#allocation2 + $0x78] sm:$0xff] %vm619_vm1, %v602_v15  ;;  %v4016_v17 = vunpack.i.h.bf16 %v4012_v16  ;;  %v4013_v18 = vunpack.i.l.bf16 %v4012_v16 }
 0x25c   : > { %v4017_v19 = vpop.trf.xlu0 }
 0x25d   : > { %v4021_v20 = vunpack.i.h.bf16 %v4017_v19  ;;  %v4018_v21 = vunpack.i.l.bf16 %v4017_v19 }
 0x25f   : > { %v603_v22 = vpack.c.bf16 %v4018_v21, %v4013_v18  ;;  %v611_v23 = vpack.c.bf16 %v4021_v20, %v4016_v17 }
 0x260   : > { %v4022_v24 = vpop.trf.xlu0 }
 0x261   : > { %636 = vst.msk [vmem:[#allocation2 + $0x80] sm:$0xff] %vm619_vm1, %v603_v22  ;;  %644 = vst.msk [vmem:[#allocation2 + $0xc0] sm:$0xff] %vm619_vm1, %v611_v23  ;;  %v4026_v25 = vunpack.i.h.bf16 %v4022_v24  ;;  %v4023_v26 = vunpack.i.l.bf16 %v4022_v24 }
 0x264   : > { %v4027_v27 = vpop.trf.xlu0 }
 0x265   : > { %v4031_v28 = vunpack.i.h.bf16 %v4027_v27  ;;  %v4028_v29 = vunpack.i.l.bf16 %v4027_v27 }
 0x267   : > { %v604_v30 = vpack.c.bf16 %v4028_v29, %v4023_v26  ;;  %v612_v31 = vpack.c.bf16 %v4031_v28, %v4026_v25 }
 0x268   : > { %v4032_v32 = vpop.trf.xlu0 }
 0x269   : > { %637 = vst.msk [vmem:[#allocation2 + $0x88] sm:$0xff] %vm619_vm1, %v604_v30  ;;  %645 = vst.msk [vmem:[#allocation2 + $0xc8] sm:$0xff] %vm619_vm1, %v612_v31  ;;  %v4036_v33 = vunpack.i.h.bf16 %v4032_v32  ;;  %v4033_v34 = vunpack.i.l.bf16 %v4032_v32 }
 0x26c   : > { %v4037_v35 = vpop.trf.xlu0 }
 0x26d   : > { %v4041_v36 = vunpack.i.h.bf16 %v4037_v35  ;;  %v4038_v37 = vunpack.i.l.bf16 %v4037_v35 }
 0x26f   : > { %v605_v38 = vpack.c.bf16 %v4038_v37, %v4033_v34  ;;  %v613_v39 = vpack.c.bf16 %v4041_v36, %v4036_v33 }
 0x270   : > { %v4042_v40 = vpop.trf.xlu0 }
 0x271   : > { %638 = vst.msk [vmem:[#allocation2 + $0x90] sm:$0xff] %vm619_vm1, %v605_v38  ;;  %646 = vst.msk [vmem:[#allocation2 + $0xd0] sm:$0xff] %vm619_vm1, %v613_v39  ;;  %v4046_v41 = vunpack.i.h.bf16 %v4042_v40  ;;  %v4043_v42 = vunpack.i.l.bf16 %v4042_v40 }
 0x274   : > { %v4047_v43 = vpop.trf.xlu0 }
 0x275   : > { %v4051_v44 = vunpack.i.h.bf16 %v4047_v43  ;;  %v4048_v45 = vunpack.i.l.bf16 %v4047_v43 }
 0x277   : > { %v606_v46 = vpack.c.bf16 %v4048_v45, %v4043_v42  ;;  %v614_v47 = vpack.c.bf16 %v4051_v44, %v4046_v41 }
 0x278   : > { %v4052_v48 = vpop.trf.xlu0 }
 0x279   : > { %639 = vst.msk [vmem:[#allocation2 + $0x98] sm:$0xff] %vm619_vm1, %v606_v46  ;;  %647 = vst.msk [vmem:[#allocation2 + $0xd8] sm:$0xff] %vm619_vm1, %v614_v47  ;;  %v4056_v49 = vunpack.i.h.bf16 %v4052_v48  ;;  %v4053_v50 = vunpack.i.l.bf16 %v4052_v48 }
 0x27c   : > { %v4057_v51 = vpop.trf.xlu0 }
 0x27d   : > { %v4061_v52 = vunpack.i.h.bf16 %v4057_v51  ;;  %v4058_v53 = vunpack.i.l.bf16 %v4057_v51 }
 0x27f   : > { %v607_v54 = vpack.c.bf16 %v4058_v53, %v4053_v50  ;;  %v615_v55 = vpack.c.bf16 %v4061_v52, %v4056_v49 }
 0x280   : > { %v4062_v56 = vpop.trf.xlu0 }
 0x281   : > { %640 = vst.msk [vmem:[#allocation2 + $0xa0] sm:$0xff] %vm619_vm1, %v607_v54  ;;  %648 = vst.msk [vmem:[#allocation2 + $0xe0] sm:$0xff] %vm619_vm1, %v615_v55  ;;  %v4066_v57 = vunpack.i.h.bf16 %v4062_v56  ;;  %v4063_v58 = vunpack.i.l.bf16 %v4062_v56 }
 0x284   : > { %v4067_v59 = vpop.trf.xlu0 }
 0x285   : > { %v4071_v60 = vunpack.i.h.bf16 %v4067_v59  ;;  %v4068_v61 = vunpack.i.l.bf16 %v4067_v59 }
 0x287   : > { %v608_v62 = vpack.c.bf16 %v4068_v61, %v4063_v58  ;;  %v616_v63 = vpack.c.bf16 %v4071_v60, %v4066_v57 }
 0x288   : > { %v4072_v0 = vpop.trf.xlu0 }
 0x289   : > { %641 = vst.msk [vmem:[#allocation2 + $0xa8] sm:$0xff] %vm619_vm1, %v608_v62  ;;  %649 = vst.msk [vmem:[#allocation2 + $0xe8] sm:$0xff] %vm619_vm1, %v616_v63  ;;  %v4076_v1 = vunpack.i.h.bf16 %v4072_v0  ;;  %v4073_v2 = vunpack.i.l.bf16 %v4072_v0 }
 0x28c   : > { %v4077_v3 = vpop.trf.xlu0 }
 0x28d   : > { %v4081_v4 = vunpack.i.h.bf16 %v4077_v3  ;;  %v4078_v5 = vunpack.i.l.bf16 %v4077_v3 }
 0x28f   : > { %v609_v6 = vpack.c.bf16 %v4078_v5, %v4073_v2  ;;  %v617_v7 = vpack.c.bf16 %v4081_v4, %v4076_v1 }
 0x290   : > { %v4082_v8 = vpop.trf.xlu0 }
 0x291   : > { %642 = vst.msk [vmem:[#allocation2 + $0xb0] sm:$0xff] %vm619_vm1, %v609_v6  ;;  %650 = vst.msk [vmem:[#allocation2 + $0xf0] sm:$0xff] %vm619_vm1, %v617_v7  ;;  %v4086_v9 = vunpack.i.h.bf16 %v4082_v8  ;;  %v4083_v10 = vunpack.i.l.bf16 %v4082_v8 }
 0x294   : > { %v4087_v11 = vpop.trf.xlu0 }
 0x295   : > { %v4091_v12 = vunpack.i.h.bf16 %v4087_v11  ;;  %v4088_v13 = vunpack.i.l.bf16 %v4087_v11 }
 0x297   : > { %v610_v14 = vpack.c.bf16 %v4088_v13, %v4083_v10  ;;  %v618_v15 = vpack.c.bf16 %v4091_v12, %v4086_v9 }
 0x299   : > { %643 = vst.msk [vmem:[#allocation2 + $0xb8] sm:$0xff] %vm619_vm1, %v610_v14  ;;  %651 = vst.msk [vmem:[#allocation2 + $0xf8] sm:$0xff] %vm619_vm1, %v618_v15 }
 0x29a PF: > { %v658_v16 = vld [vmem:[%s4812_s14] sm:$0xff]  ;;  %v659_v17 = vld [vmem:[%s4812_s14 + $0x8] sm:$0xff]  ;;  %v660_v18 = vld [vmem:[%s4812_s14 + $0x10] sm:$0xff]  ;;  %vm6118_vm2 = vcmask 261120   ;;  %s6173_s24 = sld [smem:[#allocation104_spill]]  ;;  %s6175_s22 = sld [smem:[#allocation105_spill]] }
 0x29b   : > { %v662_v19 = vpack.c.bf16 %v659_v17, %v658_v16  ;;  %v661_v20 = vld [vmem:[%s4812_s14 + $0x18] sm:$0xff]  ;;  %vm843_vm3 = vcmask 64512   ;;  %vm868_vm4 = vcmask 1043456   ;;  %v812_v36 = vld [vmem:[#allocation2 + $0x8] sm:$0xff]  ;;  %v813_v39 = vld [vmem:[#allocation2 + $0x10] sm:$0xff]  ;;  %vm1545_vm5 = vcmask 130112  }
 0x29c   : > { %v663_v21 = vpack.c.bf16 %v661_v20, %v660_v18  ;;  %v811_v26 = vld [vmem:[#allocation2] sm:$0xff]  ;;  %v820_v40 = vld [vmem:[#allocation2 + $0x48] sm:$0xff]  ;;  %v821_v42 = vld [vmem:[#allocation2 + $0x50] sm:$0xff]  ;;  %vm1552_vm6 = vcmask 195712   ;;  %vm1559_vm7 = vcmask 261312   ;;  %vm1566_vm8 = vcmask 326912  }
 0x29d   : > { %3600 = vmatprep.subr.bf16.mxu0 %v662_v19  ;;  %3608 = vmatprep.subr.bf16.mxu1 %v662_v19  ;;  %v819_v27 = vld [vmem:[#allocation2 + $0x40] sm:$0xff]  ;;  %v814_v44 = vld [vmem:[#allocation2 + $0x18] sm:$0xff]  ;;  %v816_v48 = vld [vmem:[#allocation2 + $0x28] sm:$0xff]  ;;  %vm1573_vm9 = vcmask 392512   ;;  %vm1580_vm10 = vcmask 458112   ;;  %vm1587_vm11 = vcmask 523712  }
 0x29e   : > { %3601 = vmatpush3.bf16.msra.mxu0 %v662_v19  ;;  %3609 = vmatpush3.bf16.msra.mxu1 %v662_v19  ;;  %v815_v45 = vld [vmem:[#allocation2 + $0x20] sm:$0xff]  ;;  %v822_v46 = vld [vmem:[#allocation2 + $0x58] sm:$0xff]  ;;  %v817_v49 = vld [vmem:[#allocation2 + $0x30] sm:$0xff]  ;;  %vm1594_vm12 = vcmask 589312   ;;  %vm1601_vm13 = vcmask 654912   ;;  %vm6119_vm14 = vcmask 720512  }
 0x29f   : > { %3602 = vmatprep.subr.bf16.mxu0 %v663_v21  ;;  %3610 = vmatprep.subr.bf16.mxu1 %v663_v21  ;;  %v823_v47 = vld [vmem:[#allocation2 + $0x60] sm:$0xff]  ;;  %v824_v50 = vld [vmem:[#allocation2 + $0x68] sm:$0xff]  ;;  %v825_v51 = vld [vmem:[#allocation2 + $0x70] sm:$0xff]  ;;  %vm6120_vm15 = vcmask 786112   ;;  %vm1622_vm0 = vcmask 851712   ;;  %vm1629_vm1 = vcmask 917312  }
 0x2a0   : > { %s6174_s7 = smov %s6173_s24  ;;  %v4094_v22 = vld [vmem:[%s6173_s24] sm:$0xff]   ;;  %v4097_v25 = vld [vmem:[%s6175_s22 + $0x8] sm:$0xff]   ;;  %v818_v52 = vld [vmem:[#allocation2 + $0x38] sm:$0xff]  ;;  %s6341_s6 = sld [smem:[#allocation19_spill]] }
 0x2a1   : > { %3604 = vmatprep.mubr.msk.bf16.mxu0 %vm6118_vm2, %v4094_v22  ;;  %v4095_v23 = vld [vmem:[%s6174_s7 + $0x8] sm:$0xff]   ;;  %v4096_v24 = vld [vmem:[%s6175_s22] sm:$0xff]   ;;  %v826_v54 = vld [vmem:[#allocation2 + $0x78] sm:$0xff] }
 0x2a2   : > { %3603 = vmatpush3.bf16.msra.mxu0 %v663_v21  ;;  %3611 = vmatpush3.bf16.msra.mxu1 %v663_v21  ;;  %v827_v53 = vld [vmem:[#allocation2 + $0x80] sm:$0xff]  ;;  %v828_v56 = vld [vmem:[#allocation2 + $0x88] sm:$0xff]  ;;  %v829_v57 = vld [vmem:[#allocation2 + $0x90] sm:$0xff] }
 0x2a3   : > { %3612 = vmatprep.mubr.msk.bf16.mxu1 %vm6118_vm2, %v4096_v24  ;;  %v835_v55 = vld [vmem:[#allocation2 + $0xc0] sm:$0xff]  ;;  %v836_v58 = vld [vmem:[#allocation2 + $0xc8] sm:$0xff]  ;;  %v837_v59 = vld [vmem:[#allocation2 + $0xd0] sm:$0xff] }
 0x2a4   : > { %v830_v60 = vld [vmem:[#allocation2 + $0x98] sm:$0xff]  ;;  %v831_v61 = vld [vmem:[#allocation2 + $0xa0] sm:$0xff]  ;;  %v832_v0 = vld [vmem:[#allocation2 + $0xa8] sm:$0xff] }
 0x2a5   : > { %3605 = vmatmul.mubr.msk.bf16.vlgmr.msra.gmra.mrb[0].mxu0 %vm6118_vm2, %v4095_v23  ;;  %3613 = vmatmul.mubr.msk.bf16.vlgmr.msra.gmra.mrb[0].mxu1 %vm6118_vm2, %v4097_v25  ;;  %v838_v62 = vld [vmem:[#allocation2 + $0xd8] sm:$0xff]  ;;  %v839_v63 = vld [vmem:[#allocation2 + $0xe0] sm:$0xff]  ;;  %v833_v1 = vld [vmem:[#allocation2 + $0xb0] sm:$0xff]  ;;  %vm1882_vm2 = vcmask 1041409  }
 0x2a6   : > { %3618 = vmatprep.mubr.msk.bf16.mxu0 %vm843_vm3, %v811_v26  ;;  %3636 = vmatprep.mubr.msk.bf16.mxu1 %vm843_vm3, %v819_v27  ;;  %v840_v2 = vld [vmem:[#allocation2 + $0xe8] sm:$0xff]  ;;  %v841_v3 = vld [vmem:[#allocation2 + $0xf0] sm:$0xff]  ;;  %v834_v4 = vld [vmem:[#allocation2 + $0xb8] sm:$0xff]  ;;  %p3494_p6 = scmp.ne.s32.totalorder %s6341_s6, 1 }
 0x2a7   : > { %v842_v5 = vld [vmem:[#allocation2 + $0xf8] sm:$0xff]  ;;  %s6342_s2 = sld [smem:[#allocation107_spill]] (!%p3494_p6) }
 0x378   : > { %v3606_v28 = vpop.f32.mrb[0].mxu0  ;;  %v4927_v6 = vpop.f32.mrb[0].mxu1 }
 0x379   : > { %v719_v29 = vpop.f32.mrb[1].mxu0  ;;  %v805_v33 = vpack.c.bf16 %v3606_v28, %v3606_v28  ;;  %6176 = vst [vmem:[#allocation29_spill] sm:$0xff] %v4927_v6  ;;  %v4929_v7 = vpop.f32.mrb[1].mxu1 }
 0x37a   : > { %v803_v30 = vpack.c.bf16 %v719_v29, %v719_v29  ;;  %v3607_v31 = vpop.f32.mrb[2].mxu0  ;;  %6177 = vst [vmem:[#allocation30_spill] sm:$0xff] %v4929_v7  ;;  %v4931_v8 = vpop.f32.mrb[2].mxu1 }
 0x37b   : > { %v722_v32 = vpop.f32.mrb[3].mxu0  ;;  %v806_v37 = vpack.c.bf16 %v3607_v31, %v3607_v31  ;;  %v1118_v41 = vsel %vm868_vm4, %v805_v33, 0  ;;  %6178 = vst [vmem:[#allocation31_spill] sm:$0xff] %v4931_v8  ;;  %v4933_v9 = vpop.f32.mrb[3].mxu1 }
 0x37c   : > { %v870_v34 = vsel %vm868_vm4, %v803_v30, 0  ;;  %v804_v35 = vpack.c.bf16 %v722_v32, %v722_v32  ;;  %3776 = vmatprep.subr.msk.bf16.mxu0 %vm868_vm4, %v803_v30  ;;  %6179 = vst [vmem:[#allocation32_spill] sm:$0xff] %v4933_v9 }
 0x37d   : > { %3617 = vmatpush3.bf16.msra.mxu0 %v870_v34  ;;  %v1242_v43 = vsel %vm868_vm4, %v806_v37, 0 }
 0x37e   : > { %v994_v38 = vsel %vm868_vm4, %v804_v35, 0  ;;  %3777 = vmatprep.subr.msk.bf16.mxu1 %vm868_vm4, %v804_v35  ;;  %3778 = vmatprep.subr.msk.bf16.mxu0 %vm868_vm4, %v805_v33 }
 0x37f   : > { %3635 = vmatpush3.bf16.msra.mxu1 %v994_v38 }
 0x380   : > { %3619 = vmatmul.mubr.msk.bf16.vlgmr.msra.gmra.mrb[4].mxu0 %vm843_vm3, %v812_v36  ;;  %3779 = vmatprep.subr.msk.bf16.mxu1 %vm868_vm4, %v806_v37  ;;  %vm1643_vm4 = vcmask 1048512  }
 0x381   : > { %3653 = vmatpush3.bf16.msra.mxu0 %v1118_v41  ;;  %3622 = vmatprep.mubr.msk.bf16.mxu0 %vm843_vm3, %v813_v39 }
 0x382   : > { %3637 = vmatmul.mubr.msk.bf16.vlgmr.msra.gmra.mrb[4].mxu1 %vm843_vm3, %v820_v40 }
 0x383   : > { %3671 = vmatpush3.bf16.msra.mxu1 %v1242_v43  ;;  %3640 = vmatprep.mubr.msk.bf16.mxu1 %vm843_vm3, %v821_v42 }
 0x388   : > { %3623 = vmatmul.mubr.msk.bf16.gmra.mrb[8].mxu0 %vm843_vm3, %v814_v44 }
 0x389   : > { %3626 = vmatprep.mubr.msk.bf16.mxu0 %vm843_vm3, %v815_v45 }
 0x38a   : > { %3641 = vmatmul.mubr.msk.bf16.gmra.mrb[8].mxu1 %vm843_vm3, %v822_v46 }
 0x38b   : > { %3644 = vmatprep.mubr.msk.bf16.mxu1 %vm843_vm3, %v823_v47 }
 0x390   : > { %3627 = vmatmul.mubr.msk.bf16.gmra.mrb[12].mxu0 %vm843_vm3, %v816_v48 }
 0x391   : > { %3630 = vmatprep.mubr.msk.bf16.mxu0 %vm843_vm3, %v817_v49 }
 0x392   : > { %3645 = vmatmul.mubr.msk.bf16.gmra.mrb[12].mxu1 %vm843_vm3, %v824_v50 }
 0x393   : > { %3648 = vmatprep.mubr.msk.bf16.mxu1 %vm843_vm3, %v825_v51 }
 0x398   : > { %3631 = vmatmul.mubr.msk.bf16.gmra.mrb[16].mxu0 %vm843_vm3, %v818_v52 }
 0x399   : > { %3654 = vmatprep.mubr.msk.bf16.mxu0 %vm843_vm3, %v827_v53 }
 0x39a   : > { %3649 = vmatmul.mubr.msk.bf16.gmra.mrb[16].mxu1 %vm843_vm3, %v826_v54 }
 0x39b   : > { %3672 = vmatprep.mubr.msk.bf16.mxu1 %vm843_vm3, %v835_v55 }
 0x3a0   : > { %3655 = vmatmul.mubr.msk.bf16.vlgmr.msra.gmra.mrb[20].mxu0 %vm843_vm3, %v828_v56 }
 0x3a1   : > { %3658 = vmatprep.mubr.msk.bf16.mxu0 %vm843_vm3, %v829_v57 }
 0x3a2   : > { %3673 = vmatmul.mubr.msk.bf16.vlgmr.msra.gmra.mrb[20].mxu1 %vm843_vm3, %v836_v58 }
 0x3a3   : > { %3676 = vmatprep.mubr.msk.bf16.mxu1 %vm843_vm3, %v837_v59 }
 0x3a8   : > { %3659 = vmatmul.mubr.msk.bf16.gmra.mrb[24].mxu0 %vm843_vm3, %v830_v60 }
 0x3a9   : > { %3662 = vmatprep.mubr.msk.bf16.mxu0 %vm843_vm3, %v831_v61 }
 0x3aa   : > { %3677 = vmatmul.mubr.msk.bf16.gmra.mrb[24].mxu1 %vm843_vm3, %v838_v62 }
 0x3ab   : > { %3680 = vmatprep.mubr.msk.bf16.mxu1 %vm843_vm3, %v839_v63 }
 0x3b0   : > { %3663 = vmatmul.mubr.msk.bf16.gmra.mrb[28].mxu0 %vm843_vm3, %v832_v0 }
 0x3b1   : > { %3666 = vmatprep.mubr.msk.bf16.mxu0 %vm843_vm3, %v833_v1 }
 0x3b2   : > { %3681 = vmatmul.mubr.msk.bf16.gmra.mrb[28].mxu1 %vm843_vm3, %v840_v2 }
 0x3b3   : > { %3684 = vmatprep.mubr.msk.bf16.mxu1 %vm843_vm3, %v841_v3 }
 0x3b8   : > { %3667 = vmatmul.mubr.msk.bf16.gmra.mrb[32].mxu0 %vm843_vm3, %v834_v4 }
 0x3ba   : > { %3685 = vmatmul.mubr.msk.bf16.gmra.mrb[32].mxu1 %vm843_vm3, %v842_v5  ;;  %vm1636_vm3 = vcmask 982912  }
 0x453   : > { %v4935_v10 = vpop.f32.mrb[4].mxu0 }
 0x454   : > { %6180 = vst [vmem:[#allocation33_spill] sm:$0xff] %v4935_v10  ;;  %1346 = vmax.xlane.f32.xlu0 %v4935_v10  ;;  %v4938_v11 = vpop.f32.mrb[5].mxu0 }
 0x455   : > { %6181 = vst [vmem:[#allocation34_spill] sm:$0xff] %v4938_v11  ;;  %v4940_v12 = vpop.f32.mrb[4].mxu1  ;;  %v4942_v13 = vpop.f32.mrb[6].mxu0 }
 0x456   : > { %6182 = vst [vmem:[#allocation35_spill] sm:$0xff] %v4940_v12  ;;  %6183 = vst [vmem:[#allocation36_spill] sm:$0xff] %v4942_v13  ;;  %1378 = vmax.xlane.f32.xlu1 %v4940_v12  ;;  %v4945_v14 = vpop.f32.mrb[5].mxu1  ;;  %v4947_v15 = vpop.f32.mrb[7].mxu0 }
 0x457   : > { %6184 = vst [vmem:[#allocation37_spill] sm:$0xff] %v4945_v14  ;;  %6185 = vst [vmem:[#allocation38_spill] sm:$0xff] %v4947_v15  ;;  %v4949_v16 = vpop.f32.mrb[6].mxu1 }
 0x458   : > { %6186 = vst [vmem:[#allocation39_spill] sm:$0xff] %v4949_v16  ;;  %1342 = vmax.xlane.f32.xlu0 %v4938_v11  ;;  %v4952_v17 = vpop.f32.mrb[7].mxu1 }
 0x459   : > { %6187 = vst [vmem:[#allocation40_spill] sm:$0xff] %v4952_v17 }
 0x45a   : > { %1374 = vmax.xlane.f32.xlu1 %v4945_v14 }
 0x45b   : > { %v4955_v18 = vpop.f32.mrb[8].mxu0 }
 0x45c   : > { %6188 = vst [vmem:[#allocation41_spill] sm:$0xff] %v4955_v18  ;;  %1348 = vmax.xlane.f32.xlu0 %v4942_v13  ;;  %v4958_v19 = vpop.f32.mrb[9].mxu0 }
 0x45d   : > { %6189 = vst [vmem:[#allocation42_spill] sm:$0xff] %v4958_v19  ;;  %v4960_v20 = vpop.f32.mrb[8].mxu1  ;;  %v4962_v21 = vpop.f32.mrb[10].mxu0 }
 0x45e   : > { %6190 = vst [vmem:[#allocation43_spill] sm:$0xff] %v4960_v20  ;;  %6191 = vst [vmem:[#allocation44_spill] sm:$0xff] %v4962_v21  ;;  %1380 = vmax.xlane.f32.xlu1 %v4949_v16  ;;  %v4965_v22 = vpop.f32.mrb[9].mxu1  ;;  %v4967_v23 = vpop.f32.mrb[11].mxu0 }
 0x45f   : > { %6192 = vst [vmem:[#allocation45_spill] sm:$0xff] %v4965_v22  ;;  %6193 = vst [vmem:[#allocation46_spill] sm:$0xff] %v4967_v23  ;;  %v4969_v24 = vpop.f32.mrb[10].mxu1 }
 0x460   : > { %6194 = vst [vmem:[#allocation47_spill] sm:$0xff] %v4969_v24  ;;  %1344 = vmax.xlane.f32.xlu0 %v4947_v15  ;;  %v4972_v25 = vpop.f32.mrb[11].mxu1 }
 0x461   : > { %6195 = vst [vmem:[#allocation48_spill] sm:$0xff] %v4972_v25 }
 0x462   : > { %1376 = vmax.xlane.f32.xlu1 %v4952_v17 }
 0x463   : > { %v4975_v26 = vpop.f32.mrb[12].mxu0 }
 0x464   : > { %6196 = vst [vmem:[#allocation49_spill] sm:$0xff] %v4975_v26  ;;  %1386 = vmax.xlane.f32.xlu0 %v4960_v20  ;;  %v4978_v27 = vpop.f32.mrb[13].mxu0 }
 0x465   : > { %6197 = vst [vmem:[#allocation50_spill] sm:$0xff] %v4978_v27  ;;  %v4980_v28 = vpop.f32.mrb[12].mxu1  ;;  %v4982_v29 = vpop.f32.mrb[14].mxu0 }
 0x466   : > { %6198 = vst [vmem:[#allocation51_spill] sm:$0xff] %v4980_v28  ;;  %6199 = vst [vmem:[#allocation52_spill] sm:$0xff] %v4982_v29  ;;  %1354 = vmax.xlane.f32.xlu1 %v4955_v18  ;;  %v4985_v30 = vpop.f32.mrb[13].mxu1  ;;  %v4987_v31 = vpop.f32.mrb[15].mxu0 }
 0x467   : > { %6200 = vst [vmem:[#allocation53_spill] sm:$0xff] %v4985_v30  ;;  %6201 = vst [vmem:[#allocation54_spill] sm:$0xff] %v4987_v31  ;;  %v4989_v32 = vpop.f32.mrb[14].mxu1 }
 0x468   : > { %6202 = vst [vmem:[#allocation55_spill] sm:$0xff] %v4989_v32  ;;  %1382 = vmax.xlane.f32.xlu0 %v4965_v22  ;;  %v4992_v33 = vpop.f32.mrb[15].mxu1 }
 0x469   : > { %6203 = vst [vmem:[#allocation56_spill] sm:$0xff] %v4992_v33 }
 0x46a   : > { %1350 = vmax.xlane.f32.xlu1 %v4958_v19 }
 0x46b   : > { %v4995_v34 = vpop.f32.mrb[16].mxu0 }
 0x46c   : > { %6204 = vst [vmem:[#allocation57_spill] sm:$0xff] %v4995_v34  ;;  %1388 = vmax.xlane.f32.xlu0 %v4969_v24  ;;  %v4998_v35 = vpop.f32.mrb[17].mxu0 }
 0x46d   : > { %6205 = vst [vmem:[#allocation58_spill] sm:$0xff] %v4998_v35  ;;  %v5000_v36 = vpop.f32.mrb[16].mxu1  ;;  %v5002_v37 = vpop.f32.mrb[18].mxu0 }
 0x46e   : > { %6206 = vst [vmem:[#allocation59_spill] sm:$0xff] %v5000_v36  ;;  %6207 = vst [vmem:[#allocation60_spill] sm:$0xff] %v5002_v37  ;;  %1356 = vmax.xlane.f32.xlu1 %v4962_v21  ;;  %v5005_v38 = vpop.f32.mrb[17].mxu1  ;;  %v5007_v39 = vpop.f32.mrb[19].mxu0 }
 0x46f   : > { %6208 = vst [vmem:[#allocation61_spill] sm:$0xff] %v5005_v38  ;;  %6209 = vst [vmem:[#allocation62_spill] sm:$0xff] %v5007_v39  ;;  %v5009_v40 = vpop.f32.mrb[18].mxu1 }
 0x470   : > { %6210 = vst [vmem:[#allocation63_spill] sm:$0xff] %v5009_v40  ;;  %1384 = vmax.xlane.f32.xlu0 %v4972_v25  ;;  %v5012_v41 = vpop.f32.mrb[19].mxu1 }
 0x471   : > { %6211 = vst [vmem:[#allocation64_spill] sm:$0xff] %v5012_v41 }
 0x472   : > { %1352 = vmax.xlane.f32.xlu1 %v4967_v23 }
 0x473   : > { %v5015_v42 = vpop.f32.mrb[20].mxu0 }
 0x474   : > { %6212 = vst [vmem:[#allocation65_spill] sm:$0xff] %v5015_v42  ;;  %1394 = vmax.xlane.f32.xlu0 %v4980_v28  ;;  %v5018_v43 = vpop.f32.mrb[21].mxu0 }
 0x475   : > { %6213 = vst [vmem:[#allocation66_spill] sm:$0xff] %v5018_v43  ;;  %v5020_v44 = vpop.f32.mrb[22].mxu0  ;;  %v5022_v45 = vpop.f32.mrb[20].mxu1 }
 0x476   : > { %6214 = vst [vmem:[#allocation67_spill] sm:$0xff] %v5020_v44  ;;  %6215 = vst [vmem:[#allocation68_spill] sm:$0xff] %v5022_v45  ;;  %1362 = vmax.xlane.f32.xlu1 %v4975_v26  ;;  %v5025_v46 = vpop.f32.mrb[23].mxu0  ;;  %v5027_v47 = vpop.f32.mrb[21].mxu1 }
 0x477   : > { %6216 = vst [vmem:[#allocation69_spill] sm:$0xff] %v5025_v46  ;;  %6217 = vst [vmem:[#allocation70_spill] sm:$0xff] %v5027_v47  ;;  %v5029_v48 = vpop.f32.mrb[22].mxu1 }
 0x478   : > { %6218 = vst [vmem:[#allocation71_spill] sm:$0xff] %v5029_v48  ;;  %1390 = vmax.xlane.f32.xlu0 %v4985_v30  ;;  %v5032_v49 = vpop.f32.mrb[23].mxu1 }
 0x479   : > { %6219 = vst [vmem:[#allocation72_spill] sm:$0xff] %v5032_v49 }
 0x47a   : > { %1358 = vmax.xlane.f32.xlu1 %v4978_v27 }
 0x47b   : > { %v5035_v50 = vpop.f32.mrb[24].mxu0 }
 0x47c   : > { %6220 = vst [vmem:[#allocation73_spill] sm:$0xff] %v5035_v50  ;;  %1396 = vmax.xlane.f32.xlu0 %v4989_v32  ;;  %v5038_v51 = vpop.f32.mrb[25].mxu0 }
 0x47d   : > { %6221 = vst [vmem:[#allocation74_spill] sm:$0xff] %v5038_v51  ;;  %v5040_v52 = vpop.f32.mrb[26].mxu0  ;;  %v5042_v53 = vpop.f32.mrb[24].mxu1 }
 0x47e   : > { %6222 = vst [vmem:[#allocation75_spill] sm:$0xff] %v5040_v52  ;;  %6223 = vst [vmem:[#allocation76_spill] sm:$0xff] %v5042_v53  ;;  %1364 = vmax.xlane.f32.xlu1 %v4982_v29  ;;  %v5045_v54 = vpop.f32.mrb[27].mxu0  ;;  %v5047_v55 = vpop.f32.mrb[25].mxu1 }
 0x47f   : > { %6224 = vst [vmem:[#allocation77_spill] sm:$0xff] %v5045_v54  ;;  %6225 = vst [vmem:[#allocation78_spill] sm:$0xff] %v5047_v55  ;;  %v5049_v56 = vpop.f32.mrb[26].mxu1 }
 0x480   : > { %6226 = vst [vmem:[#allocation79_spill] sm:$0xff] %v5049_v56  ;;  %1392 = vmax.xlane.f32.xlu0 %v4992_v33  ;;  %v5052_v57 = vpop.f32.mrb[27].mxu1 }
 0x481   : > { %6227 = vst [vmem:[#allocation80_spill] sm:$0xff] %v5052_v57 }
 0x482   : > { %1360 = vmax.xlane.f32.xlu1 %v4987_v31 }
 0x483   : > { %v5055_v58 = vpop.f32.mrb[28].mxu0 }
 0x484   : > { %6228 = vst [vmem:[#allocation81_spill] sm:$0xff] %v5055_v58  ;;  %1402 = vmax.xlane.f32.xlu0 %v5000_v36  ;;  %v5058_v59 = vpop.f32.mrb[29].mxu0 }
 0x485   : > { %6229 = vst [vmem:[#allocation82_spill] sm:$0xff] %v5058_v59  ;;  %v5060_v60 = vpop.f32.mrb[30].mxu0  ;;  %v5062_v61 = vpop.f32.mrb[28].mxu1 }
 0x486   : > { %6230 = vst [vmem:[#allocation83_spill] sm:$0xff] %v5060_v60  ;;  %6231 = vst [vmem:[#allocation84_spill] sm:$0xff] %v5062_v61  ;;  %1370 = vmax.xlane.f32.xlu1 %v4995_v34  ;;  %v5065_v62 = vpop.f32.mrb[31].mxu0  ;;  %v5067_v63 = vpop.f32.mrb[29].mxu1 }
 0x487   : > { %6232 = vst [vmem:[#allocation85_spill] sm:$0xff] %v5065_v62  ;;  %6233 = vst [vmem:[#allocation86_spill] sm:$0xff] %v5067_v63  ;;  %v5069_v0 = vpop.f32.mrb[30].mxu1 }
 0x488   : > { %6234 = vst [vmem:[#allocation87_spill] sm:$0xff] %v5069_v0  ;;  %1398 = vmax.xlane.f32.xlu0 %v5005_v38  ;;  %v5072_v1 = vpop.f32.mrb[31].mxu1 }
 0x489   : > { %6235 = vst [vmem:[#allocation88_spill] sm:$0xff] %v5072_v1 }
 0x48a   : > { %1366 = vmax.xlane.f32.xlu1 %v4998_v35 }
 0x48b   : > { %v5075_v2 = vpop.f32.mrb[32].mxu0 }
 0x48c   : > { %6236 = vst [vmem:[#allocation89_spill] sm:$0xff] %v5075_v2  ;;  %1404 = vmax.xlane.f32.xlu0 %v5009_v40  ;;  %v5078_v3 = vpop.f32.mrb[33].mxu0 }
 0x48d   : > { %6237 = vst [vmem:[#allocation90_spill] sm:$0xff] %v5078_v3  ;;  %v5080_v4 = vpop.f32.mrb[34].mxu0  ;;  %v5082_v5 = vpop.f32.mrb[32].mxu1 }
 0x48e   : > { %6238 = vst [vmem:[#allocation91_spill] sm:$0xff] %v5080_v4  ;;  %6239 = vst [vmem:[#allocation92_spill] sm:$0xff] %v5082_v5  ;;  %1372 = vmax.xlane.f32.xlu1 %v5002_v37  ;;  %v5085_v8 = vpop.f32.mrb[35].mxu0  ;;  %v5087_v6 = vpop.f32.mrb[33].mxu1 }
 0x48f   : > { %6240 = vst [vmem:[#allocation93_spill] sm:$0xff] %v5085_v8  ;;  %6241 = vst [vmem:[#allocation94_spill] sm:$0xff] %v5087_v6  ;;  %v5089_v9 = vpop.f32.mrb[34].mxu1 }
 0x490   : > { %6242 = vst [vmem:[#allocation95_spill] sm:$0xff] %v5089_v9  ;;  %1400 = vmax.xlane.f32.xlu0 %v5012_v41  ;;  %v5092_v7 = vpop.f32.mrb[35].mxu1 }
 0x491   : > { %6243 = vst [vmem:[#allocation96_spill] sm:$0xff] %v5092_v7 }
 0x492   : > { %1368 = vmax.xlane.f32.xlu1 %v5007_v39  ;;  %v1534_v39 = vlaneseq }
 0x494   : > { %1410 = vmax.xlane.f32.xlu0 %v5015_v42  ;;  %v5205_v35 = vand.u32 127, %v1534_v39  ;;  %v5212_v26 = vshrl.u32 %v1534_v39, 7 }
 0x496   : > { %1412 = vmax.xlane.f32.xlu1 %v5020_v44  ;;  %v1540_v28 = vadd.s32 4294967288, %v5205_v35  ;;  %v1547_v30 = vadd.s32 4294967280, %v5205_v35  ;;  %v1554_v21 = vadd.s32 4294967272, %v5205_v35  ;;  %v5225_v20 = vsub.s32 %v5205_v35, %v5212_v26 }
 0x497   : > { %v1575_v39 = vadd.s32 4294967248, %v5205_v35  ;;  %v1561_v18 = vadd.s32 4294967264, %v5205_v35  ;;  %v1582_v22 = vadd.s32 4294967240, %v5205_v35  ;;  %v1568_v13 = vadd.s32 4294967256, %v5205_v35 }
 0x498   : > { %1406 = vmax.xlane.f32.xlu0 %v5018_v43  ;;  %v5218_v24 = vsub.s32 %v1540_v28, %v5212_v26  ;;  %v5232_v23 = vsub.s32 %v1547_v30, %v5212_v26  ;;  %v5240_v19 = vsub.s32 %v1554_v21, %v5212_v26  ;;  %v1603_v17 = vadd.s32 4294967216, %v5205_v35 }
 0x499   : > { %v5252_v14 = vsub.s32 %v1575_v39, %v5212_v26  ;;  %v5255_v21 = vsub.s32 %v1561_v18, %v5212_v26  ;;  %v1610_v15 = vadd.s32 4294967208, %v5205_v35  ;;  %v1596_v18 = vadd.s32 4294967224, %v5205_v35 }
 0x49a   : > { %1408 = vmax.xlane.f32.xlu1 %v5025_v46 }
 0x49c   : > { %1442 = vmax.xlane.f32.xlu0 %v5022_v45 }
 0x49e   : > { %1438 = vmax.xlane.f32.xlu1 %v5027_v47 }
 0x4a0   : > { %1444 = vmax.xlane.f32.xlu0 %v5029_v48 }
 0x4a2   : > { %1418 = vmax.xlane.f32.xlu1 %v5035_v50 }
 0x4a4   : > { %1440 = vmax.xlane.f32.xlu0 %v5032_v49 }
 0x4a6   : > { %1414 = vmax.xlane.f32.xlu1 %v5038_v51 }
 0x4a8   : > { %1450 = vmax.xlane.f32.xlu0 %v5042_v53 }
 0x4aa   : > { %1420 = vmax.xlane.f32.xlu1 %v5040_v52 }
 0x4ac   : > { %1446 = vmax.xlane.f32.xlu0 %v5047_v55 }
 0x4ae   : > { %1416 = vmax.xlane.f32.xlu1 %v5045_v54 }
 0x4b0   : > { %1452 = vmax.xlane.f32.xlu0 %v5049_v56 }
 0x4b2   : > { %1426 = vmax.xlane.f32.xlu1 %v5055_v58 }
 0x4b4   : > { %1448 = vmax.xlane.f32.xlu0 %v5052_v57 }
 0x4b6   : > { %1422 = vmax.xlane.f32.xlu1 %v5058_v59 }
 0x4b8   : > { %1458 = vmax.xlane.f32.xlu0 %v5062_v61 }
 0x4ba   : > { %1428 = vmax.xlane.f32.xlu1 %v5060_v60 }
 0x4bc   : > { %1454 = vmax.xlane.f32.xlu0 %v5067_v63 }
 0x4be   : > { %1424 = vmax.xlane.f32.xlu1 %v5065_v62 }
 0x4c0   : > { %1460 = vmax.xlane.f32.xlu0 %v5069_v0 }
 0x4c2   : > { %1434 = vmax.xlane.f32.xlu1 %v5075_v2 }
 0x4c4   : > { %1456 = vmax.xlane.f32.xlu0 %v5072_v1 }
 0x4c6   : > { %1430 = vmax.xlane.f32.xlu1 %v5078_v3 }
 0x4c8   : > { %1462 = vmax.xlane.f32.xlu0 %v5087_v6 }
 0x4ca   : > { %1436 = vmax.xlane.f32.xlu1 %v5080_v4 }
 0x4cc   : > { %1464 = vmax.xlane.f32.xlu0 %v5092_v7 }
 0x4ce   : > { %1432 = vmax.xlane.f32.xlu1 %v5085_v8 }
 0x4d0   : > { %1466 = vmax.xlane.f32.xlu0 %v5082_v5 }
 0x4d2   : > { %1468 = vmax.xlane.f32.xlu1 %v5089_v9 }
 0x4e1   : > { %v5127_v60 = vpop.xlane.xlu0 %1346 }
 0x4e2   : > { %v1551_v39 = vrot.slane %v5127_v60, %v5232_v23 }
 0x4e3   : > { %v5129_v0 = vpop.xlane.xlu1 %1378 }
 0x4e5   : > { %v5131_v2 = vpop.xlane.xlu0 %1342 }
 0x4e6   : > { %v1539_v12 = vrot.slane %v5131_v2, %v5225_v20 }
 0x4e7   : > { %v5133_v61 = vpop.xlane.xlu1 %1374 }
 0x4e8   : > { %v1648_v2 = vrot.slane %v5133_v61, %v5225_v20 }
 0x4e9   : > { %v5135_v3 = vpop.xlane.xlu0 %1348 }
 0x4eb   : > { %v5137_v6 = vpop.xlane.xlu1 %1380 }
 0x4ed   : > { %v5139_v4 = vpop.xlane.xlu0 %1344 }
 0x4ee   : > { %v1544_v28 = vrot.slane %v5139_v4, %v5218_v24  ;;  %v1589_v4 = vadd.s32 4294967232, %v5205_v35 }
 0x4ef   : > { %v5141_v7 = vpop.xlane.xlu1 %1376 }
 0x4f0   : > { %v1652_v30 = vrot.slane %v5141_v7, %v5218_v24  ;;  %v1546_v11 = vsel %vm1545_vm5, %v1544_v28, %v1539_v12  ;;  %v5261_v7 = vsub.s32 %v1582_v22, %v5212_v26  ;;  %v5274_v12 = vsub.s32 %v1603_v17, %v5212_v26 }
 0x4f1   : > { %v5143_v8 = vpop.xlane.xlu0 %1386  ;;  %v5277_v22 = vsub.s32 %v1589_v4, %v5212_v26  ;;  %v1631_v28 = vadd.s32 4294967184, %v5205_v35  ;;  %v1553_v60 = vsel %vm1552_vm6, %v1551_v39, %v1546_v11  ;;  %v1558_v17 = vrot.slane %v5135_v3, %v5240_v19 }
 0x4f2   : > { %v1653_v61 = vsel %vm1545_vm5, %v1652_v30, %v1648_v2  ;;  %v1617_v30 = vadd.s32 4294967200, %v5205_v35  ;;  %v5293_v2 = vsub.s32 %v1610_v15, %v5212_v26  ;;  %v5301_v39 = vsub.s32 %v1596_v18, %v5212_v26 }
 0x4f3   : > { %v5145_v5 = vpop.xlane.xlu1 %1354  ;;  %v1560_v15 = vsel %vm1559_vm7, %v1558_v17, %v1553_v60  ;;  %v5316_v18 = vsub.s32 %v1631_v28, %v5212_v26 }
 0x4f4   : > { %v1579_v28 = vrot.slane %v5145_v5, %v5252_v14 }
 0x4f5   : > { %v5147_v9 = vpop.xlane.xlu0 %1382 }
 0x4f7   : > { %v5149_v1 = vpop.xlane.xlu1 %1350 }
 0x4f9   : > { %v5151_v58 = vpop.xlane.xlu0 %1388 }
 0x4fb   : > { %v5153_v62 = vpop.xlane.xlu1 %1356 }
 0x4fd   : > { %v5155_v63 = vpop.xlane.xlu0 %1384 }
 0x4ff   : > { %v5157_v56 = vpop.xlane.xlu1 %1352 }
 0x501   : > { %v5159_v59 = vpop.xlane.xlu0 %1394 }
 0x503   : > { %v5161_v52 = vpop.xlane.xlu1 %1362 }
 0x505   : > { %v5163_v53 = vpop.xlane.xlu0 %1390 }
 0x507   : > { %v5165_v57 = vpop.xlane.xlu1 %1358 }
 0x509   : > { %v5167_v50 = vpop.xlane.xlu0 %1396 }
 0x50b   : > { %v5169_v54 = vpop.xlane.xlu1 %1364 }
 0x50d   : > { %v5171_v55 = vpop.xlane.xlu0 %1392 }
 0x50f   : > { %v5173_v48 = vpop.xlane.xlu1 %1360 }
 0x511   : > { %v5175_v51 = vpop.xlane.xlu0 %1402 }
 0x512   : > { %6244 = vst [vmem:[#allocation97_spill] sm:$0xff] %v5175_v51 }
 0x513   : > { %v5177_v44 = vpop.xlane.xlu1 %1370 }
 0x514   : > { %6245 = vst [vmem:[#allocation98_spill] sm:$0xff] %v5177_v44  ;;  %v1565_v44 = vrot.slane %v5149_v1, %v5255_v21  ;;  %v1667_v1 = vrot.slane %v5147_v9, %v5255_v21 }
 0x515   : > { %v5179_v45 = vpop.xlane.xlu0 %1398 }
 0x516   : > { %v1567_v9 = vsel %vm1566_vm8, %v1565_v44, %v1560_v15 }
 0x517   : > { %v5181_v49 = vpop.xlane.xlu1 %1366 }
 0x519   : > { %v5183_v42 = vpop.xlane.xlu0 %1404 }
 0x51a   : > { %6246 = vst [vmem:[#allocation99_spill] sm:$0xff] %v5183_v42 }
 0x51b   : > { %v5185_v46 = vpop.xlane.xlu1 %1372 }
 0x51c   : > { %6247 = vst [vmem:[#allocation100_spill] sm:$0xff] %v5185_v46  ;;  %v5269_v46 = vsub.s32 %v1568_v13, %v5212_v26  ;;  %v1657_v13 = vrot.slane %v5129_v0, %v5232_v23 }
 0x51d   : > { %v5187_v47 = vpop.xlane.xlu0 %1400 }
 0x51e   : > { %v1572_v4 = vrot.slane %v5157_v56, %v5269_v46  ;;  %v1658_v11 = vsel %vm1552_vm6, %v1657_v13, %v1653_v61  ;;  %v1662_v56 = vrot.slane %v5137_v6, %v5240_v19 }
 0x51f   : > { %v5189_v40 = vpop.xlane.xlu1 %1368 }
 0x520   : > { %v1574_v60 = vsel %vm1573_vm9, %v1572_v4, %v1567_v9  ;;  %v1677_v4 = vrot.slane %v5143_v8, %v5252_v14 }
 0x521   : > { %v5191_v43 = vpop.xlane.xlu0 %1410  ;;  %v1581_v5 = vsel %vm1580_vm10, %v1579_v28, %v1574_v60 }
 0x523   : > { %v5193_v37 = vpop.xlane.xlu1 %1412 }
 0x525   : > { %v5195_v36 = vpop.xlane.xlu0 %1406 }
 0x526   : > { %v1727_v6 = vrot.slane %v5195_v36, %v5225_v20 }
 0x527   : > { %v5197_v41 = vpop.xlane.xlu1 %1408 }
 0x528   : > { %v1731_v3 = vrot.slane %v5197_v41, %v5218_v24  ;;  %v5319_v41 = vsub.s32 %v1617_v30, %v5212_v26 }
 0x529   : > { %v5199_v34 = vpop.xlane.xlu0 %1442 }
 0x52a   : > { %v1732_v15 = vsel %vm1545_vm5, %v1731_v3, %v1727_v6  ;;  %v1815_v36 = vrot.slane %v5199_v34, %v5232_v23  ;;  %v1600_v6 = vrot.slane %v5173_v48, %v5301_v39  ;;  %v1692_v48 = vrot.slane %v5171_v55, %v5301_v39 }
 0x52b   : > { %v5201_v38 = vpop.xlane.xlu1 %1438 }
 0x52c   : > { %v1806_v61 = vrot.slane %v5201_v38, %v5225_v20  ;;  %v1638_v38 = vadd.s32 4294967176, %v5205_v35 }
 0x52d   : > { %v5203_v32 = vpop.xlane.xlu0 %1444 }
 0x52e   : > { %v5376_v28 = vsub.s32 %v1638_v38, %v5212_v26 }
 0x52f   : > { %v5207_v29 = vpop.xlane.xlu1 %1418 }
 0x531   : > { %v5210_v33 = vpop.xlane.xlu0 %1440 }
 0x533   : > { %v5214_v31 = vpop.xlane.xlu1 %1414 }
 0x535   : > { %v5220_v27 = vpop.xlane.xlu0 %1450 }
 0x537   : > { %v5227_v25 = vpop.xlane.xlu1 %1420 }
 0x539   : > { %v5237_v16 = vpop.xlane.xlu0 %1446 }
 0x53a   : > { %v1825_v8 = vrot.slane %v5237_v16, %v5255_v21  ;;  %v1741_v16 = vrot.slane %v5193_v37, %v5240_v19 }
 0x53b   : > { %v5249_v10 = vpop.xlane.xlu1 %1416 }
 0x53d   : > { %v5264_v42 = vpop.xlane.xlu0 %1452 }
 0x53f   : > { %v5280_v51 = vpop.xlane.xlu1 %1426 }
 0x540   : > { %6248 = vst [vmem:[#allocation101_spill] sm:$0xff] %v5280_v51  ;;  %v1810_v51 = vrot.slane %v5210_v33, %v5218_v24  ;;  %v1672_v33 = vrot.slane %v5155_v63, %v5269_v46  ;;  %v1663_v63 = vsel %vm1559_vm7, %v1662_v56, %v1658_v11  ;;  %v1624_v56 = vadd.s32 4294967192, %v5205_v35 }
 0x541   : > { %v1449_v0 = vpop.xlane.xlu0 %1448  ;;  %v1668_v30 = vsel %vm1566_vm8, %v1667_v1, %v1663_v63  ;;  %v1593_v1 = vrot.slane %v5165_v57, %v5277_v22  ;;  %v1820_v35 = vrot.slane %v5203_v32, %v5240_v19  ;;  %v1586_v57 = vrot.slane %v5153_v62, %v5261_v7 }
 0x542   : > { %v1811_v17 = vsel %vm1545_vm5, %v1810_v51, %v1806_v61  ;;  %v1673_v11 = vsel %vm1573_vm9, %v1672_v33, %v1668_v30  ;;  %v1736_v51 = vrot.slane %v5191_v43, %v5232_v23  ;;  %v1746_v43 = vrot.slane %v5214_v31, %v5255_v21 }
 0x543   : > { %v5312_v13 = vpop.xlane.xlu1 %1422  ;;  %v1816_v34 = vsel %vm1552_vm6, %v1815_v36, %v1811_v17  ;;  %v1830_v33 = vrot.slane %v1449_v0, %v5269_v46  ;;  %v1751_v63 = vrot.slane %v5249_v10, %v5269_v46  ;;  %v1682_v32 = vrot.slane %v5151_v58, %v5261_v7 }
 0x544   : > { %v1737_v3 = vsel %vm1552_vm6, %v1736_v51, %v1732_v15  ;;  %v1678_v31 = vsel %vm1580_vm10, %v1677_v4, %v1673_v11  ;;  %v1687_v0 = vrot.slane %v5163_v53, %v5277_v22  ;;  %v1821_v60 = vsel %vm1559_vm7, %v1820_v35, %v1816_v34 }
 0x545   : > { %v5327_v44 = vpop.xlane.xlu0 %1458  ;;  %v1588_v17 = vsel %vm1587_vm11, %v1586_v57, %v1581_v5  ;;  %v1742_v37 = vsel %vm1559_vm7, %v1741_v16, %v1737_v3  ;;  %v1826_v10 = vsel %vm1566_vm8, %v1825_v8, %v1821_v60  ;;  %v1683_v36 = vsel %vm1587_vm11, %v1682_v32, %v1678_v31 }
 0x546   : > { %v1595_v58 = vsel %vm1594_vm12, %v1593_v1, %v1588_v17  ;;  %v1747_v53 = vsel %vm1566_vm8, %v1746_v43, %v1742_v37  ;;  %v1831_v30 = vsel %vm1573_vm9, %v1830_v33, %v1826_v10  ;;  %v1835_v4 = vrot.slane %v5220_v27, %v5252_v14 }
 0x547   : > { %v5341_v61 = vpop.xlane.xlu1 %1428  ;;  %v1602_v55 = vsel %vm1601_vm13, %v1600_v6, %v1595_v58  ;;  %v1752_v11 = vsel %vm1573_vm9, %v1751_v63, %v1747_v53  ;;  %v1607_v51 = vrot.slane %v5161_v52, %v5274_v12  ;;  %v1688_v38 = vsel %vm1594_vm12, %v1687_v0, %v1683_v36 }
 0x548   : > { %v5389_v5 = vsub.s32 %v1624_v56, %v5212_v26  ;;  %v1756_v1 = vrot.slane %v5207_v29, %v5252_v14  ;;  %v1697_v8 = vrot.slane %v5159_v59, %v5274_v12  ;;  %v1693_v27 = vsel %vm1601_vm13, %v1692_v48, %v1688_v38 }
 0x549   : > { %v1455_v9 = vpop.xlane.xlu0 %1454  ;;  %v1836_v3 = vsel %vm1580_vm10, %v1835_v4, %v1831_v30  ;;  %v1609_v52 = vsel %vm6119_vm14, %v1607_v51, %v1602_v55  ;;  %v1840_v56 = vrot.slane %v5264_v42, %v5261_v7  ;;  %v1766_v29 = vrot.slane %v5312_v13, %v5277_v22  ;;  %v6250_v30 = vld [vmem:[#allocation98_spill] sm:$0xff] }
 0x54a   : > { %v1845_v35 = vrot.slane %v1455_v9, %v5277_v22  ;;  %v1757_v43 = vsel %vm1580_vm10, %v1756_v1, %v1752_v11  ;;  %v1621_v59 = vrot.slane %v5181_v49, %v5319_v41  ;;  %v1761_v57 = vrot.slane %v5227_v25, %v5261_v7 }
 0x54b   : > { %v1425_v62 = vpop.xlane.xlu1 %1424  ;;  %v1702_v16 = vrot.slane %v5167_v50, %v5293_v2  ;;  %v1614_v42 = vrot.slane %v5169_v54, %v5293_v2  ;;  %v1628_v13 = vrot.slane %v5189_v40, %v5389_v5  ;;  %v1841_v63 = vsel %vm1587_vm11, %v1840_v56, %v1836_v3 }
 0x54c   : > { %v1771_v6 = vrot.slane %v1425_v62, %v5301_v39  ;;  %v1698_v49 = vsel %vm6119_vm14, %v1697_v8, %v1693_v27  ;;  %v1707_v25 = vrot.slane %v5179_v45, %v5319_v41  ;;  %v1762_v31 = vsel %vm1587_vm11, %v1761_v57, %v1757_v43  ;;  %v6251_v8 = vld [vmem:[#allocation97_spill] sm:$0xff]  ;;  %v6252_v43 = vld [vmem:[#allocation100_spill] sm:$0xff] }
 0x54d   : > { %v1461_v15 = vpop.xlane.xlu0 %1460  ;;  %v1846_v0 = vsel %vm1594_vm12, %v1845_v35, %v1841_v63  ;;  %v1616_v50 = vsel %vm6120_vm15, %v1614_v42, %v1609_v52  ;;  %v1712_v54 = vrot.slane %v5187_v47, %v5389_v5  ;;  %v1767_v60 = vsel %vm1594_vm12, %v1766_v29, %v1762_v31  ;;  %v6249_v47 = vld [vmem:[#allocation101_spill] sm:$0xff] }
 0x54e   : > { %v1623_v17 = vsel %vm1622_vm0, %v1621_v59, %v1616_v50  ;;  %v1855_v45 = vrot.slane %v5327_v44, %v5274_v12  ;;  %v1772_v48 = vsel %vm1601_vm13, %v1771_v6, %v1767_v60  ;;  %v1703_v37 = vsel %vm6120_vm15, %v1702_v16, %v1698_v49 }
 0x54f   : > { %v5393_v34 = vpop.xlane.xlu1 %1434  ;;  %v1630_v10 = vsel %vm1629_vm1, %v1628_v13, %v1623_v17  ;;  %v1776_v58 = vrot.slane %v6249_v47, %v5274_v12  ;;  %v1635_v36 = vrot.slane %v6250_v30, %v5316_v18  ;;  %v1708_v55 = vsel %vm1622_vm0, %v1707_v25, %v1703_v37 }
 0x550   : > { %v1713_v44 = vsel %vm1629_vm1, %v1712_v54, %v1708_v55  ;;  %v1860_v51 = vrot.slane %v1461_v15, %v5293_v2  ;;  %v1717_v27 = vrot.slane %v6251_v8, %v5316_v18  ;;  %v1781_v35 = vrot.slane %v5341_v61, %v5293_v2  ;;  %v6253_v61 = vld [vmem:[#allocation99_spill] sm:$0xff] }
 0x551   : > { %v1457_v33 = vpop.xlane.xlu0 %1456  ;;  %v1777_v11 = vsel %vm6119_vm14, %v1776_v58, %v1772_v48  ;;  %v1637_v3 = vsel %vm1636_vm3, %v1635_v36, %v1630_v10  ;;  %v1642_v56 = vrot.slane %v6252_v43, %v5376_v28  ;;  %v1796_v42 = vrot.slane %v5393_v34, %v5316_v18 }
 0x552   : > { %v1850_v9 = vrot.slane %v1457_v33, %v5301_v39  ;;  %v1718_v59 = vsel %vm1636_vm3, %v1717_v27, %v1713_v44  ;;  %v1782_v57 = vsel %vm6120_vm15, %v1781_v35, %v1777_v11  ;;  %v5477_v37 = vsub.s32 0, %v5212_v26 }
 0x553   : > { %v1431_v32 = vpop.xlane.xlu1 %1430  ;;  %v1644_v16 = vsel %vm1643_vm4, %v1642_v56, %v1637_v3 }
 0x554   : > { %v1851_v40 = vsel %vm1601_vm13, %v1850_v9, %v1846_v0  ;;  %v1786_v38 = vrot.slane %v1431_v32, %v5319_v41  ;;  %v1722_v9 = vrot.slane %v6253_v61, %v5376_v28 }
 0x555   : > { %v1463_v62 = vpop.xlane.xlu0 %1462  ;;  %v1856_v4 = vsel %vm6119_vm14, %v1855_v45, %v1851_v40  ;;  %vm6122_vm14 = vcmask 1042434   ;;  %v1341_v45 = vld [vmem:[#allocation3] sm:$0xf] }
 0x556   : > { %v1865_v52 = vrot.slane %v1463_v62, %v5319_v41  ;;  %v1861_v29 = vsel %vm6120_vm15, %v1860_v51, %v1856_v4  ;;  %v1787_v13 = vsel %vm1622_vm0, %v1786_v38, %v1782_v57  ;;  %v1723_v0 = vsel %vm1643_vm4, %v1722_v9, %v1718_v59 }
 0x557   : > { %v1437_v53 = vpop.xlane.xlu1 %1436  ;;  %vm6121_vm15 = vcmask 1043459   ;;  %v1883_v62 = vsel %vm1882_vm2, %v1723_v0, %v1644_v16  ;;  %v4480_v4 = vmov 1966171168   ;;  %v4481_v51 = vmov 0.0  }
 0x558   : > { %v1866_v32 = vsel %vm1622_vm0, %v1865_v52, %v1861_v29  ;;  %v1801_v49 = vrot.slane %v1437_v53, %v5376_v28  ;;  %v1962_v53 = vsub.s32 1, %v5212_v26  ;;  %v3063_v44 = vunpack.c.l.s4 %v4480_v4  ;;  %3688 = vmatprep.subr.bf16.mxu0 %v4481_v51  ;;  %3708 = vmatprep.subr.bf16.mxu1 %v4481_v51 }
 0x559   : > { %v1465_v1 = vpop.xlane.xlu0 %1464  ;;  %v2029_v57 = vsub.s32 2, %v5212_v26 }
 0x55a   : > { %v1870_v15 = vrot.slane %v1465_v1, %v5389_v5  ;;  %v3064_v38 = vunpack.c.0.s8 %v3063_v44 }
 0x55b   : > { %v1433_v33 = vpop.xlane.xlu1 %1432 }
 0x55c   : > { %v1791_v6 = vrot.slane %v1433_v33, %v5389_v5  ;;  %v1871_v50 = vsel %vm1629_vm1, %v1870_v15, %v1866_v32  ;;  %v5486_v1 = vsub.s32 %v3064_v38, %v5212_v26 }
 0x55d   : > { %v1467_v63 = vpop.xlane.xlu0 %1466 }
 0x55e   : > { %v1792_v25 = vsel %vm1629_vm1, %v1791_v6, %v1787_v13  ;;  %v1875_v31 = vrot.slane %v1467_v63, %v5316_v18  ;;  %6254 = vst [vmem:[#allocation101_spill] sm:$0xff] %v5486_v1  ;;  %v2096_v6 = vsub.s32 3, %v5212_v26  ;;  %v6259_v63 = vld [vmem:[#allocation34_spill] sm:$0xff] }
 0x55f   : > { %v1797_v54 = vsel %vm1636_vm3, %v1796_v42, %v1792_v25  ;;  %v1469_v60 = vpop.xlane.xlu1 %1468  ;;  %v6258_v42 = vld [vmem:[#allocation38_spill] sm:$0xff] }
 0x560   : > { %v1802_v34 = vsel %vm1643_vm4, %v1801_v49, %v1797_v54  ;;  %v1876_v40 = vsel %vm1636_vm3, %v1875_v31, %v1871_v50  ;;  %v1880_v17 = vrot.slane %v1469_v60, %v5376_v28  ;;  %v6260_v50 = vld [vmem:[#allocation37_spill] sm:$0xff] }
 0x561   : > { %v1885_v48 = vsel %vm6122_vm14, %v1802_v34, %v1883_v62  ;;  %v6261_v34 = vld [vmem:[#allocation33_spill] sm:$0xff]  ;;  %vm6327_vm14 = vcmask 786112  }
 0x562   : > { %v1881_v10 = vsel %vm1643_vm4, %v1880_v17, %v1876_v40 }
 0x563   : > { %v1887_v47 = vsel %vm6121_vm15, %v1881_v10, %v1885_v48  ;;  %vm4482_vm15 = vmmov 0  }
 0x564   : > { %v1889_v58 = vmax.f32 %v1341_v45, %v1887_v47  ;;  %3704 = vmatprep.mubr.msk.bf16.mxu0 %vm4482_vm15, %v4481_v51  ;;  %3724 = vmatprep.mubr.msk.bf16.mxu1 %vm4482_vm15, %v4481_v51 }
 0x566   : > { %v1890_v30 = vsub.f32 %v1341_v45, %v1889_v58  ;;  %v1896_v36 = vrot.slane %v1889_v58, %v5477_v37  ;;  %3122 = vst [vmem:[#allocation3] sm:$0xf] %v1889_v58  ;;  %v1963_v11 = vrot.slane %v1889_v58, %v1962_v53  ;;  %v2030_v61 = vrot.slane %v1889_v58, %v2029_v57  ;;  %v6262_v45 = vld [vmem:[#allocation40_spill] sm:$0xff] }
 0x567   : > { %v2097_v9 = vrot.slane %v1889_v58, %v2096_v6  ;;  %v6263_v58 = vld [vmem:[#allocation35_spill] sm:$0xff] }
 0x568   : > { %v1891_v55 = vmul.f32 1.442695, %v1890_v30  ;;  %1902 = vbcast.lane.b32.xlu1 %v1896_v36, 264  ;;  %1898 = vbcast.lane.b32.xlu0 %v1896_v36, 256  ;;  %v6266_v6 = vld [vmem:[#allocation39_spill] sm:$0xff] }
 0x56a   : > { %4098 = vpow2.f32 %v1891_v55  ;;  %v6264_v55 = vld [vmem:[#allocation36_spill] sm:$0xff] }
 0x56c   : > { %1965 = vbcast.lane.b32.xlu1 %v1963_v11, 256  ;;  %1906 = vbcast.lane.b32.xlu0 %v1896_v36, 272 }
 0x570   : > { %1969 = vbcast.lane.b32.xlu1 %v1963_v11, 264  ;;  %1973 = vbcast.lane.b32.xlu0 %v1963_v11, 272 }
 0x574   : > { %v5488_v8 = vpop.eup %4098  ;;  %1910 = vbcast.lane.b32.xlu1 %v1896_v36, 280  ;;  %1914 = vbcast.lane.b32.xlu0 %v1896_v36, 288 }
 0x575   : > { %6255 = vst [vmem:[#allocation98_spill] sm:$0xff] %v5488_v8  ;;  %v3068_v27 = vrot.slane %v5488_v8, %v5486_v1 }
 0x577   : > { %v5493_v3 = vrot.slane %v3068_v27, %v5486_v1  ;;  %v3069_v35 = vcombine.high %v3068_v27, %v3068_v27 }
 0x578   : > { %1977 = vbcast.lane.b32.xlu1 %v1963_v11, 280  ;;  %1981 = vbcast.lane.b32.xlu0 %v1963_v11, 288 }
 0x579   : > { %v5498_v43 = vrot.slane %v3069_v35, %v5486_v1  ;;  %v3084_v56 = vcombine.high %v5493_v3, %v5493_v3  ;;  %v6265_v35 = vld [vmem:[#allocation42_spill] sm:$0xff] }
 0x57b   : > { %v5505_v15 = vrot.slane %v3084_v56, %v5477_v37  ;;  %v3085_v33 = vcombine.high %v5498_v43, %v5498_v43 }
 0x57c   : > { %1918 = vbcast.lane.b32.xlu1 %v1896_v36, 296  ;;  %1922 = vbcast.lane.b32.xlu0 %v1896_v36, 304 }
 0x57d   : > { %6256 = vst [vmem:[#allocation97_spill] sm:$0xff] %v5505_v15  ;;  %v5510_v59 = vrot.slane %v3085_v33, %v5477_v37 }
 0x57f   : > { %6257 = vst [vmem:[#allocation100_spill] sm:$0xff] %v5510_v59 }
 0x580   : > { %1985 = vbcast.lane.b32.xlu1 %v1963_v11, 296  ;;  %1989 = vbcast.lane.b32.xlu0 %v1963_v11, 304 }
 0x584   : > { %1926 = vbcast.lane.b32.xlu1 %v1896_v36, 312  ;;  %1930 = vbcast.lane.b32.xlu0 %v1896_v36, 320 }
 0x588   : > { %1993 = vbcast.lane.b32.xlu1 %v1963_v11, 312  ;;  %1997 = vbcast.lane.b32.xlu0 %v1963_v11, 320 }
 0x58c   : > { %1934 = vbcast.lane.b32.xlu1 %v1896_v36, 328  ;;  %1938 = vbcast.lane.b32.xlu0 %v1896_v36, 336 }
 0x590   : > { %2001 = vbcast.lane.b32.xlu1 %v1963_v11, 328  ;;  %2005 = vbcast.lane.b32.xlu0 %v1963_v11, 336 }
 0x594   : > { %1942 = vbcast.lane.b32.xlu1 %v1896_v36, 344  ;;  %1946 = vbcast.lane.b32.xlu0 %v1896_v36, 352 }
 0x598   : > { %2009 = vbcast.lane.b32.xlu1 %v1963_v11, 344  ;;  %2013 = vbcast.lane.b32.xlu0 %v1963_v11, 352 }
 0x59c   : > { %1950 = vbcast.lane.b32.xlu1 %v1896_v36, 360  ;;  %1954 = vbcast.lane.b32.xlu0 %v1896_v36, 368 }
 0x5a0   : > { %2017 = vbcast.lane.b32.xlu1 %v1963_v11, 360  ;;  %2021 = vbcast.lane.b32.xlu0 %v1963_v11, 368 }
 0x5a4   : > { %1958 = vbcast.lane.b32.xlu1 %v1896_v36, 376  ;;  %2032 = vbcast.lane.b32.xlu0 %v2030_v61, 256 }
 0x5a8   : > { %2025 = vbcast.lane.b32.xlu1 %v1963_v11, 376  ;;  %2099 = vbcast.lane.b32.xlu0 %v2097_v9, 256 }
 0x5ac   : > { %2036 = vbcast.lane.b32.xlu1 %v2030_v61, 264  ;;  %2040 = vbcast.lane.b32.xlu0 %v2030_v61, 272 }
 0x5b0   : > { %2103 = vbcast.lane.b32.xlu1 %v2097_v9, 264  ;;  %2107 = vbcast.lane.b32.xlu0 %v2097_v9, 272 }
 0x5b4   : > { %2044 = vbcast.lane.b32.xlu1 %v2030_v61, 280  ;;  %2048 = vbcast.lane.b32.xlu0 %v2030_v61, 288 }
 0x5b8   : > { %2111 = vbcast.lane.b32.xlu1 %v2097_v9, 280  ;;  %2115 = vbcast.lane.b32.xlu0 %v2097_v9, 288 }
 0x5bc   : > { %2052 = vbcast.lane.b32.xlu1 %v2030_v61, 296  ;;  %2056 = vbcast.lane.b32.xlu0 %v2030_v61, 304 }
 0x5c0   : > { %2119 = vbcast.lane.b32.xlu1 %v2097_v9, 296  ;;  %2123 = vbcast.lane.b32.xlu0 %v2097_v9, 304 }
 0x5c4   : > { %2060 = vbcast.lane.b32.xlu1 %v2030_v61, 312  ;;  %2064 = vbcast.lane.b32.xlu0 %v2030_v61, 320 }
 0x5c8   : > { %2127 = vbcast.lane.b32.xlu1 %v2097_v9, 312  ;;  %2131 = vbcast.lane.b32.xlu0 %v2097_v9, 320 }
 0x5cc   : > { %2068 = vbcast.lane.b32.xlu1 %v2030_v61, 328  ;;  %2072 = vbcast.lane.b32.xlu0 %v2030_v61, 336 }
 0x5d0   : > { %2135 = vbcast.lane.b32.xlu1 %v2097_v9, 328  ;;  %2139 = vbcast.lane.b32.xlu0 %v2097_v9, 336 }
 0x5d4   : > { %2076 = vbcast.lane.b32.xlu1 %v2030_v61, 344  ;;  %2080 = vbcast.lane.b32.xlu0 %v2030_v61, 352 }
 0x5d8   : > { %2143 = vbcast.lane.b32.xlu1 %v2097_v9, 344  ;;  %2147 = vbcast.lane.b32.xlu0 %v2097_v9, 352 }
 0x5da   : > { %v1903_v26 = vpop.permute.xlu1 %1902  ;;  %v1899_v16 = vpop.permute.xlu0 %1898 }
 0x5db   : > { %v2162_v13 = vsub.f32 %v6258_v42, %v1903_v26  ;;  %v2161_v32 = vsub.f32 %v6259_v63, %v1899_v16  ;;  %v6267_v42 = vld [vmem:[#allocation45_spill] sm:$0xff] }
 0x5dc   : > { %2084 = vbcast.lane.b32.xlu1 %v2030_v61, 360  ;;  %2088 = vbcast.lane.b32.xlu0 %v2030_v61, 368 }
 0x5dd   : > { %v2227_v49 = vmul.f32 1.442695, %v2162_v13  ;;  %v2225_v25 = vmul.f32 1.442695, %v2161_v32 }
 0x5de   : > { %v1966_v31 = vpop.permute.xlu1 %1965  ;;  %v1907_v0 = vpop.permute.xlu0 %1906 }
 0x5df   : > { %4100 = vpow2.f32 %v2227_v49  ;;  %v2177_v54 = vsub.f32 %v6260_v50, %v1966_v31  ;;  %v2163_v40 = vsub.f32 %v6261_v34, %v1907_v0  ;;  %v6268_v49 = vld [vmem:[#allocation46_spill] sm:$0xff] }
 0x5e0   : > { %4102 = vpow2.f32 %v2225_v25  ;;  %2151 = vbcast.lane.b32.xlu1 %v2097_v9, 360  ;;  %2155 = vbcast.lane.b32.xlu0 %v2097_v9, 368 }
 0x5e1   : > { %v2257_v60 = vmul.f32 1.442695, %v2177_v54  ;;  %v2229_v47 = vmul.f32 1.442695, %v2163_v40 }
 0x5e2   : > { %v1970_v62 = vpop.permute.xlu1 %1969  ;;  %v1974_v17 = vpop.permute.xlu0 %1973 }
 0x5e3   : > { %v2178_v48 = vsub.f32 %v6262_v45, %v1970_v62  ;;  %4104 = vpow2.f32 %v2257_v60  ;;  %v2179_v53 = vsub.f32 %v6263_v58, %v1974_v17  ;;  %v6269_v60 = vld [vmem:[#allocation41_spill] sm:$0xff]  ;;  %v6270_v45 = vld [vmem:[#allocation48_spill] sm:$0xff] }
 0x5e4   : > { %2092 = vbcast.lane.b32.xlu1 %v2030_v61, 376 }
 0x5e5   : > { %v2259_v10 = vmul.f32 1.442695, %v2178_v48  ;;  %v2261_v27 = vmul.f32 1.442695, %v2179_v53 }
 0x5e6   : > { %v1911_v30 = vpop.permute.xlu1 %1910  ;;  %v1915_v36 = vpop.permute.xlu0 %1914 }
 0x5e7   : > { %4106 = vpow2.f32 %v2259_v10  ;;  %v2164_v4 = vsub.f32 %v6264_v55, %v1911_v30  ;;  %v2165_v56 = vsub.f32 %v6265_v35, %v1915_v36  ;;  %v6271_v30 = vld [vmem:[#allocation43_spill] sm:$0xff] }
 0x5e8   : > { %2159 = vbcast.lane.b32.xlu1 %v2097_v9, 376  ;;  %4108 = vpow2.f32 %v2229_v47 }
 0x5e9   : > { %v5525_v44 = vpop.eup %4100  ;;  %v2231_v11 = vmul.f32 1.442695, %v2164_v4  ;;  %v2233_v9 = vmul.f32 1.442695, %v2165_v56 }
 0x5ea   : > { %v5527_v38 = vpop.eup %4102  ;;  %v1978_v33 = vpop.permute.xlu1 %1977 }
 0x5eb   : > { %v1982_v57 = vpop.permute.xlu0 %1981  ;;  %4110 = vpow2.f32 %v2231_v11  ;;  %v2180_v61 = vsub.f32 %v6266_v6, %v1978_v33  ;;  %v2869_v26 = vpack.c.bf16 %v5525_v44, %v5527_v38 }
 0x5ec   : > { %4112 = vpow2.f32 %v2261_v27  ;;  %v2181_v13 = vsub.f32 %v6267_v42, %v1982_v57  ;;  %v6272_v27 = vld [vmem:[#allocation44_spill] sm:$0xff] }
 0x5ed   : > { %v2263_v16 = vmul.f32 1.442695, %v2180_v61  ;;  %3689 = vmatpush3.bf16.xpose.msra.mxu0 %v2869_v26  ;;  %v5536_v31 = vpop.eup %4104  ;;  %v6273_v61 = vld [vmem:[#allocation50_spill] sm:$0xff] }
 0x5ee   : > { %v1919_v63 = vpop.permute.xlu1 %1918  ;;  %3690 = vmatprep.subr.bf16.mxu0 %v4481_v51  ;;  %v2265_v54 = vmul.f32 1.442695, %v2181_v13  ;;  %v6274_v13 = vld [vmem:[#allocation47_spill] sm:$0xff] }
 0x5ef   : > { %v1923_v32 = vpop.permute.xlu0 %1922  ;;  %4114 = vpow2.f32 %v2263_v16  ;;  %v2166_v25 = vsub.f32 %v6268_v49, %v1919_v63 }
 0x5f0   : > { %4116 = vpow2.f32 %v2233_v9  ;;  %v2167_v34 = vsub.f32 %v6269_v60, %v1923_v32 }
 0x5f1   : > { %v5538_v0 = vpop.eup %4106  ;;  %v2235_v50 = vmul.f32 1.442695, %v2166_v25 }
 0x5f2   : > { %v1986_v40 = vpop.permute.xlu1 %1985  ;;  %v2877_v17 = vpack.c.bf16 %v5538_v0, %v5536_v31  ;;  %v4109_v10 = vpop.eup %4108  ;;  %v2237_v53 = vmul.f32 1.442695, %v2167_v34 }
 0x5f3   : > { %v1990_v62 = vpop.permute.xlu0 %1989  ;;  %4118 = vpow2.f32 %v2235_v50  ;;  %v2182_v48 = vsub.f32 %v6270_v45, %v1986_v40 }
 0x5f4   : > { %3709 = vmatpush3.bf16.xpose.msra.mxu1 %v2877_v17  ;;  %4120 = vpow2.f32 %v2265_v54  ;;  %v2183_v36 = vsub.f32 %v6271_v30, %v1990_v62  ;;  %v6275_v54 = vld [vmem:[#allocation53_spill] sm:$0xff]  ;;  %v6276_v17 = vld [vmem:[#allocation54_spill] sm:$0xff] }
 0x5f5   : > { %v5544_v47 = vpop.eup %4110  ;;  %v2267_v58 = vmul.f32 1.442695, %v2182_v48  ;;  %3710 = vmatprep.subr.bf16.mxu1 %v4481_v51 }
 0x5f6   : > { %v1927_v55 = vpop.permute.xlu1 %1926  ;;  %v2870_v11 = vpack.c.bf16 %v5544_v47, %v4109_v10  ;;  %v5550_v56 = vpop.eup %4112  ;;  %v2269_v6 = vmul.f32 1.442695, %v2183_v36  ;;  %v6277_v36 = vld [vmem:[#allocation49_spill] sm:$0xff] }
 0x5f7   : > { %v1931_v4 = vpop.permute.xlu0 %1930  ;;  %4122 = vpow2.f32 %v2267_v58  ;;  %v2168_v35 = vsub.f32 %v6272_v27, %v1927_v55 }
 0x5f8   : > { %3691 = vmatpush3.bf16.xpose.msra.mxu0 %v2870_v11  ;;  %4124 = vpow2.f32 %v2237_v53  ;;  %v2169_v26 = vsub.f32 %v6273_v61, %v1931_v4 }
 0x5f9   : > { %v5552_v33 = vpop.eup %4114  ;;  %v2239_v57 = vmul.f32 1.442695, %v2168_v35  ;;  %3692 = vmatprep.subr.bf16.mxu0 %v4481_v51  ;;  %v6278_v35 = vld [vmem:[#allocation56_spill] sm:$0xff] }
 0x5fa   : > { %v1994_v16 = vpop.permute.xlu1 %1993  ;;  %v2878_v42 = vpack.c.bf16 %v5552_v33, %v5550_v56  ;;  %v4117_v32 = vpop.eup %4116  ;;  %v2241_v50 = vmul.f32 1.442695, %v2169_v26 }
 0x5fb   : > { %v1998_v9 = vpop.permute.xlu0 %1997  ;;  %4126 = vpow2.f32 %v2239_v57  ;;  %v2184_v63 = vsub.f32 %v6274_v13, %v1994_v16  ;;  %v6279_v16 = vld [vmem:[#allocation51_spill] sm:$0xff] }
 0x5fc   : > { %3711 = vmatpush3.bf16.xpose.msra.mxu1 %v2878_v42  ;;  %4128 = vpow2.f32 %v2269_v6  ;;  %v2185_v60 = vsub.f32 %v6275_v54, %v1998_v9 }
 0x5fd   : > { %v5559_v49 = vpop.eup %4118  ;;  %v2271_v25 = vmul.f32 1.442695, %v2184_v63  ;;  %3712 = vmatprep.subr.bf16.mxu1 %v4481_v51 }
 0x5fe   : > { %v1935_v34 = vpop.permute.xlu1 %1934  ;;  %v2871_v62 = vpack.c.bf16 %v5559_v49, %v4117_v32  ;;  %v5566_v48 = vpop.eup %4120  ;;  %v2273_v30 = vmul.f32 1.442695, %v2185_v60 }
 0x5ff   : > { %v1939_v40 = vpop.permute.xlu0 %1938  ;;  %4130 = vpow2.f32 %v2271_v25  ;;  %v2170_v45 = vsub.f32 %v6276_v17, %v1935_v34  ;;  %2355 = vadd.xlane.f32.xlu0 %v5527_v38  ;;  %v6280_v25 = vld [vmem:[#allocation52_spill] sm:$0xff] }
 0x600   : > { %3693 = vmatpush3.bf16.xpose.msra.mxu0 %v2871_v62  ;;  %4132 = vpow2.f32 %v2241_v50  ;;  %v2171_v55 = vsub.f32 %v6277_v36, %v1939_v40 }
 0x601   : > { %v5568_v58 = vpop.eup %4122  ;;  %v2243_v53 = vmul.f32 1.442695, %v2170_v45  ;;  %3694 = vmatprep.subr.bf16.mxu0 %v4481_v51 }
 0x602   : > { %v2002_v4 = vpop.permute.xlu1 %2001  ;;  %v2879_v27 = vpack.c.bf16 %v5568_v58, %v5566_v48  ;;  %v4125_v57 = vpop.eup %4124  ;;  %v2245_v26 = vmul.f32 1.442695, %v2171_v55 }
 0x603   : > { %v2006_v11 = vpop.permute.xlu0 %2005  ;;  %4134 = vpow2.f32 %v2243_v53  ;;  %v2186_v38 = vsub.f32 %v6278_v35, %v2002_v4  ;;  %2359 = vadd.xlane.f32.xlu0 %v4109_v10  ;;  %v6281_v10 = vld [vmem:[#allocation58_spill] sm:$0xff] }
 0x604   : > { %3713 = vmatpush3.bf16.xpose.msra.mxu1 %v2879_v27  ;;  %4136 = vpow2.f32 %v2273_v30  ;;  %v2187_v9 = vsub.f32 %v6279_v16, %v2006_v11  ;;  %v6282_v30 = vld [vmem:[#allocation55_spill] sm:$0xff]  ;;  %v6283_v27 = vld [vmem:[#allocation61_spill] sm:$0xff]  ;;  %v6284_v16 = vld [vmem:[#allocation62_spill] sm:$0xff] }
 0x605   : > { %v4127_v6 = vpop.eup %4126  ;;  %v2275_v61 = vmul.f32 1.442695, %v2186_v38  ;;  %3714 = vmatprep.subr.bf16.mxu1 %v4481_v51 }
 0x606   : > { %v1943_v42 = vpop.permute.xlu1 %1942  ;;  %v2872_v63 = vpack.c.bf16 %v4127_v6, %v4125_v57  ;;  %v5579_v54 = vpop.eup %4128  ;;  %v2277_v62 = vmul.f32 1.442695, %v2187_v9 }
 0x607   : > { %v1947_v13 = vpop.permute.xlu0 %1946  ;;  %4138 = vpow2.f32 %v2275_v61  ;;  %v2172_v50 = vsub.f32 %v6280_v25, %v1943_v42  ;;  %2361 = vadd.xlane.f32.xlu0 %v5544_v47  ;;  %v6285_v42 = vld [vmem:[#allocation57_spill] sm:$0xff] }
 0x608   : > { %v2173_v60 = vsub.f32 %v6281_v10, %v1947_v13  ;;  %3695 = vmatpush3.bf16.xpose.msra.mxu0 %v2872_v63  ;;  %4140 = vpow2.f32 %v2245_v26 }
 0x609   : > { %v5582_v34 = vpop.eup %4130  ;;  %v2247_v40 = vmul.f32 1.442695, %v2172_v50  ;;  %3696 = vmatprep.subr.bf16.mxu0 %v4481_v51 }
 0x60a   : > { %v2010_v17 = vpop.permute.xlu1 %2009  ;;  %v2880_v53 = vpack.c.bf16 %v5582_v34, %v5579_v54  ;;  %v4133_v36 = vpop.eup %4132  ;;  %v2249_v55 = vmul.f32 1.442695, %v2173_v60 }
 0x60b   : > { %v2014_v45 = vpop.permute.xlu0 %2013  ;;  %4142 = vpow2.f32 %v2247_v40  ;;  %v2188_v47 = vsub.f32 %v6282_v30, %v2010_v17  ;;  %2363 = vadd.xlane.f32.xlu0 %v4117_v32 }
 0x60c   : > { %2357 = vadd.xlane.f32.xlu1 %v5525_v44  ;;  %3715 = vmatpush3.bf16.xpose.msra.mxu1 %v2880_v53  ;;  %4144 = vpow2.f32 %v2277_v62  ;;  %v2189_v35 = vsub.f32 %v6283_v27, %v2014_v45  ;;  %v6287_v53 = vld [vmem:[#allocation59_spill] sm:$0xff]  ;;  %v6288_v27 = vld [vmem:[#allocation60_spill] sm:$0xff] }
 0x60d   : > { %v4135_v4 = vpop.eup %4134  ;;  %v2279_v11 = vmul.f32 1.442695, %v2188_v47  ;;  %3716 = vmatprep.subr.bf16.mxu1 %v4481_v51 }
 0x60e   : > { %v1951_v38 = vpop.permute.xlu1 %1950  ;;  %v2873_v26 = vpack.c.bf16 %v4135_v4, %v4133_v36  ;;  %v5593_v13 = vpop.eup %4136  ;;  %v2281_v50 = vmul.f32 1.442695, %v2189_v35 }
 0x60f   : > { %v1955_v61 = vpop.permute.xlu0 %1954  ;;  %4146 = vpow2.f32 %v2279_v11  ;;  %v2174_v9 = vsub.f32 %v6284_v16, %v1951_v38  ;;  %2367 = vadd.xlane.f32.xlu0 %v4125_v57  ;;  %v6286_v57 = vld [vmem:[#allocation64_spill] sm:$0xff]  ;;  %v6289_v16 = vld [vmem:[#allocation66_spill] sm:$0xff] }
 0x610   : > { %v2175_v32 = vsub.f32 %v6285_v42, %v1955_v61  ;;  %4148 = vpow2.f32 %v2249_v55  ;;  %2365 = vadd.xlane.f32.xlu1 %v5559_v49  ;;  %3697 = vmatpush3.bf16.xpose.msra.mxu0 %v2873_v26 }
 0x611   : > { %v5596_v44 = vpop.eup %4138  ;;  %v2251_v63 = vmul.f32 1.442695, %v2174_v9  ;;  %3698 = vmatprep.subr.bf16.mxu0 %v4481_v51 }
 0x612   : > { %v2253_v25 = vmul.f32 1.442695, %v2175_v32  ;;  %v2018_v10 = vpop.permute.xlu1 %2017  ;;  %v2881_v40 = vpack.c.bf16 %v5596_v44, %v5593_v13  ;;  %v4141_v17 = vpop.eup %4140 }
 0x613   : > { %v2022_v60 = vpop.permute.xlu0 %2021  ;;  %4150 = vpow2.f32 %v2251_v63  ;;  %v2190_v62 = vsub.f32 %v6286_v57, %v2018_v10  ;;  %2371 = vadd.xlane.f32.xlu0 %v4133_v36 }
 0x614   : > { %4152 = vpow2.f32 %v2253_v25  ;;  %2369 = vadd.xlane.f32.xlu1 %v4127_v6  ;;  %3717 = vmatpush3.bf16.xpose.msra.mxu1 %v2881_v40  ;;  %v2191_v30 = vsub.f32 %v6287_v53, %v2022_v60  ;;  %v6290_v25 = vld [vmem:[#allocation63_spill] sm:$0xff]  ;;  %v6291_v60 = vld [vmem:[#allocation70_spill] sm:$0xff] }
 0x615   : > { %v4143_v49 = vpop.eup %4142  ;;  %v2283_v45 = vmul.f32 1.442695, %v2190_v62  ;;  %3718 = vmatprep.subr.bf16.mxu1 %v4481_v51  ;;  %4154 = vpow2.f32 %v2281_v50 }
 0x616   : > { %v1959_v47 = vpop.permute.xlu1 %1958  ;;  %v2874_v11 = vpack.c.bf16 %v4143_v49, %v4141_v17  ;;  %v5605_v38 = vpop.eup %4144  ;;  %v2285_v26 = vmul.f32 1.442695, %v2191_v30  ;;  %v6292_v30 = vld [vmem:[#allocation69_spill] sm:$0xff] }
 0x617   : > { %v2033_v55 = vpop.permute.xlu0 %2032  ;;  %4156 = vpow2.f32 %v2283_v45  ;;  %v2176_v35 = vsub.f32 %v6288_v27, %v1959_v47  ;;  %2375 = vadd.xlane.f32.xlu0 %v4141_v17 }
 0x618   : > { %2373 = vadd.xlane.f32.xlu1 %v4135_v4  ;;  %3699 = vmatpush3.bf16.xpose.msra.mxu0 %v2874_v11  ;;  %v2193_v9 = vsub.f32 %v6289_v16, %v2033_v55  ;;  %v6293_v55 = vld [vmem:[#allocation65_spill] sm:$0xff] }
 0x619   : > { %v5607_v6 = vpop.eup %4146  ;;  %v2255_v36 = vmul.f32 1.442695, %v2176_v35  ;;  %3700 = vmatprep.subr.bf16.mxu0 %v4481_v51 }
 0x61a   : > { %v4149_v61 = vpop.eup %4148  ;;  %v2026_v42 = vpop.permute.xlu1 %2025  ;;  %v2882_v63 = vpack.c.bf16 %v5607_v6, %v5605_v38  ;;  %v2289_v62 = vmul.f32 1.442695, %v2193_v9 }
 0x61b   : > { %v2100_v32 = vpop.permute.xlu0 %2099  ;;  %4158 = vpow2.f32 %v2255_v36  ;;  %v2192_v50 = vsub.f32 %v6290_v25, %v2026_v42  ;;  %2379 = vadd.xlane.f32.xlu0 %v4149_v61  ;;  %v6294_v42 = vld [vmem:[#allocation72_spill] sm:$0xff] }
 0x61c   : > { %2377 = vadd.xlane.f32.xlu1 %v4143_v49  ;;  %3719 = vmatpush3.bf16.xpose.msra.mxu1 %v2882_v63  ;;  %v2209_v40 = vsub.f32 %v6291_v60, %v2100_v32  ;;  %4160 = vpow2.f32 %v2285_v26 }
 0x61d   : > { %v4151_v4 = vpop.eup %4150  ;;  %v2287_v10 = vmul.f32 1.442695, %v2192_v50  ;;  %3720 = vmatprep.subr.bf16.mxu1 %v4481_v51  ;;  %v6295_v50 = vld [vmem:[#allocation68_spill] sm:$0xff] }
 0x61e   : > { %v4153_v57 = vpop.eup %4152  ;;  %v2037_v17 = vpop.permute.xlu1 %2036  ;;  %v2875_v53 = vpack.c.bf16 %v4151_v4, %v4149_v61  ;;  %v2321_v35 = vmul.f32 1.442695, %v2209_v40 }
 0x61f   : > { %v2041_v45 = vpop.permute.xlu0 %2040  ;;  %4162 = vpow2.f32 %v2287_v10  ;;  %v2194_v47 = vsub.f32 %v6292_v30, %v2037_v17  ;;  %2383 = vadd.xlane.f32.xlu0 %v4153_v57  ;;  %v5618_v49 = vpop.eup %4154 }
 0x620   : > { %v2195_v11 = vsub.f32 %v6293_v55, %v2041_v45  ;;  %2381 = vadd.xlane.f32.xlu1 %v4151_v4  ;;  %3701 = vmatpush3.bf16.xpose.msra.mxu0 %v2875_v53  ;;  %4164 = vpow2.f32 %v2289_v62  ;;  %v6296_v62 = vld [vmem:[#allocation67_spill] sm:$0xff] }
 0x621   : > { %v5620_v27 = vpop.eup %4156  ;;  %v2291_v36 = vmul.f32 1.442695, %v2194_v47  ;;  %3702 = vmatprep.subr.bf16.mxu0 %v4481_v51  ;;  %v6297_v47 = vld [vmem:[#allocation74_spill] sm:$0xff] }
 0x622   : > { %v2293_v26 = vmul.f32 1.442695, %v2195_v11  ;;  %v2104_v16 = vpop.permute.xlu1 %2103  ;;  %v2883_v9 = vpack.c.bf16 %v5620_v27, %v5618_v49 }
 0x623   : > { %v2108_v61 = vpop.permute.xlu0 %2107  ;;  %4166 = vpow2.f32 %v2291_v36  ;;  %v2210_v32 = vsub.f32 %v6294_v42, %v2104_v16  ;;  %2387 = vadd.xlane.f32.xlu0 %v5536_v31 }
 0x624   : > { %3721 = vmatpush3.bf16.xpose.msra.mxu1 %v2883_v9  ;;  %4168 = vpow2.f32 %v2321_v35  ;;  %v2211_v4 = vsub.f32 %v6295_v50, %v2108_v61  ;;  %v6299_v61 = vld [vmem:[#allocation30_spill] sm:$0xff] }
 0x625   : > { %v4159_v63 = vpop.eup %4158  ;;  %v2323_v25 = vmul.f32 1.442695, %v2210_v32  ;;  %3722 = vmatprep.subr.bf16.mxu1 %v4481_v51  ;;  %4170 = vpow2.f32 %v2293_v26  ;;  %v807_v9 = vpack.c.bf16 %v6299_v61, %v6299_v61 }
 0x626   : > { %2385 = vadd.xlane.f32.xlu1 %v4159_v63  ;;  %v2045_v10 = vpop.permute.xlu1 %2044  ;;  %v2876_v40 = vpack.c.bf16 %v4159_v63, %v4153_v57  ;;  %v5631_v45 = vpop.eup %4160  ;;  %v2325_v30 = vmul.f32 1.442695, %v2211_v4 }
 0x627   : > { %v2049_v60 = vpop.permute.xlu0 %2048  ;;  %4172 = vpow2.f32 %v2323_v25  ;;  %v2196_v17 = vsub.f32 %v6296_v62, %v2045_v10  ;;  %2391 = vadd.xlane.f32.xlu0 %v5550_v56  ;;  %v6298_v56 = vld [vmem:[#allocation71_spill] sm:$0xff] }
 0x628   : > { %3703 = vmatpush3.bf16.xpose.msra.mxu0 %v2876_v40  ;;  %v2197_v55 = vsub.f32 %v6297_v47, %v2049_v60  ;;  %v6301_v60 = vld [vmem:[#allocation77_spill] sm:$0xff] }
 0x629   : > { %v5633_v31 = vpop.eup %4162  ;;  %v2295_v53 = vmul.f32 1.442695, %v2196_v17  ;;  %3728 = vmatprep.subr.bf16.mxu0 %v4481_v51 }
 0x62a   : > { %2389 = vadd.xlane.f32.xlu1 %v5538_v0  ;;  %v2112_v11 = vpop.permute.xlu1 %2111  ;;  %v2884_v35 = vpack.c.bf16 %v5633_v31, %v5631_v45  ;;  %v4165_v26 = vpop.eup %4164  ;;  %v2297_v32 = vmul.f32 1.442695, %v2197_v55  ;;  %v6300_v0 = vld [vmem:[#allocation78_spill] sm:$0xff] }
 0x62b   : > { %v2116_v57 = vpop.permute.xlu0 %2115  ;;  %4174 = vpow2.f32 %v2295_v53  ;;  %v2212_v36 = vsub.f32 %v6298_v56, %v2112_v11  ;;  %v6302_v53 = vld [vmem:[#allocation32_spill] sm:$0xff]  ;;  %v6303_v11 = vld [vmem:[#allocation73_spill] sm:$0xff] }
 0x62c   : > { %3723 = vmatpush3.bf16.xpose.msra.mxu1 %v2884_v35  ;;  %4176 = vpow2.f32 %v2325_v30  ;;  %v2213_v63 = vsub.f32 %v6300_v0, %v2116_v57  ;;  %v808_v30 = vpack.c.bf16 %v6302_v53, %v6302_v53 }
 0x62d   : > { %v4167_v16 = vpop.eup %4166  ;;  %v2327_v42 = vmul.f32 1.442695, %v2212_v36  ;;  %3748 = vmatprep.subr.bf16.mxu1 %v4481_v51 }
 0x62e   : > { %v2053_v25 = vpop.permute.xlu1 %2052  ;;  %2421 = vadd.xlane.f32.xlu0 %v4167_v16  ;;  %2419 = vadd.xlane.f32.xlu1 %v4165_v26  ;;  %v2885_v4 = vpack.c.bf16 %v4167_v16, %v4165_v26  ;;  %v4169_v10 = vpop.eup %4168  ;;  %v2329_v55 = vmul.f32 1.442695, %v2213_v63  ;;  %v6304_v26 = vld [vmem:[#allocation80_spill] sm:$0xff] }
 0x62f   : > { %v2057_v50 = vpop.permute.xlu0 %2056  ;;  %4178 = vpow2.f32 %v2327_v42  ;;  %v2198_v40 = vsub.f32 %v6301_v60, %v2053_v25  ;;  %3705 = vmatmul.mubr.bf16.vlgmr.msra.gmra.mrb[36].mxu0 %v807_v9  ;;  %v4171_v62 = vpop.eup %4170 }
 0x630   : > { %3729 = vmatpush3.bf16.xpose.msra.mxu0 %v2885_v4  ;;  %3744 = vmatprep.mubr.msk.bf16.mxu0 %vm4482_vm15, %v4481_v51  ;;  %4180 = vpow2.f32 %v2297_v32  ;;  %v2199_v57 = vsub.f32 %v6303_v11, %v2057_v50  ;;  %v6305_v32 = vld [vmem:[#allocation76_spill] sm:$0xff]  ;;  %v6306_v50 = vld [vmem:[#allocation75_spill] sm:$0xff] }
 0x631   : > { %v4173_v17 = vpop.eup %4172  ;;  %v2299_v47 = vmul.f32 1.442695, %v2198_v40  ;;  %3730 = vmatprep.subr.bf16.mxu0 %v4481_v51 }
 0x632   : > { %v2120_v35 = vpop.permute.xlu1 %2119  ;;  %2393 = vadd.xlane.f32.xlu1 %v5552_v33  ;;  %2423 = vadd.xlane.f32.xlu0 %v4171_v62  ;;  %v2893_v36 = vpack.c.bf16 %v4173_v17, %v4169_v10  ;;  %v2301_v42 = vmul.f32 1.442695, %v2199_v57 }
 0x633   : > { %v2124_v56 = vpop.permute.xlu0 %2123  ;;  %4182 = vpow2.f32 %v2299_v47  ;;  %v2214_v16 = vsub.f32 %v6304_v26, %v2120_v35  ;;  %3725 = vmatmul.mubr.bf16.vlgmr.msra.gmra.mrb[36].mxu1 %v808_v30  ;;  %v6307_v47 = vld [vmem:[#allocation82_spill] sm:$0xff] }
 0x634   : > { %3749 = vmatpush3.bf16.xpose.msra.mxu1 %v2893_v36  ;;  %3764 = vmatprep.mubr.msk.bf16.mxu1 %vm4482_vm15, %v4481_v51  ;;  %4184 = vpow2.f32 %v2329_v55  ;;  %v2215_v0 = vsub.f32 %v6305_v32, %v2124_v56  ;;  %v6310_v32 = vld [vmem:[#allocation85_spill] sm:$0xff]  ;;  %vm6326_vm15 = vcmask 720512  }
 0x635   : > { %v4175_v61 = vpop.eup %4174  ;;  %v2331_v9 = vmul.f32 1.442695, %v2214_v16  ;;  %3750 = vmatprep.subr.bf16.mxu1 %v4481_v51  ;;  %v6309_v16 = vld [vmem:[#allocation86_spill] sm:$0xff] }
 0x636   : > { %v2061_v33 = vpop.permute.xlu1 %2060  ;;  %2451 = vadd.xlane.f32.xlu1 %v4169_v10  ;;  %2453 = vadd.xlane.f32.xlu0 %v4173_v17  ;;  %v2886_v25 = vpack.c.bf16 %v4175_v61, %v4171_v62  ;;  %v4177_v60 = vpop.eup %4176  ;;  %v2333_v30 = vmul.f32 1.442695, %v2215_v0  ;;  %v6308_v62 = vld [vmem:[#allocation79_spill] sm:$0xff] }
 0x637   : > { %v2065_v63 = vpop.permute.xlu0 %2064  ;;  %4186 = vpow2.f32 %v2331_v9  ;;  %v2200_v4 = vsub.f32 %v6306_v50, %v2061_v33 }
 0x638   : > { %3731 = vmatpush3.bf16.xpose.msra.mxu0 %v2886_v25  ;;  %4188 = vpow2.f32 %v2301_v42  ;;  %v2201_v55 = vsub.f32 %v6307_v47, %v2065_v63  ;;  %v6312_v47 = vld [vmem:[#allocation88_spill] sm:$0xff] }
 0x639   : > { %v4179_v40 = vpop.eup %4178  ;;  %v2303_v53 = vmul.f32 1.442695, %v2200_v4  ;;  %3732 = vmatprep.subr.bf16.mxu0 %v4481_v51  ;;  %v6311_v4 = vld [vmem:[#allocation81_spill] sm:$0xff] }
 0x63a   : > { %v2128_v11 = vpop.permute.xlu1 %2127  ;;  %2395 = vadd.xlane.f32.xlu1 %v5566_v48  ;;  %2425 = vadd.xlane.f32.xlu0 %v4175_v61  ;;  %v2894_v17 = vpack.c.bf16 %v4179_v40, %v4177_v60  ;;  %v4181_v35 = vpop.eup %4180  ;;  %v2305_v26 = vmul.f32 1.442695, %v2201_v55 }
 0x63b   : > { %v2132_v10 = vpop.permute.xlu0 %2131  ;;  %4190 = vpow2.f32 %v2303_v53  ;;  %v2216_v57 = vsub.f32 %v6308_v62, %v2128_v11 }
 0x63c   : > { %3751 = vmatpush3.bf16.xpose.msra.mxu1 %v2894_v17  ;;  %4192 = vpow2.f32 %v2333_v30  ;;  %v2217_v9 = vsub.f32 %v6309_v16, %v2132_v10  ;;  %v6314_v16 = vld [vmem:[#allocation83_spill] sm:$0xff] }
 0x63d   : > { %v4183_v56 = vpop.eup %4182  ;;  %v2335_v36 = vmul.f32 1.442695, %v2216_v57  ;;  %3752 = vmatprep.subr.bf16.mxu1 %v4481_v51  ;;  %v6313_v57 = vld [vmem:[#allocation84_spill] sm:$0xff] }
 0x63e   : > { %v2069_v42 = vpop.permute.xlu1 %2068  ;;  %2397 = vadd.xlane.f32.xlu0 %v5568_v58  ;;  %2455 = vadd.xlane.f32.xlu1 %v4177_v60  ;;  %v2887_v61 = vpack.c.bf16 %v4183_v56, %v4181_v35  ;;  %v4185_v33 = vpop.eup %4184  ;;  %v2337_v50 = vmul.f32 1.442695, %v2217_v9 }
 0x63f   : > { %v2073_v48 = vpop.permute.xlu0 %2072  ;;  %4194 = vpow2.f32 %v2335_v36  ;;  %v2202_v0 = vsub.f32 %v6310_v32, %v2069_v42 }
 0x640   : > { %3733 = vmatpush3.bf16.xpose.msra.mxu0 %v2887_v61  ;;  %4196 = vpow2.f32 %v2305_v26  ;;  %v2203_v53 = vsub.f32 %v6311_v4, %v2073_v48  ;;  %v6316_v4 = vld [vmem:[#allocation87_spill] sm:$0xff] }
 0x641   : > { %v4187_v63 = vpop.eup %4186  ;;  %v2307_v25 = vmul.f32 1.442695, %v2202_v0  ;;  %3734 = vmatprep.subr.bf16.mxu0 %v4481_v51  ;;  %v6315_v0 = vld [vmem:[#allocation90_spill] sm:$0xff] }
 0x642   : > { %v2136_v30 = vpop.permute.xlu1 %2135  ;;  %2457 = vadd.xlane.f32.xlu0 %v4179_v40  ;;  %2427 = vadd.xlane.f32.xlu1 %v4181_v35  ;;  %v2895_v60 = vpack.c.bf16 %v4187_v63, %v4185_v33  ;;  %v4189_v11 = vpop.eup %4188  ;;  %v2309_v62 = vmul.f32 1.442695, %v2203_v53 }
 0x643   : > { %v2140_v58 = vpop.permute.xlu0 %2139  ;;  %4198 = vpow2.f32 %v2307_v25  ;;  %v2218_v55 = vsub.f32 %v6312_v47, %v2136_v30 }
 0x644   : > { %3753 = vmatpush3.bf16.xpose.msra.mxu1 %v2895_v60  ;;  %4200 = vpow2.f32 %v2337_v50  ;;  %v2219_v36 = vsub.f32 %v6313_v57, %v2140_v58  ;;  %v6318_v57 = vld [vmem:[#allocation93_spill] sm:$0xff] }
 0x645   : > { %v4191_v10 = vpop.eup %4190  ;;  %v2339_v17 = vmul.f32 1.442695, %v2218_v55  ;;  %3754 = vmatprep.subr.bf16.mxu1 %v4481_v51  ;;  %v6317_v55 = vld [vmem:[#allocation94_spill] sm:$0xff] }
 0x646   : > { %v2077_v26 = vpop.permute.xlu1 %2076  ;;  %2429 = vadd.xlane.f32.xlu0 %v4183_v56  ;;  %2399 = vadd.xlane.f32.xlu1 %v5579_v54  ;;  %v2888_v35 = vpack.c.bf16 %v4191_v10, %v4189_v11  ;;  %v4193_v42 = vpop.eup %4192  ;;  %v2341_v32 = vmul.f32 1.442695, %v2219_v36 }
 0x647   : > { %v2081_v40 = vpop.permute.xlu0 %2080  ;;  %4202 = vpow2.f32 %v2339_v17  ;;  %v2204_v9 = vsub.f32 %v6314_v16, %v2077_v26 }
 0x648   : > { %3735 = vmatpush3.bf16.xpose.msra.mxu0 %v2888_v35  ;;  %4204 = vpow2.f32 %v2309_v62  ;;  %v2205_v25 = vsub.f32 %v6315_v0, %v2081_v40 }
 0x649   : > { %v5674_v48 = vpop.eup %4194  ;;  %v2311_v61 = vmul.f32 1.442695, %v2204_v9  ;;  %3736 = vmatprep.subr.bf16.mxu0 %v4481_v51  ;;  %v6319_v9 = vld [vmem:[#allocation89_spill] sm:$0xff] }
 0x64a   : > { %v2144_v50 = vpop.permute.xlu1 %2143  ;;  %2401 = vadd.xlane.f32.xlu0 %v5582_v34  ;;  %2459 = vadd.xlane.f32.xlu1 %v4185_v33  ;;  %v2896_v56 = vpack.c.bf16 %v5674_v48, %v4193_v42  ;;  %v4197_v30 = vpop.eup %4196  ;;  %v2313_v47 = vmul.f32 1.442695, %v2205_v25 }
 0x64b   : > { %v2148_v54 = vpop.permute.xlu0 %2147  ;;  %4206 = vpow2.f32 %v2311_v61  ;;  %v2220_v53 = vsub.f32 %v6316_v4, %v2144_v50 }
 0x64c   : > { %3755 = vmatpush3.bf16.xpose.msra.mxu1 %v2896_v56  ;;  %4208 = vpow2.f32 %v2341_v32  ;;  %v2221_v17 = vsub.f32 %v6317_v55, %v2148_v54 }
 0x64d   : > { %v4199_v58 = vpop.eup %4198  ;;  %v2343_v60 = vmul.f32 1.442695, %v2220_v53  ;;  %3756 = vmatprep.subr.bf16.mxu1 %v4481_v51  ;;  %v6321_v53 = vld [vmem:[#allocation92_spill] sm:$0xff] }
 0x64e   : > { %v2085_v62 = vpop.permute.xlu1 %2084  ;;  %2461 = vadd.xlane.f32.xlu0 %v4187_v63  ;;  %2431 = vadd.xlane.f32.xlu1 %v4189_v11  ;;  %v2889_v33 = vpack.c.bf16 %v4199_v58, %v4197_v30  ;;  %v4201_v26 = vpop.eup %4200  ;;  %v2345_v16 = vmul.f32 1.442695, %v2221_v17  ;;  %v6320_v11 = vld [vmem:[#allocation96_spill] sm:$0xff] }
 0x64f   : > { %v2089_v34 = vpop.permute.xlu0 %2088  ;;  %4210 = vpow2.f32 %v2343_v60  ;;  %v2206_v36 = vsub.f32 %v6318_v57, %v2085_v62 }
 0x650   : > { %3737 = vmatpush3.bf16.xpose.msra.mxu0 %v2889_v33  ;;  %4212 = vpow2.f32 %v2313_v47  ;;  %v2207_v61 = vsub.f32 %v6319_v9, %v2089_v34 }
 0x651   : > { %v4203_v40 = vpop.eup %4202  ;;  %v2315_v35 = vmul.f32 1.442695, %v2206_v36  ;;  %3738 = vmatprep.subr.bf16.mxu0 %v4481_v51 }
 0x652   : > { %v2152_v32 = vpop.permute.xlu1 %2151  ;;  %2433 = vadd.xlane.f32.xlu0 %v4191_v10  ;;  %2403 = vadd.xlane.f32.xlu1 %v5593_v13  ;;  %v2897_v63 = vpack.c.bf16 %v4203_v40, %v4201_v26  ;;  %v4205_v50 = vpop.eup %4204  ;;  %v2317_v4 = vmul.f32 1.442695, %v2207_v61  ;;  %v6322_v10 = vld [vmem:[#allocation91_spill] sm:$0xff] }
 0x653   : > { %4214 = vpow2.f32 %v2315_v35  ;;  %v2222_v0 = vsub.f32 %v6320_v11, %v2152_v32  ;;  %v2156_v25 = vpop.permute.xlu0 %2155 }
 0x654   : > { %3757 = vmatpush3.bf16.xpose.msra.mxu1 %v2897_v63  ;;  %4216 = vpow2.f32 %v2345_v16  ;;  %v2223_v60 = vsub.f32 %v6321_v53, %v2156_v25 }
 0x655   : > { %v4207_v54 = vpop.eup %4206  ;;  %v2347_v56 = vmul.f32 1.442695, %v2222_v0  ;;  %3758 = vmatprep.subr.bf16.mxu1 %v4481_v51 }
 0x656   : > { %v2093_v47 = vpop.permute.xlu1 %2092  ;;  %2405 = vadd.xlane.f32.xlu0 %v5596_v44  ;;  %2463 = vadd.xlane.f32.xlu1 %v4193_v42  ;;  %v2890_v13 = vpack.c.bf16 %v4207_v54, %v4205_v50  ;;  %v4209_v17 = vpop.eup %4208  ;;  %v2349_v33 = vmul.f32 1.442695, %v2223_v60  ;;  %v6323_v44 = vld [vmem:[#allocation95_spill] sm:$0xff] }
 0x657   : > { %4218 = vpow2.f32 %v2347_v56  ;;  %v2208_v55 = vsub.f32 %v6322_v10, %v2093_v47  ;;  %v6324_v56 = vld [vmem:[#allocation29_spill] sm:$0xff] }
 0x658   : > { %3739 = vmatpush3.bf16.xpose.msra.mxu0 %v2890_v13  ;;  %4220 = vpow2.f32 %v2317_v4 }
 0x659   : > { %v4211_v62 = vpop.eup %4210  ;;  %v2319_v34 = vmul.f32 1.442695, %v2208_v55  ;;  %3740 = vmatprep.subr.bf16.mxu0 %v4481_v51 }
 0x65a   : > { %v2160_v57 = vpop.permute.xlu1 %2159  ;;  %2465 = vadd.xlane.f32.xlu0 %v5674_v48  ;;  %2435 = vadd.xlane.f32.xlu1 %v4197_v30  ;;  %v2898_v36 = vpack.c.bf16 %v4211_v62, %v4209_v17  ;;  %v4213_v35 = vpop.eup %4212 }
 0x65b   : > { %4222 = vpow2.f32 %v2319_v34  ;;  %v2224_v42 = vsub.f32 %v6323_v44, %v2160_v57 }
 0x65c   : > { %3759 = vmatpush3.bf16.xpose.msra.mxu1 %v2898_v36  ;;  %4224 = vpow2.f32 %v2349_v33 }
 0x65d   : > { %v4215_v16 = vpop.eup %4214  ;;  %v2351_v9 = vmul.f32 1.442695, %v2224_v42  ;;  %3760 = vmatprep.subr.bf16.mxu1 %v4481_v51 }
 0x65e   : > { %2437 = vadd.xlane.f32.xlu0 %v4199_v58  ;;  %2407 = vadd.xlane.f32.xlu1 %v5605_v38  ;;  %v2891_v61 = vpack.c.bf16 %v4215_v16, %v4213_v35  ;;  %v4217_v32 = vpop.eup %4216 }
 0x65f   : > { %4226 = vpow2.f32 %v2351_v9 }
 0x660   : > { %3741 = vmatpush3.bf16.xpose.msra.mxu0 %v2891_v61 }
 0x661   : > { %v4219_v48 = vpop.eup %4218  ;;  %3742 = vmatprep.subr.bf16.mxu0 %v4481_v51 }
 0x662   : > { %2409 = vadd.xlane.f32.xlu0 %v5607_v6  ;;  %2467 = vadd.xlane.f32.xlu1 %v4201_v26  ;;  %v2899_v30 = vpack.c.bf16 %v4219_v48, %v4217_v32  ;;  %v4221_v63 = vpop.eup %4220  ;;  %v809_v6 = vpack.c.bf16 %v6324_v56, %v6324_v56  ;;  %v6325_v26 = vld [vmem:[#allocation31_spill] sm:$0xff] }
 0x664   : > { %3761 = vmatpush3.bf16.xpose.msra.mxu1 %v2899_v30 }
 0x665   : > { %v4223_v11 = vpop.eup %4222  ;;  %3762 = vmatprep.subr.bf16.mxu1 %v4481_v51  ;;  %v810_v51 = vpack.c.bf16 %v6325_v26, %v6325_v26 }
 0x666   : > { %2469 = vadd.xlane.f32.xlu0 %v4203_v40  ;;  %2439 = vadd.xlane.f32.xlu1 %v4205_v50  ;;  %v2892_v58 = vpack.c.bf16 %v4223_v11, %v4221_v63  ;;  %v4225_v38 = vpop.eup %4224 }
 0x668   : > { %3743 = vmatpush3.bf16.xpose.msra.mxu0 %v2892_v58 }
 0x669   : > { %v4227_v0 = vpop.eup %4226 }
 0x66a   : > { %2441 = vadd.xlane.f32.xlu0 %v4207_v54  ;;  %2411 = vadd.xlane.f32.xlu1 %v5618_v49  ;;  %v2900_v25 = vpack.c.bf16 %v4227_v0, %v4225_v38 }
 0x66c   : > { %3763 = vmatpush3.bf16.xpose.msra.mxu1 %v2900_v25 }
 0x66e   : > { %2413 = vadd.xlane.f32.xlu0 %v5620_v27  ;;  %2471 = vadd.xlane.f32.xlu1 %v4209_v17 }
 0x66f   : > { %3745 = vmatmul.mubr.bf16.vlgmr.msra.gmra.mrb[40].mxu0 %v809_v6 }
 0x672   : > { %2473 = vadd.xlane.f32.xlu0 %v4211_v62  ;;  %2443 = vadd.xlane.f32.xlu1 %v4213_v35 }
 0x673   : > { %3765 = vmatmul.mubr.bf16.vlgmr.msra.gmra.mrb[40].mxu1 %v810_v51 }
 0x676   : > { %2445 = vadd.xlane.f32.xlu0 %v4215_v16  ;;  %2415 = vadd.xlane.f32.xlu1 %v5631_v45 }
 0x67a   : > { %2417 = vadd.xlane.f32.xlu0 %v5633_v31  ;;  %2475 = vadd.xlane.f32.xlu1 %v4217_v32 }
 0x67e   : > { %2477 = vadd.xlane.f32.xlu0 %v4219_v48  ;;  %2447 = vadd.xlane.f32.xlu1 %v4221_v63 }
 0x682   : > { %2449 = vadd.xlane.f32.xlu1 %v4223_v11  ;;  %2479 = vadd.xlane.f32.xlu0 %v4225_v38 }
 0x686   : > { %2481 = vadd.xlane.f32.xlu1 %v4227_v0 }
 0x68c   : > { %v2356_v49 = vpop.xlane.xlu0 %2355 }
 0x68d   : > { %v2550_v4 = vrot.slane %v2356_v49, %v5225_v20 }
 0x690   : > { %v2360_v27 = vpop.xlane.xlu0 %2359 }
 0x691   : > { %v2559_v60 = vrot.slane %v2360_v27, %v5232_v23 }
 0x694   : > { %v2362_v40 = vpop.xlane.xlu0 %2361 }
 0x695   : > { %v2564_v45 = vrot.slane %v2362_v40, %v5240_v19 }
 0x698   : > { %v2364_v50 = vpop.xlane.xlu0 %2363 }
 0x699   : > { %v2358_v54 = vpop.xlane.xlu1 %2357  ;;  %v2569_v13 = vrot.slane %v2364_v50, %v5255_v21 }
 0x69a   : > { %v2554_v53 = vrot.slane %v2358_v54, %v5218_v24 }
 0x69c   : > { %v2555_v31 = vsel %vm1545_vm5, %v2554_v53, %v2550_v4  ;;  %v2368_v47 = vpop.xlane.xlu0 %2367 }
 0x69d   : > { %v2560_v10 = vsel %vm1552_vm6, %v2559_v60, %v2555_v31  ;;  %v2366_v55 = vpop.xlane.xlu1 %2365  ;;  %v2579_v34 = vrot.slane %v2368_v47, %v5252_v14 }
 0x69e   : > { %v2565_v17 = vsel %vm1559_vm7, %v2564_v45, %v2560_v10  ;;  %v2574_v62 = vrot.slane %v2366_v55, %v5269_v46 }
 0x69f   : > { %v2570_v33 = vsel %vm1566_vm8, %v2569_v13, %v2565_v17 }
 0x6a0   : > { %v2575_v57 = vsel %vm1573_vm9, %v2574_v62, %v2570_v33  ;;  %v2372_v36 = vpop.xlane.xlu0 %2371 }
 0x6a1   : > { %v2370_v44 = vpop.xlane.xlu1 %2369  ;;  %v2580_v42 = vsel %vm1580_vm10, %v2579_v34, %v2575_v57  ;;  %v2589_v16 = vrot.slane %v2372_v36, %v5277_v22 }
 0x6a2   : > { %v2584_v35 = vrot.slane %v2370_v44, %v5261_v7 }
 0x6a4   : > { %v2585_v9 = vsel %vm1587_vm11, %v2584_v35, %v2580_v42  ;;  %v2376_v61 = vpop.xlane.xlu0 %2375 }
 0x6a5   : > { %v2374_v32 = vpop.xlane.xlu1 %2373  ;;  %v2590_v48 = vsel %vm1594_vm12, %v2589_v16, %v2585_v9  ;;  %v2599_v63 = vrot.slane %v2376_v61, %v5274_v12 }
 0x6a6   : > { %v2594_v30 = vrot.slane %v2374_v32, %v5301_v39 }
 0x6a8   : > { %v2595_v11 = vsel %vm1601_vm13, %v2594_v30, %v2590_v48  ;;  %v2380_v58 = vpop.xlane.xlu0 %2379 }
 0x6a9   : > { %v2378_v38 = vpop.xlane.xlu1 %2377  ;;  %v2600_v0 = vsel %vm6326_vm15, %v2599_v63, %v2595_v11  ;;  %v2609_v56 = vrot.slane %v2380_v58, %v5319_v41 }
 0x6aa   : > { %v2604_v25 = vrot.slane %v2378_v38, %v5293_v2 }
 0x6ac   : > { %v2605_v6 = vsel %vm6327_vm14, %v2604_v25, %v2600_v0  ;;  %v2384_v26 = vpop.xlane.xlu0 %2383 }
 0x6ad   : > { %v2382_v51 = vpop.xlane.xlu1 %2381  ;;  %v2610_v49 = vsel %vm1622_vm0, %v2609_v56, %v2605_v6  ;;  %v2619_v40 = vrot.slane %v2384_v26, %v5316_v18 }
 0x6ae   : > { %v2614_v27 = vrot.slane %v2382_v51, %v5389_v5 }
 0x6b0   : > { %v2615_v50 = vsel %vm1629_vm1, %v2614_v27, %v2610_v49  ;;  %v2388_v54 = vpop.xlane.xlu0 %2387 }
 0x6b1   : > { %v2620_v4 = vsel %vm1636_vm3, %v2619_v40, %v2615_v50  ;;  %v2629_v13 = vrot.slane %v2388_v54, %v5225_v20 }
 0x6b3   : > { %v2386_v53 = vpop.xlane.xlu1 %2385 }
 0x6b4   : > { %v2624_v60 = vrot.slane %v2386_v53, %v5376_v28  ;;  %v2392_v31 = vpop.xlane.xlu0 %2391 }
 0x6b5   : > { %v2638_v55 = vrot.slane %v2392_v31, %v5232_v23 }
 0x6b6   : > { %v5739_v45 = vsel %vm1643_vm4, %v2624_v60, %v2620_v4 }
 0x6b7   : > { %v2390_v47 = vpop.xlane.xlu1 %2389 }
 0x6b8   : > { %v2633_v10 = vrot.slane %v2390_v47, %v5218_v24 }
 0x6ba   : > { %v2634_v17 = vsel %vm1545_vm5, %v2633_v10, %v2629_v13 }
 0x6bb   : > { %v2420_v62 = vpop.xlane.xlu1 %2419  ;;  %v2422_v34 = vpop.xlane.xlu0 %2421  ;;  %v2639_v33 = vsel %vm1552_vm6, %v2638_v55, %v2634_v17 }
 0x6bc   : > { %v2708_v57 = vrot.slane %v2420_v62, %v5225_v20  ;;  %v2712_v36 = vrot.slane %v2422_v34, %v5218_v24 }
 0x6be   : > { %v2713_v44 = vsel %vm1545_vm5, %v2712_v36, %v2708_v57 }
 0x6bf   : > { %v2394_v42 = vpop.xlane.xlu1 %2393  ;;  %v2424_v35 = vpop.xlane.xlu0 %2423 }
 0x6c0   : > { %v2643_v16 = vrot.slane %v2394_v42, %v5240_v19  ;;  %v2717_v9 = vrot.slane %v2424_v35, %v5232_v23 }
 0x6c2   : > { %v2644_v61 = vsel %vm1559_vm7, %v2643_v16, %v2639_v33  ;;  %v2718_v32 = vsel %vm1552_vm6, %v2717_v9, %v2713_v44  ;;  %v3086_v16 = vld [vmem:[#allocation5] sm:$0xff]  ;;  %v3087_v9 = vld [vmem:[#allocation5 + $0x8] sm:$0xff] }
 0x6c3   : > { %v2452_v48 = vpop.xlane.xlu1 %2451  ;;  %v2454_v30 = vpop.xlane.xlu0 %2453 }
 0x6c4   : > { %v2787_v36 = vrot.slane %v2452_v48, %v5225_v20  ;;  %v2791_v44 = vrot.slane %v2454_v30, %v5218_v24  ;;  %v6328_v20 = vrot.slane %v5493_v3, %v5477_v37  ;;  %v6329_v48 = vrot.slane %v5498_v43, %v5477_v37 }
 0x6c6   : > { %v3110_v24 = vmul.f32 %v6328_v20, %v3086_v16  ;;  %v3111_v30 = vmul.f32 %v6329_v48, %v3087_v9 }
 0x6c7   : > { %v2396_v63 = vpop.xlane.xlu1 %2395  ;;  %v2426_v11 = vpop.xlane.xlu0 %2425 }
 0x6c8   : > { %v2648_v42 = vrot.slane %v2396_v63, %v5255_v21  ;;  %v2722_v35 = vrot.slane %v2426_v11, %v5240_v19  ;;  %v2792_v63 = vsel %vm1545_vm5, %v2791_v44, %v2787_v36  ;;  %vm6330_vm5 = vmmov %vm6326_vm15 }
 0x6ca   : > { %v2723_v11 = vsel %vm1559_vm7, %v2722_v35, %v2718_v32 }
 0x6cb   : > { %v2456_v58 = vpop.xlane.xlu1 %2455  ;;  %v2398_v38 = vpop.xlane.xlu0 %2397 }
 0x6cc   : > { %v2653_v29 = vrot.slane %v2398_v38, %v5269_v46  ;;  %v2796_v52 = vrot.slane %v2456_v58, %v5232_v23  ;;  %v2649_v23 = vsel %vm1566_vm8, %v2648_v42, %v2644_v61 }
 0x6ce   : > { %v2654_v38 = vsel %vm1573_vm9, %v2653_v29, %v2649_v23  ;;  %v2797_v43 = vsel %vm1552_vm6, %v2796_v52, %v2792_v63  ;;  %vm6331_vm6 = vmmov %vm6327_vm14 }
 0x6cf   : > { %v5753_v0 = vpop.xlane.xlu1 %2427  ;;  %v5755_v25 = vpop.xlane.xlu0 %2457 }
 0x6d0   : > { %v2801_v3 = vrot.slane %v5755_v25, %v5240_v19 }
 0x6d3   : > { %v2400_v56 = vpop.xlane.xlu1 %2399  ;;  %v5757_v6 = vpop.xlane.xlu0 %2429 }
 0x6d4   : > { %v2658_v1 = vrot.slane %v2400_v56, %v5252_v14  ;;  %v2727_v56 = vrot.slane %v5753_v0, %v5255_v21  ;;  %v2732_v61 = vrot.slane %v5757_v6, %v5269_v46 }
 0x6d6   : > { %v2659_v36 = vsel %vm1580_vm10, %v2658_v1, %v2654_v38 }
 0x6d7   : > { %v5759_v26 = vpop.xlane.xlu1 %2459  ;;  %v2402_v51 = vpop.xlane.xlu0 %2401 }
 0x6d8   : > { %v2663_v59 = vrot.slane %v2402_v51, %v5261_v7  ;;  %v2806_v29 = vrot.slane %v5759_v26, %v5255_v21  ;;  %v2802_v26 = vsel %vm1559_vm7, %v2801_v3, %v2797_v43  ;;  %vm6332_vm7 = vmmov %vm6330_vm5 }
 0x6da   : > { %v2664_v0 = vsel %vm1587_vm11, %v2663_v59, %v2659_v36  ;;  %v2728_v59 = vsel %vm1566_vm8, %v2727_v56, %v2723_v11  ;;  %v2807_v20 = vsel %vm1566_vm8, %v2806_v29, %v2802_v26  ;;  %vm6333_vm8 = vmmov %vm6331_vm6 }
 0x6db   : > { %v5761_v49 = vpop.xlane.xlu1 %2431  ;;  %v5763_v27 = vpop.xlane.xlu0 %2461 }
 0x6dc   : > { %v2737_v52 = vrot.slane %v5761_v49, %v5252_v14  ;;  %v2811_v1 = vrot.slane %v5763_v27, %v5269_v46  ;;  %v2733_v46 = vsel %vm1573_vm9, %v2732_v61, %v2728_v59 }
 0x6de   : > { %v2738_v11 = vsel %vm1580_vm10, %v2737_v52, %v2733_v46 }
 0x6df   : > { %v2404_v40 = vpop.xlane.xlu1 %2403  ;;  %v5765_v50 = vpop.xlane.xlu0 %2433 }
 0x6e0   : > { %v2668_v58 = vrot.slane %v2404_v40, %v5277_v22  ;;  %v2742_v27 = vrot.slane %v5765_v50, %v5261_v7 }
 0x6e2   : > { %v2669_v6 = vsel %vm1594_vm12, %v2668_v58, %v2664_v0  ;;  %v2812_v58 = vsel %vm1573_vm9, %v2811_v1, %v2807_v20  ;;  %v2743_v61 = vsel %vm1587_vm11, %v2742_v27, %v2738_v11  ;;  %vm6335_vm9 = vmmov %vm6331_vm6  ;;  %v3089_v11 = vld [vmem:[#allocation5 + $0x18] sm:$0xff] }
 0x6e3   : > { %v5767_v54 = vpop.xlane.xlu1 %2463  ;;  %v2406_v4 = vpop.xlane.xlu0 %2405 }
 0x6e4   : > { %v2673_v51 = vrot.slane %v2406_v4, %v5301_v39 }
 0x6e7   : > { %v5769_v53 = vpop.xlane.xlu1 %2435  ;;  %v5771_v60 = vpop.xlane.xlu0 %2465 }
 0x6eb   : > { %v2408_v31 = vpop.xlane.xlu1 %2407  ;;  %v5773_v47 = vpop.xlane.xlu0 %2437 }
 0x6ec   : > { %v2678_v32 = vrot.slane %v2408_v31, %v5274_v12  ;;  %v2752_v50 = vrot.slane %v5773_v47, %v5301_v39  ;;  %v2821_v47 = vrot.slane %v5771_v60, %v5261_v7 }
 0x6ef   : > { %v5775_v13 = vpop.xlane.xlu1 %2467  ;;  %v2410_v10 = vpop.xlane.xlu0 %2409 }
 0x6f0   : > { %v2683_v44 = vrot.slane %v2410_v10, %v5293_v2  ;;  %v2674_v10 = vsel %vm1601_vm13, %v2673_v51, %v2669_v6  ;;  %v2816_v51 = vrot.slane %v5767_v54, %v5252_v14  ;;  %v2826_v54 = vrot.slane %v5775_v13, %v5277_v22 }
 0x6f3   : > { %v5777_v55 = vpop.xlane.xlu1 %2439  ;;  %v5779_v17 = vpop.xlane.xlu0 %2469 }
 0x6f4   : > { %v2831_v7 = vrot.slane %v5779_v17, %v5301_v39 }
 0x6f7   : > { %v5781_v62 = vpop.xlane.xlu1 %2411  ;;  %v5783_v34 = vpop.xlane.xlu0 %2441 }
 0x6f8   : > { %v2688_v31 = vrot.slane %v5781_v62, %v5319_v41  ;;  %v2679_v62 = vsel %vm6330_vm5, %v2678_v32, %v2674_v10  ;;  %v2762_v32 = vrot.slane %v5783_v34, %v5293_v2 }
 0x6f9   : > { %v2684_v48 = vsel %vm6331_vm6, %v2683_v44, %v2679_v62 }
 0x6fa   : > { %v2689_v38 = vsel %vm1622_vm0, %v2688_v31, %v2684_v48  ;;  %v3088_v48 = vld [vmem:[#allocation5 + $0x10] sm:$0xff] }
 0x6fb   : > { %v5785_v33 = vpop.xlane.xlu1 %2471  ;;  %v5787_v57 = vpop.xlane.xlu0 %2413 }
 0x6fc   : > { %v2693_v35 = vrot.slane %v5787_v57, %v5389_v5 }
 0x6ff   : > { %v5797_v15 = vpop.xlane.xlu1 %2443  ;;  %v5799_v8 = vpop.xlane.xlu0 %2473 }
 0x700   : > { %v2841_v39 = vrot.slane %v5799_v8, %v5293_v2 }
 0x702   : > { %v2935_v40 = vpop.f32.mrb[36].mxu0 }
 0x703   : > { %v3114_v19 = vadd.f32 %v3110_v24, %v2935_v40  ;;  %v3706_v25 = vpop.f32.mrb[37].mxu0  ;;  %v2416_v4 = vpop.xlane.xlu1 %2415  ;;  %v2747_v24 = vrot.slane %v5769_v53, %v5277_v22  ;;  %v2757_v53 = vrot.slane %v5777_v55, %v5274_v12  ;;  %v2767_v55 = vrot.slane %v5797_v15, %v5319_v41 }
 0x704   : > { %v2446_v42 = vpop.xlane.xlu0 %2445  ;;  %v2938_v21 = vpop.f32.mrb[38].mxu0  ;;  %v2698_v16 = vrot.slane %v2416_v4, %v5316_v18  ;;  %v2817_v25 = vsel %vm1580_vm10, %v2816_v51, %v2812_v58  ;;  %v2836_v15 = vrot.slane %v5785_v33, %v5274_v12  ;;  %vm6336_vm10 = vcmask 1042434  }
 0x705   : > { %3118 = vst [vmem:[#allocation5] sm:$0xff] %v3114_v19  ;;  %v3707_v49 = vpop.f32.mrb[39].mxu0  ;;  %v2748_v14 = vsel %vm1594_vm12, %v2747_v24, %v2743_v61  ;;  %v2772_v60 = vrot.slane %v2446_v42, %v5389_v5  ;;  %v2822_v4 = vsel %vm1587_vm11, %v2821_v47, %v2817_v25  ;;  %vm6338_vm11 = vcmask 1043459  }
 0x706   : > { %v2975_v9 = vpop.f32.mrb[36].mxu1  ;;  %v2753_v44 = vsel %vm1601_vm13, %v2752_v50, %v2748_v14  ;;  %v2827_v17 = vsel %vm1594_vm12, %v2826_v54, %v2822_v4  ;;  %v2353_v49 = vld [vmem:[#allocation4] sm:$0xf]  ;;  %v4483_v47 = vmov (!%p3494_p6), 0   ;;  %vm6343_vm12 = vcmask (!%p3494_p6), 261120   ;;  %v3192_v54 = vld [vmem:[%s6342_s2 + $0x18] sm:$0xff] (!%p3494_p6) }
 0x707   : > { %v3115_v57 = vadd.f32 %v3111_v30, %v2975_v9  ;;  %v3726_v63 = vpop.f32.mrb[37].mxu1  ;;  %v2476_v23 = vpop.xlane.xlu1 %2475  ;;  %v2694_v30 = vsel %vm1629_vm1, %v2693_v35, %v2689_v38  ;;  %v2758_v22 = vsel %vm6332_vm7, %v2757_v53, %v2753_v44  ;;  %v2832_v31 = vsel %vm1601_vm13, %v2831_v7, %v2827_v17  ;;  %4229 = vset.pattern.permute.xlu1 (!%p3494_p6), %v4483_v47  ;;  %v3189_v14 = vld [vmem:[%s6342_s2] sm:$0xff] (!%p3494_p6)  ;;  %vm6345_vm13 = vmmov (!%p3494_p6), %vm6343_vm12 }
 0x708   : > { %v2418_v56 = vpop.xlane.xlu0 %2417  ;;  %v2978_v3 = vpop.f32.mrb[38].mxu1  ;;  %v2699_v40 = vsel %vm1636_vm3, %v2698_v16, %v2694_v30  ;;  %v2763_v52 = vsel %vm6333_vm8, %v2762_v32, %v2758_v22  ;;  %v2846_v1 = vrot.slane %v2476_v23, %v5319_v41  ;;  %v6337_v16 = vld [vmem:[#allocation98_spill] sm:$0xff]  ;;  %4228 = vset.pattern.permute.xlu0 (!%p3494_p6), %v4483_v47  ;;  %v4230_v32 = vld [vmem:[#allocation11] sm:$0xff] (!%p3494_p6)  }
 0x709   : > { %3119 = vst [vmem:[#allocation5 + $0x8] sm:$0xff] %v3115_v57  ;;  %v2703_v43 = vrot.slane %v2418_v56, %v5376_v28  ;;  %v3727_v36 = vpop.f32.mrb[39].mxu1  ;;  %v2354_v9 = vmul.f32 %v6337_v16, %v2353_v49  ;;  %v6339_v57 = vld [vmem:[#allocation97_spill] sm:$0xff]  ;;  %v6340_v56 = vld [vmem:[#allocation100_spill] sm:$0xff]  ;;  %3772 = vmatprep.mubr.msk.bf16.mxu0 (!%p3494_p6), %vm6343_vm12, %v4230_v32  ;;  %3195 = vperm.xlu0 (!%p3494_p6), %4228, %v3189_v14  }
 0x70a   : > { %v3112_v63 = vmul.f32 %v6339_v57, %v3088_v48  ;;  %v3113_v3 = vmul.f32 %v6340_v56, %v3089_v11 }
 0x70b   : > { %v2704_v29 = vsel %vm1643_vm4, %v2703_v43, %v2699_v40  ;;  %v2448_v0 = vpop.xlane.xlu1 %2447  ;;  %v3191_v40 = vld [vmem:[%s6342_s2 + $0x10] sm:$0xff] (!%p3494_p6) }
 0x70c   : > { %v2863_v34 = vsel %vm1882_vm2, %v2704_v29, %v5739_v45  ;;  %v2478_v19 = vpop.xlane.xlu0 %2477  ;;  %v2777_v13 = vrot.slane %v2448_v0, %v5316_v18  ;;  %v2768_v45 = vsel %vm1622_vm0, %v2767_v55, %v2763_v52  ;;  %vm6334_vm2 = vmmov %vm6330_vm5  ;;  %3205 = vperm.xlu1 (!%p3494_p6), %4229, %v3191_v40   ;;  %v3190_v55 = vld [vmem:[%s6342_s2 + $0x8] sm:$0xff] (!%p3494_p6)  ;;  %v6344_v0 = vld [vmem:[#allocation101_spill] sm:$0xff] (!%p3494_p6) }
 0x70d   : > { %v2773_v12 = vsel %vm1629_vm1, %v2772_v60, %v2768_v45  ;;  %v2851_v33 = vrot.slane %v2478_v19, %v5389_v5  ;;  %v2837_v59 = vsel %vm6334_vm2, %v2836_v15, %v2832_v31  ;;  %3200 = vperm.xlu0 (!%p3494_p6), %4228, %v3190_v55  }
 0x70e   : > { %v2778_v2 = vsel %vm1636_vm3, %v2777_v13, %v2773_v12  ;;  %v2842_v26 = vsel %vm6335_vm9, %v2841_v39, %v2837_v59 }
 0x70f   : > { %v2450_v6 = vpop.xlane.xlu1 %2449  ;;  %v2847_v10 = vsel %vm1622_vm0, %v2846_v1, %v2842_v26  ;;  %v3280_v26 = vld [vmem:[%s4804_s5 + $0x10] sm:$0xff] (!%p3494_p6) }
 0x710   : > { %v2782_v42 = vrot.slane %v2450_v6, %v5376_v28  ;;  %v2480_v21 = vpop.xlane.xlu0 %2479  ;;  %v2852_v5 = vsel %vm1629_vm1, %v2851_v33, %v2847_v10  ;;  %3210 = vperm.xlu1 (!%p3494_p6), %4229, %v3192_v54   ;;  %v3131_v15 = vld [vmem:[#allocation5 + $0x8] sm:$0xff] (!%p3494_p6)  ;;  %v3278_v10 = vld [vmem:[%s4804_s5] sm:$0xff] (!%p3494_p6) }
 0x711   : > { %v2856_v8 = vrot.slane %v2480_v21, %v5316_v18  ;;  %v4231_v21 = vld [vmem:[#allocation11 + $0x8] sm:$0xff] (!%p3494_p6)  }
 0x712   : > { %v2783_v41 = vsel %vm1643_vm4, %v2782_v42, %v2778_v2 }
 0x713   : > { %v2864_v35 = vsel %vm6336_vm10, %v2783_v41, %v2863_v34  ;;  %v2482_v46 = vpop.xlane.xlu1 %2481  ;;  %v2857_v62 = vsel %vm1636_vm3, %v2856_v8, %v2852_v5  ;;  %v3130_v34 = vld [vmem:[#allocation5] sm:$0xff] (!%p3494_p6)  ;;  %v3281_v5 = vld [vmem:[%s4804_s5 + $0x18] sm:$0xff] (!%p3494_p6) }
 0x714   : > { %v2861_v27 = vrot.slane %v2482_v46, %v5376_v28 }
 0x716   : > { %v2862_v18 = vsel %vm1643_vm4, %v2861_v27, %v2857_v62 }
 0x717   : > { %v2865_v20 = vsel %vm6338_vm11, %v2862_v18, %v2864_v35  ;;  %v3279_v18 = vld [vmem:[%s4804_s5 + $0x8] sm:$0xff] (!%p3494_p6) }
 0x718   : > { %v2867_v24 = vadd.f32 %v2865_v20, %v2354_v9 }
 0x71a   : > { %2868 = vst [vmem:[#allocation4] sm:$0xf] %v2867_v24 }
 0x721   : > { %v3127_v61 = vld [vmem:[#allocation4] sm:$0xf] (!%p3494_p6) }
 0x722   : > { %4232 = vrcp.f32 (!%p3494_p6), %v3127_v61 }
 0x72c   : > { %v4233_v29 = vpop.eup (!%p3494_p6), %4232 }
 0x72d   : > { %v3141_v44 = vrot.slane (!%p3494_p6), %v4233_v29, %v6344_v0 }
 0x72f   : > { %v3142_v7 = vcombine.high (!%p3494_p6), %v3141_v44, %v3141_v44  ;;  %v3149_v60 = vrot.slane (!%p3494_p6), %v3141_v44, %v6344_v0 }
 0x731   : > { %v3156_v19 = vrot.slane (!%p3494_p6), %v3142_v7, %v6344_v0  ;;  %v3162_v25 = vrot.slane (!%p3494_p6), %v3149_v60, %v5477_v37  ;;  %v3157_v22 = vcombine.high (!%p3494_p6), %v3149_v60, %v3149_v60 }
 0x733   : > { %v3166_v4 = vrot.slane (!%p3494_p6), %v3156_v19, %v5477_v37  ;;  %v3179_v52 = vmul.f32 (!%p3494_p6), %v3162_v25, %v3130_v34  ;;  %v3158_v39 = vcombine.high (!%p3494_p6), %v3156_v19, %v3156_v19  ;;  %v3170_v17 = vrot.slane (!%p3494_p6), %v3157_v22, %v5477_v37 }
 0x735   : > { %v3180_v1 = vmul.f32 (!%p3494_p6), %v3166_v4, %v3131_v15  ;;  %v3174_v6 = vrot.slane (!%p3494_p6), %v3158_v39, %v5477_v37 }
 0x737   : > { %v3187_v12 = vpack.c.bf16 (!%p3494_p6), %v3180_v1, %v3179_v52 }
 0x739   : > { %3768 = vmatprep.subr.bf16.mxu0 (!%p3494_p6), %v3187_v12 }
 0x73a   : > { %3769 = vmatpush3.bf16.msra.mxu0 (!%p3494_p6), %v3187_v12 }
 0x742   : > { %v3015_v23 = vpop.f32.mrb[40].mxu0 }
 0x743   : > { %v3116_v58 = vadd.f32 %v3112_v63, %v3015_v23  ;;  %v3746_v50 = vpop.f32.mrb[41].mxu0  ;;  %3126 = sbr.rel (%p3494_p6) target bundleno = 2101 (0x835), region = 68 }
 0x744   : > { %v3018_v38 = vpop.f32.mrb[42].mxu0 }
 0x745   : > { %3120 = vst [vmem:[#allocation5 + $0x10] sm:$0xff] %v3116_v58  ;;  %v3747_v28 = vpop.f32.mrb[43].mxu0 }
 0x746   : > { %v3055_v51 = vpop.f32.mrb[40].mxu1 }
 0x747   : > { %v3117_v53 = vadd.f32 %v3113_v3, %v3055_v51  ;;  %v3766_v30 = vpop.f32.mrb[41].mxu1 }
 0x748   : > { %v3058_v43 = vpop.f32.mrb[42].mxu1 }
 0x749   : > { %3121 = vst [vmem:[#allocation5 + $0x18] sm:$0xff] %v3117_v53  ;;  %v3767_v36 = vpop.f32.mrb[43].mxu1 }
 0x74c   : > { %v3132_v13 = vld [vmem:[#allocation5 + $0x10] sm:$0xff] }
 0x74d   : > { %v3181_v31 = vmul.f32 %v3170_v17, %v3132_v13 }
 0x750   : > { %v3133_v45 = vld [vmem:[#allocation5 + $0x18] sm:$0xff] }
 0x751   : > { %v3182_v33 = vmul.f32 %v3174_v6, %v3133_v45 }
 0x753   : > { %v3188_v42 = vpack.c.bf16 %v3182_v33, %v3181_v31 }
 0x755   : > { %3770 = vmatprep.subr.bf16.mxu0 %v3188_v42 }
 0x756   : > { %3771 = vmatpush3.bf16.msra.mxu0 %v3188_v42 }
 0x759   : > { %3773 = vmatmul.mubr.msk.bf16.vlgmr.msra.gmra.mrb[0].mxu0 %vm6345_vm13, %v4231_v21 }
 0x788   : > { %v3196_v2 = vpop.permute.xlu0 %3195 }
 0x78b   : > { %v3206_v59 = vpop.permute.xlu1 %3205 }
 0x78c   : > { %v3201_v27 = vpop.permute.xlu0 %3200 }
 0x78f   : > { %v3211_v35 = vpop.permute.xlu1 %3210 }
 0x82c   : > { %v3774_v8 = vpop.f32.mrb[0].mxu0 }
 0x82d   : > { %v3272_v37 = vadd.f32 %v3774_v8, %v3206_v59  ;;  %v3263_v41 = vpop.f32.mrb[1].mxu0 }
 0x82e   : > { %v3264_v49 = vadd.f32 %v3263_v41, %v3196_v2  ;;  %v3775_v46 = vpop.f32.mrb[2].mxu0 }
 0x82f   : > { %v3284_v62 = vadd.f32 %v3280_v26, %v3272_v37  ;;  %v3275_v16 = vadd.f32 %v3775_v46, %v3211_v35  ;;  %v3266_v9 = vpop.f32.mrb[3].mxu0 }
 0x830   : > { %v3282_v20 = vadd.f32 %v3278_v10, %v3264_v49  ;;  %v3267_v24 = vadd.f32 %v3266_v9, %v3201_v27 }
 0x831   : > { %3288 = vst [vmem:[%s4822_s25 + $0x10] sm:$0xff] %v3284_v62  ;;  %v3285_v48 = vadd.f32 %v3281_v5, %v3275_v16 }
 0x832   : > { %3286 = vst [vmem:[%s4822_s25] sm:$0xff] %v3282_v20  ;;  %v3283_v57 = vadd.f32 %v3279_v18, %v3267_v24 }
 0x833   : > { %3289 = vst [vmem:[%s4822_s25 + $0x18] sm:$0xff] %v3285_v48 }
 0x834   : > { %3287 = vst [vmem:[%s4822_s25 + $0x8] sm:$0xff] %v3283_v57 }
 0x835 PF: > { %s6346_s8 = sld [smem:[#allocation21_spill]]  ;;  %s6347_s14 = sld [smem:[#allocation20_spill]] }
 0x836   : > { %s3305_s23 = sshll.u32 %s4822_s25, 4  ;;  %s6349_s24 = sld [smem:[#allocation108_spill]]  ;;  %s5940_s23 = int_to_ptr.vmem [resolvable:$true] %s3305_s23 }
 0x837   : > { %s3291_s9 = scalar_lea.sflag [#allocation8], %s4800_s18  ;;  %s4322_s0 = scalar_lea.vmem %s5940_s23, 512 }
 0x838   : > { %p4323_p8 = scmp.ne.s32.totalorder %s5940_s23, %s4322_s0 }
 0x83a   : > { %p4324_p11 = pnand %p4323_p8, %p4684_p13 }
 0x83b   : > { %s3500_s6 = sshll.u32 %s6346_s8, 3  ;;  %s4484_s8 = smov [#allocation12]  }
 0x83c   : > { %s3302_s15 = sadd.s32 %s6347_s14, %s3500_s6  ;;  %s6350_s20 = smov %s6349_s24 }
 0x83d   : > { %s3501_s3 = sshll.u32 %s3302_s15, 7  ;;  %p4325_p12 = pneg %p4324_p11 }
 0x83e   : > { %s5945_s27 = scalar_lea.hbm %s6349_s24, %s3501_s3  ;;  %s4326_s14 = sshll.u32 %s4484_s8, 4  ;;  %s4327_s14 = int_to_ptr.vmem [resolvable:$false] %s4326_s14 }
 0x83f   : > { %s4328_s25 = scalar_lea.vmem %s4327_s14, 1024  ;;  %p4329_p1 = scmp.lt.s32.totalorder %s5940_s23, %s4327_s14 }
 0x840   : > { %p4330_p9 = scmp.lt.s32.totalorder %s4328_s25, %s4322_s0 }
 0x842   : > { %p4331_p10 = por %p4330_p9, %p4329_p1 }
 0x844   : > { %p4332_p2 = pnand %p4331_p10, %p4325_p12 }
 0x846   : > { %4335 = shalt.err (!%p4332_p2)
}
 0x847   : > { %s4336_s6 = scalar_lea.hbm %s5945_s27, 512  ;;  %s4340_s5 = scalar_lea.hbm %s6350_s20, 2048 }
 0x848   : > { %p4337_p4 = scmp.ne.s32.totalorder %s5945_s27, %s4336_s6  ;;  %p4341_p0 = scmp.lt.u32.totalorder %s5945_s27, %s6350_s20 }
 0x849   : > { %p4342_p5 = scmp.lt.u32.totalorder %s4340_s5, %s4336_s6  ;;  %p4344_p8 = scmp.lt.u32.totalorder %s4336_s6, %s5945_s27 }
 0x84a   : > { %p4338_p7 = pnand %p4337_p4, %p4684_p13 }
 0x84b   : > { %p4343_p6 = por %p4342_p5, %p4341_p0 }
 0x84c   : > { %p4339_p3 = pneg %p4338_p7 }
 0x84d   : > { %p4345_p11 = por %p4344_p8, %p4343_p6 }
 0x84f   : > { %p4346_p12 = pnand %p4345_p11, %p4339_p3 }
 0x851   : > { %4349 = shalt.err (!%p4346_p12)
}
 0x852   : > { %s4485_s0 = smov 128   ;;  %s4486_s8 = smov 256  }
 0x853   : > { %s4487_s14 = smov 8  }
 0x854   : > { %3788 = dma.vmem_to_hbm [thread:$0]  (%p4684_p13), %s5940_s23, 512, %s5945_s27, %s3291_s9, %s4485_s0, %s4486_s8, %s4487_s14  }
 0x855 PF: > { %s6351_s25 = sld [smem:[#allocation18_spill]]  ;;  %s6352_s15 = sld [smem:[#allocation25_spill]] }
 0x856   : > { %p3808_p1 = scmp.ge.s32.totalorder %s4468_s13, 2 }
 0x85b   : > { %s3320_s3 = sand.u32 1, %s6351_s25   ;;  %p6353_p9 = scmp.ne.s32.totalorder %s6352_s15, 0 }
 0x85c   : > { %s3321_s6 = scalar_lea.sflag [#allocation8], %s3320_s3 }
 0x85d   : > { %p3802_p10 = pnand %p3808_p1, %p6353_p9 }
 0x85f   : > { %4415 = dma.done.wait (!%p3802_p10), %s3321_s6, 512  }
 0x860   : > { %4417 = vsyncadd (!%p3802_p10), %s3321_s6, 4294966784  ;;  %s26_s13 = sadd.s32 1, %s4468_s13   ;;  %s6355_s24 = sld [smem:[#allocation17_spill]] }
 0x861   : > { %p5976_p2 = scmp.ge.s32.totalorder %s26_s13, 10   ;;  %s6356_s18 = sld [smem:[#allocation26_spill]] }
 0x862   : > { %s6357_s23 = sld [smem:[#allocation28_spill]]  ;;  %s6358_s25 = smov %s4428_s26 }
 0x863   : > { %s6359_s26 = smov %s4711_s19  ;;  %s6360_s27 = smov %s4436_s28 }
 0x864   : > { %s6361_s28 = smov %s4440_s29  ;;  %s6362_s29 = smov %s4708_s16 }
 0x865   : > { %s6363_s30 = smov %s4456_s10  ;;  %s6364_s8 = smov %s4460_s11 }
 0x866   : > { %s6365_s9 = smov %s4464_s12  ;;  %s6368_s12 = smov %s6378_s21 }
 0x867   : > { %s6366_s10 = smov %s6356_s18  ;;  %25 = sbr.rel (!%p5976_p2) target bundleno = 20 (0x14), region = 118 }
 0x868   : > { %s6367_s11 = smov %s6357_s23 }
 0x86e   :  { %3326 = vsyncpa [#allocation7], 1 }
 0x86f   :  { %3328 = vsyncpa [#allocation7 + $0x1], 1 }
 0x870   :  { %3329 = vsyncpa [#allocation10], 1 }
 0x871   :  { %3331 = vsyncpa [#allocation10 + $0x1], 1 }
 0x872   :  { %3332 = vsyncpa [#allocation8], 1 }
 0x873   :  { %3334 = vsyncpa [#allocation8 + $0x1], 1 }

</bundles_post_ra>
